<compile_context>
chip_gen: v7x
topology: tpu7x:2x2x1
jax: 0.10.0
libtpu: 0.0.40
codegen_flags: <defaults>
</compile_context>

<pallas_src>
import math

import numpy as np
import jax
import jax.numpy as jnp
from jax.experimental import pallas as pl

# ----------------------- model config (small, consistent with the module) -----------------------
VOCAB = 16          # target_vocab_size
EMBED = 64          # embed_dim
SEQ = 8             # seq_len
N_HEADS = 8         # n_heads (hard-coded to 8 inside DecoderBlock)
HEAD_DIM = EMBED // N_HEADS
N_LAYERS = 2
EXPANSION = 4
BATCH = 2

# packed-array row offsets (vec64 stack)
_EMB_OFF = 0
_PE_OFF = VOCAB
_LVEC_OFF = VOCAB + BATCH * SEQ     # per-layer bias/LN rows start here (9 rows per layer)
_BLK_IDX = 4 * N_LAYERS             # index of the head-selector matrix inside the w64 stack


# ------------------------------------- fused Pallas kernel --------------------------------------
def _fused_decoder_kernel(tok_ref, enc_ref, mask_ref,
                          w64_ref, w256_ref, w2_ref, vec64_ref, vec256_ref,
                          out_ref):
    B, S, D, H, d, V = BATCH, SEQ, EMBED, N_HEADS, HEAD_DIM, VOCAB
    BS = B * S
    scale = 1.0 / math.sqrt(d)

    def vrow(ref, i):                       # (1, width) static row read
        return ref[i:i + 1, :]

    enc = enc_ref[...]                      # (BS, D) encoder output (flattened)
    blk = w64_ref[_BLK_IDX]                 # (D, H*S) block-diag head selector (ones on 8x8 blocks)

    # Causal-mask additive bias, computed ONCE and tiled to the wide (S, H*S) score layout.
    mask_bias = jnp.where(mask_ref[...] == 0.0, -1e20, 0.0)          # (S, S)
    mask_bias_wide = jnp.concatenate([mask_bias] * H, axis=1)        # (S, H*S)

    def layer_norm(v, g, b, eps=1e-5):
        mean = jnp.mean(v, axis=-1, keepdims=True)
        var = jnp.mean((v - mean) ** 2, axis=-1, keepdims=True)      # biased variance (PyTorch)
        return (v - mean) * jax.lax.rsqrt(var + eps) * g + b

    def attention(q, k, v, bias_wide):
        """Multi-head attention on 'concat'-layout (BS, D) tensors, returns (BS, D).

        Head h lives in lane block [h*d, (h+1)*d).  All heads of one batch are handled with
        three lane-dense MXU matmuls via the static block-diagonal selector `blk`
        (off-block products are exact zeros -> identical math to per-head attention).
        Relies on HEAD_DIM == SEQ (asserted in __main__).
        """
        outs = []
        for b in range(B):
            r0 = b * S
            qb = q[r0:r0 + S, :]                                     # (S, D)
            kb = k[r0:r0 + S, :]
            vb = v[r0:r0 + S, :]
            # per-head K^T arranged block-diagonally: (D, H*S)
            z = jnp.concatenate([kb.T] * H, axis=1) * blk
            s = jnp.dot(qb, z, preferred_element_type=jnp.float32)   # (S, H*S) all-head scores
            if bias_wide is not None:
                s = s + bias_wide                                    # masked_fill BEFORE the scale
            s = s * scale
            # row-constant shift (same constant within every head group -> softmax invariant)
            s = s - jnp.max(s, axis=-1, keepdims=True)
            e = jnp.exp(s)
            denom = jnp.dot(e, blk, preferred_element_type=jnp.float32)   # per-head sums, broadcast
            p = e * pl.reciprocal(denom, approx=True)
            # per-head V arranged block-diagonally: (H*S, D); output lands in concat layout.
            w = jnp.concatenate([vb] * H, axis=0) * blk
            outs.append(jnp.dot(p, w, preferred_element_type=jnp.float32))    # (S, D)
        return jnp.concatenate(outs, axis=0)                          # (BS, D)

    # ---- word embedding (one-hot matmul gather) + positional encoding, fused into the kernel
    tok = tok_ref[...]                                                # (BS, 1) int32
    onehot = (jax.lax.broadcasted_iota(jnp.int32, (BS, V), 1) == tok).astype(jnp.float32)
    emb = vec64_ref[_EMB_OFF:_EMB_OFF + V, :]                         # (V, D), pre-scaled by sqrt(D)
    pe = vec64_ref[_PE_OFF:_PE_OFF + BS, :]                           # (BS, D), batch-tiled
    hidden = jnp.dot(onehot, emb, preferred_element_type=jnp.float32) + pe   # dropout: identity

    for l in range(N_LAYERS):
        wk_s = w64_ref[4 * l + 0]
        wo_s = w64_ref[4 * l + 1]
        wk_c = w64_ref[4 * l + 2]
        wo_c = w64_ref[4 * l + 3]
        w1 = w256_ref[l]                                              # (D, 4D)
        w2 = w2_ref[l]                                                # (4D, D)
        vb0 = _LVEC_OFF + 9 * l
        bo_s, ln_g, ln_b = vrow(vec64_ref, vb0 + 0), vrow(vec64_ref, vb0 + 1), vrow(vec64_ref, vb0 + 2)
        bo_c, ln1_g, ln1_b = vrow(vec64_ref, vb0 + 3), vrow(vec64_ref, vb0 + 4), vrow(vec64_ref, vb0 + 5)
        b2, ln2_g, ln2_b = vrow(vec64_ref, vb0 + 6), vrow(vec64_ref, vb0 + 7), vrow(vec64_ref, vb0 + 8)
        b1 = vrow(vec256_ref, l)                                      # (1, 4D)

        # ---- DecoderBlock self-attention: MHA(enc, enc, enc, mask); q=k=v share w_k -> 1 matmul
        p_self = jnp.dot(enc, wk_s, preferred_element_type=jnp.float32)
        ctx = attention(p_self, p_self, p_self, mask_bias_wide)
        attn_out = jnp.dot(ctx, wo_s, preferred_element_type=jnp.float32) + bo_s
        value = layer_norm(attn_out + enc, ln_g, ln_b)                # dropout: identity

        # ---- TransformerBlock cross-attention: key=enc, query=hidden, value=value;
        #      all three share wk_c -> ONE fused (3*BS, D) @ (D, D) projection
        qkv = jnp.dot(jnp.concatenate([hidden, enc, value], axis=0), wk_c,
                      preferred_element_type=jnp.float32)             # (3*BS, D)
        ctx2 = attention(qkv[0:BS, :], qkv[BS:2 * BS, :], qkv[2 * BS:3 * BS, :], None)
        attn2 = jnp.dot(ctx2, wo_c, preferred_element_type=jnp.float32) + bo_c
        norm1 = layer_norm(attn2 + value, ln1_g, ln1_b)               # dropout1: identity

        # ---- feed-forward + residual + LayerNorm (intermediate never leaves vregs/VMEM)
        ff1 = jnp.maximum(jnp.dot(norm1, w1, preferred_element_type=jnp.float32) + b1, 0.0)
        ff2 = jnp.dot(ff1, w2, preferred_element_type=jnp.float32) + b2
        hidden = layer_norm(ff2 + norm1, ln2_g, ln2_b)                # dropout2: identity

    # ---- final vocab projection (lane-dense zero-padded weights) + exact softmax over VOCAB
    wfc = w256_ref[N_LAYERS]                                          # (D, 4D), cols >= V are zero
    bfc = vrow(vec256_ref, N_LAYERS)                                  # (1, 4D), cols >= V are zero
    logits = (jnp.dot(hidden, wfc, preferred_element_type=jnp.float32) + bfc)[:, :V]
    z = logits - jnp.max(logits, axis=-1, keepdims=True)
    e = jnp.exp(z)
    out_ref[...] = e / jnp.sum(e, axis=-1, keepdims=True)


# --------------------------- host-side parameter packing (done ONCE) ----------------------------
def _head_block_diag(w_k):
    """kron(I_H, w_k.T): per-head nn.Linear(w_k) as one lane-dense (D, D) matmul."""
    return jnp.kron(jnp.eye(N_HEADS, dtype=jnp.float32), w_k.T)


def pack_params(params):
    """Pack the param pytree into 5 stacked arrays so the kernel does few, large DMAs."""
    D, V, S, B, H, d = EMBED, VOCAB, SEQ, BATCH, N_HEADS, HEAD_DIM

    w64_list, w256_list, w2_list, vec64_rows, vec256_rows = [], [], [], [], []

    vec64_rows.append(params["emb"] * math.sqrt(D))                # rows 0..V-1: pre-scaled embedding
    vec64_rows.append(jnp.tile(params["pe"][:S], (B, 1)))          # rows V..V+B*S-1: tiled PE

    for lp in params["layers"]:
        tb = lp["tblock"]
        w64_list += [_head_block_diag(lp["self_attn"]["w_k"]),     # wk_s
                     lp["self_attn"]["w_out"].T,                   # wo_s
                     _head_block_diag(tb["attn"]["w_k"]),          # wk_c
                     tb["attn"]["w_out"].T]                        # wo_c
        w256_list.append(tb["w_ff1"].T)                            # (D, 4D)
        w2_list.append(tb["w_ff2"].T)                              # (4D, D)
        vec64_rows.append(jnp.stack([
            lp["self_attn"]["b_out"], lp["ln_g"], lp["ln_b"],
            tb["attn"]["b_out"], tb["ln1_g"], tb["ln1_b"],
            tb["b_ff2"], tb["ln2_g"], tb["ln2_b"]], axis=0))       # (9, D)
        vec256_rows.append(tb["b_ff1"])                            # (4D,)

    # static block-diagonal head selector (ones on 8x8 diagonal blocks); used for scores/denominator/
    # value packing inside the kernel -- valid because HEAD_DIM == SEQ.
    blk = jnp.kron(jnp.eye(H, dtype=jnp.float32), jnp.ones((d, S), jnp.float32))
    w64_list.append(blk)

    wfc_pad = jnp.zeros((D, EXPANSION * D), jnp.float32).at[:, :V].set(params["w_fc"].T)
    bfc_pad = jnp.zeros((EXPANSION * D,), jnp.float32).at[:V].set(params["b_fc"])
    w256_list.append(wfc_pad)
    vec256_rows.append(bfc_pad)

    return {
        "w64": jnp.stack(w64_list, axis=0),                        # (4*L+1, 64, 64)
        "w256": jnp.stack(w256_list, axis=0),                      # (L+1, 64, 256)
        "w2": jnp.stack(w2_list, axis=0),                          # (L, 256, 64)
        "vec64": jnp.concatenate(vec64_rows, axis=0),              # (V + B*S + 9*L, 64)
        "vec256": jnp.stack(vec256_rows, axis=0),                  # (L+1, 256)
    }


# ----------------------------------- wrapper (thin JAX glue) ------------------------------------
def transformer_decoder(x_tokens, enc_out, mask, packed):
    B, S = x_tokens.shape
    tok = x_tokens.reshape(B * S, 1).astype(jnp.int32)
    enc = enc_out.reshape(B * S, EMBED).astype(jnp.float32)

    probs = pl.pallas_call(
        _fused_decoder_kernel,
        out_shape=jax.ShapeDtypeStruct((B * S, VOCAB), jnp.float32),
        # No grid: single invocation on one TensorCore, all inputs/activations VMEM-resident.
    )(tok, enc, mask.astype(jnp.float32),
      packed["w64"], packed["w256"], packed["w2"], packed["vec64"], packed["vec256"])
    return probs.reshape(B, S, VOCAB)


transformer_decoder_jit = jax.jit(transformer_decoder)


# --------------------------------- deterministic parameter init ---------------------------------
def positional_encoding_table(max_seq_len, embed_dim):
    pe = np.zeros((max_seq_len, embed_dim), np.float32)
    for pos in range(max_seq_len):
        for i in range(0, embed_dim, 2):
            pe[pos, i] = math.sin(pos / 10000 ** (2 * i / embed_dim))
            pe[pos, i + 1] = math.cos(pos / 10000 ** (2 * (i + 1) / embed_dim))
    return jnp.asarray(pe)


def init_params(key):
    keys = iter(jax.random.split(key, 128))

    def nrm(shape, scale=0.02):
        return jax.random.normal(next(keys), shape, jnp.float32) * scale

    def attn_params():
        # query_matrix / value_matrix exist in the module but are unused in forward -> omitted.
        return {
            "w_k": nrm((HEAD_DIM, HEAD_DIM)),
            "w_out": nrm((EMBED, EMBED)),
            "b_out": nrm((EMBED,)),
        }

    def layer_params():
        return {
            "self_attn": attn_params(),
            "ln_g": jnp.ones((EMBED,), jnp.float32),
            "ln_b": jnp.zeros((EMBED,), jnp.float32),
            "tblock": {
                "attn": attn_params(),
                "ln1_g": jnp.ones((EMBED,), jnp.float32),
                "ln1_b": jnp.zeros((EMBED,), jnp.float32),
                "ln2_g": jnp.ones((EMBED,), jnp.float32),
                "ln2_b": jnp.zeros((EMBED,), jnp.float32),
                "w_ff1": nrm((EXPANSION * EMBED, EMBED)),
                "b_ff1": nrm((EXPANSION * EMBED,)),
                "w_ff2": nrm((EMBED, EXPANSION * EMBED)),
                "b_ff2": nrm((EMBED,)),
            },
        }

    return {
        "emb": nrm((VOCAB, EMBED), scale=1.0),
        "pe": positional_encoding_table(SEQ, EMBED),
        "layers": [layer_params() for _ in range(N_LAYERS)],
        "w_fc": nrm((VOCAB, EMBED)),
        "b_fc": nrm((VOCAB,)),
    }


# -------------------------------------------- main -----------------------------------------------
if __name__ == "__main__":
    # The in-kernel block-diagonal attention trick shares one selector matrix for scores/values/
    # denominators; that requires HEAD_DIM == SEQ (true for this config: 64/8 == 8).
    assert HEAD_DIM == SEQ and N_HEADS * SEQ == EMBED

    root = jax.random.PRNGKey(0)
    pkey, tkey, ekey = jax.random.split(root, 3)

    params = init_params(pkey)
    packed = pack_params(params)                                   # packed once, outside jit

    x_tokens = jax.random.randint(tkey, (BATCH, SEQ), 0, VOCAB, dtype=jnp.int32)
    enc_out = jax.random.normal(ekey, (BATCH, SEQ, EMBED), jnp.float32)
    mask = jnp.tril(jnp.ones((SEQ, SEQ), jnp.float32))             # causal decoder mask

    out = transformer_decoder_jit(x_tokens, enc_out, mask, packed)
    out = jax.block_until_ready(out)

    assert out.shape == (BATCH, SEQ, VOCAB), out.shape
    assert bool(jnp.all(jnp.isfinite(out)))
    row_sums = jnp.sum(out, axis=-1)
    assert bool(jnp.all(jnp.abs(row_sums - 1.0) < 1e-3))
    print("KERNEL_OK")
</pallas_src>

<mosaic_0001>
module attributes {stable_mosaic.version = 11 : i64} {
  func.func @_fused_decoder_kernel(%arg0: memref<16x1xi32, #tpu.memory_space<vmem>>, %arg1: memref<16x64xf32, #tpu.memory_space<vmem>>, %arg2: memref<8x8xf32, #tpu.memory_space<vmem>>, %arg3: memref<9x64x64xf32, #tpu.memory_space<vmem>>, %arg4: memref<3x64x256xf32, #tpu.memory_space<vmem>>, %arg5: memref<2x256x64xf32, #tpu.memory_space<vmem>>, %arg6: memref<50x64xf32, #tpu.memory_space<vmem>>, %arg7: memref<3x256xf32, #tpu.memory_space<vmem>>, %arg8: memref<16x16xf32, #tpu.memory_space<vmem>>) attributes {dimension_semantics = [], scalar_prefetch = 0 : i64, scratch_operands = 0 : i64, tpu.core_type = #tpu.core_type<tc>} {
    %c0 = arith.constant 0 : index
    %c0_0 = arith.constant 0 : index
    %0 = vector.load %arg1[%c0, %c0_0] : memref<16x64xf32, #tpu.memory_space<vmem>>, vector<16x64xf32>
    %c8 = arith.constant 8 : index
    %c0_1 = arith.constant 0 : index
    %c0_2 = arith.constant 0 : index
    %1 = vector.load %arg3[%c8, %c0_1, %c0_2] : memref<9x64x64xf32, #tpu.memory_space<vmem>>, vector<1x64x64xf32>
    %2 = vector.shape_cast %1 : vector<1x64x64xf32> to vector<64x64xf32>
    %c0_3 = arith.constant 0 : index
    %c0_4 = arith.constant 0 : index
    %3 = vector.load %arg2[%c0_3, %c0_4] : memref<8x8xf32, #tpu.memory_space<vmem>>, vector<8x8xf32>
    %cst = arith.constant 0.000000e+00 : f32
    %4 = vector.broadcast %cst : f32 to vector<8x8xf32>
    %5 = arith.cmpf oeq, %3, %4 : vector<8x8xf32>
    %cst_5 = arith.constant -1.000000e+20 : f32
    %cst_6 = arith.constant 0.000000e+00 : f32
    %6 = vector.broadcast %cst_5 : f32 to vector<8x8xf32>
    %7 = vector.broadcast %cst_6 : f32 to vector<8x8xf32>
    %8 = arith.select %5, %6, %7 : vector<8x8xi1>, vector<8x8xf32>
    %9 = tpu.concatenate %8, %8, %8, %8, %8, %8, %8, %8 in 1 : vector<8x8xf32>, vector<8x8xf32>, vector<8x8xf32>, vector<8x8xf32>, vector<8x8xf32>, vector<8x8xf32>, vector<8x8xf32>, vector<8x8xf32> -> vector<8x64xf32>
    %c0_7 = arith.constant 0 : index
    %c0_8 = arith.constant 0 : index
    %10 = vector.load %arg0[%c0_7, %c0_8] : memref<16x1xi32, #tpu.memory_space<vmem>>, vector<16x1xi32>
    %11 = tpu.iota {dimensions = array<i32: 1>} : vector<16x16xi32>
    %12 = vector.broadcast %10 : vector<16x1xi32> to vector<16x16xi32>
    %13 = arith.cmpi eq, %11, %12 : vector<16x16xi32>
    %14 = arith.extui %13 : vector<16x16xi1> to vector<16x16xi32>
    %15 = arith.sitofp %14 : vector<16x16xi32> to vector<16x16xf32>
    %c0_9 = arith.constant 0 : index
    %c0_10 = arith.constant 0 : index
    %16 = vector.load %arg6[%c0_9, %c0_10] : memref<50x64xf32, #tpu.memory_space<vmem>>, vector<16x64xf32>
    %c16 = arith.constant 16 : index
    %c0_11 = arith.constant 0 : index
    %17 = vector.load %arg6[%c16, %c0_11] : memref<50x64xf32, #tpu.memory_space<vmem>>, vector<16x64xf32>
    %cst_12 = arith.constant dense<0.000000e+00> : vector<16x64xf32>
    %18 = tpu.matmul %15, %16, %cst_12 {dimension_numbers = #tpu.dot_dimension_numbers<[1], [0], [0], [1], [0, 0, 1, 1], [], []>} : vector<16x16xf32>, vector<16x64xf32>, vector<16x64xf32> -> vector<16x64xf32>
    %19 = arith.addf %18, %17 : vector<16x64xf32>
    %c0_13 = arith.constant 0 : index
    %c0_14 = arith.constant 0 : index
    %c0_15 = arith.constant 0 : index
    %20 = vector.load %arg3[%c0_13, %c0_14, %c0_15] : memref<9x64x64xf32, #tpu.memory_space<vmem>>, vector<1x64x64xf32>
    %21 = vector.shape_cast %20 : vector<1x64x64xf32> to vector<64x64xf32>
    %c1 = arith.constant 1 : index
    %c0_16 = arith.constant 0 : index
    %c0_17 = arith.constant 0 : index
    %22 = vector.load %arg3[%c1, %c0_16, %c0_17] : memref<9x64x64xf32, #tpu.memory_space<vmem>>, vector<1x64x64xf32>
    %23 = vector.shape_cast %22 : vector<1x64x64xf32> to vector<64x64xf32>
    %c2 = arith.constant 2 : index
    %c0_18 = arith.constant 0 : index
    %c0_19 = arith.constant 0 : index
    %24 = vector.load %arg3[%c2, %c0_18, %c0_19] : memref<9x64x64xf32, #tpu.memory_space<vmem>>, vector<1x64x64xf32>
    %25 = vector.shape_cast %24 : vector<1x64x64xf32> to vector<64x64xf32>
    %c3 = arith.constant 3 : index
    %c0_20 = arith.constant 0 : index
    %c0_21 = arith.constant 0 : index
    %26 = vector.load %arg3[%c3, %c0_20, %c0_21] : memref<9x64x64xf32, #tpu.memory_space<vmem>>, vector<1x64x64xf32>
    %27 = vector.shape_cast %26 : vector<1x64x64xf32> to vector<64x64xf32>
    %c0_22 = arith.constant 0 : index
    %c0_23 = arith.constant 0 : index
    %c0_24 = arith.constant 0 : index
    %28 = vector.load %arg4[%c0_22, %c0_23, %c0_24] : memref<3x64x256xf32, #tpu.memory_space<vmem>>, vector<1x64x256xf32>
    %29 = vector.shape_cast %28 : vector<1x64x256xf32> to vector<64x256xf32>
    %c0_25 = arith.constant 0 : index
    %c0_26 = arith.constant 0 : index
    %c0_27 = arith.constant 0 : index
    %30 = vector.load %arg5[%c0_25, %c0_26, %c0_27] : memref<2x256x64xf32, #tpu.memory_space<vmem>>, vector<1x256x64xf32>
    %31 = vector.shape_cast %30 : vector<1x256x64xf32> to vector<256x64xf32>
    %c32 = arith.constant 32 : index
    %c0_28 = arith.constant 0 : index
    %32 = vector.load %arg6[%c32, %c0_28] : memref<50x64xf32, #tpu.memory_space<vmem>>, vector<1x64xf32>
    %c33 = arith.constant 33 : index
    %c0_29 = arith.constant 0 : index
    %33 = vector.load %arg6[%c33, %c0_29] : memref<50x64xf32, #tpu.memory_space<vmem>>, vector<1x64xf32>
    %c34 = arith.constant 34 : index
    %c0_30 = arith.constant 0 : index
    %34 = vector.load %arg6[%c34, %c0_30] : memref<50x64xf32, #tpu.memory_space<vmem>>, vector<1x64xf32>
    %c35 = arith.constant 35 : index
    %c0_31 = arith.constant 0 : index
    %35 = vector.load %arg6[%c35, %c0_31] : memref<50x64xf32, #tpu.memory_space<vmem>>, vector<1x64xf32>
    %c36 = arith.constant 36 : index
    %c0_32 = arith.constant 0 : index
    %36 = vector.load %arg6[%c36, %c0_32] : memref<50x64xf32, #tpu.memory_space<vmem>>, vector<1x64xf32>
    %c37 = arith.constant 37 : index
    %c0_33 = arith.constant 0 : index
    %37 = vector.load %arg6[%c37, %c0_33] : memref<50x64xf32, #tpu.memory_space<vmem>>, vector<1x64xf32>
    %c38 = arith.constant 38 : index
    %c0_34 = arith.constant 0 : index
    %38 = vector.load %arg6[%c38, %c0_34] : memref<50x64xf32, #tpu.memory_space<vmem>>, vector<1x64xf32>
    %c39 = arith.constant 39 : index
    %c0_35 = arith.constant 0 : index
    %39 = vector.load %arg6[%c39, %c0_35] : memref<50x64xf32, #tpu.memory_space<vmem>>, vector<1x64xf32>
    %c40 = arith.constant 40 : index
    %c0_36 = arith.constant 0 : index
    %40 = vector.load %arg6[%c40, %c0_36] : memref<50x64xf32, #tpu.memory_space<vmem>>, vector<1x64xf32>
    %c0_37 = arith.constant 0 : index
    %c0_38 = arith.constant 0 : index
    %41 = vector.load %arg7[%c0_37, %c0_38] : memref<3x256xf32, #tpu.memory_space<vmem>>, vector<1x256xf32>
    %cst_39 = arith.constant dense<0.000000e+00> : vector<16x64xf32>
    %42 = tpu.matmul %0, %21, %cst_39 {dimension_numbers = #tpu.dot_dimension_numbers<[1], [0], [0], [1], [0, 0, 1, 1], [], []>} : vector<16x64xf32>, vector<64x64xf32>, vector<16x64xf32> -> vector<16x64xf32>
    %43 = vector.extract_strided_slice %42 {offsets = [0, 0], sizes = [8, 64], strides = [1, 1]} : vector<16x64xf32> to vector<8x64xf32>
    %44 = vector.extract_strided_slice %42 {offsets = [0, 0], sizes = [8, 64], strides = [1, 1]} : vector<16x64xf32> to vector<8x64xf32>
    %45 = vector.extract_strided_slice %42 {offsets = [0, 0], sizes = [8, 64], strides = [1, 1]} : vector<16x64xf32> to vector<8x64xf32>
    %46 = tpu.transpose %44, [1, 0] : vector<8x64xf32> -> vector<64x8xf32>
    %47 = tpu.concatenate %46, %46, %46, %46, %46, %46, %46, %46 in 1 : vector<64x8xf32>, vector<64x8xf32>, vector<64x8xf32>, vector<64x8xf32>, vector<64x8xf32>, vector<64x8xf32>, vector<64x8xf32>, vector<64x8xf32> -> vector<64x64xf32>
    %48 = arith.mulf %47, %2 : vector<64x64xf32>
    %cst_40 = arith.constant dense<0.000000e+00> : vector<8x64xf32>
    %49 = tpu.matmul %43, %48, %cst_40 {dimension_numbers = #tpu.dot_dimension_numbers<[1], [0], [0], [1], [0, 0, 1, 1], [], []>} : vector<8x64xf32>, vector<64x64xf32>, vector<8x64xf32> -> vector<8x64xf32>
    %50 = arith.addf %49, %9 : vector<8x64xf32>
    %cst_41 = arith.constant 0.353553385 : f32
    %51 = vector.broadcast %cst_41 : f32 to vector<8x64xf32>
    %52 = arith.mulf %50, %51 : vector<8x64xf32>
    %cst_42 = arith.constant dense<0xFF800000> : vector<8xf32>
    %53 = vector.multi_reduction <maximumf>, %52, %cst_42 [1] : vector<8x64xf32> to vector<8xf32>
    %54 = vector.shape_cast %53 : vector<8xf32> to vector<8x1xf32>
    %55 = vector.broadcast %54 : vector<8x1xf32> to vector<8x64xf32>
    %56 = arith.subf %52, %55 : vector<8x64xf32>
    %57 = math.exp %56 : vector<8x64xf32>
    %cst_43 = arith.constant dense<0.000000e+00> : vector<8x64xf32>
    %58 = tpu.matmul %57, %2, %cst_43 {dimension_numbers = #tpu.dot_dimension_numbers<[1], [0], [0], [1], [0, 0, 1, 1], [], []>} : vector<8x64xf32>, vector<64x64xf32>, vector<8x64xf32> -> vector<8x64xf32>
    %59 = tpu.reciprocal %58 {approx = true} : vector<8x64xf32> -> vector<8x64xf32>
    %60 = arith.mulf %57, %59 : vector<8x64xf32>
    %61 = tpu.concatenate %45, %45, %45, %45, %45, %45, %45, %45 in 0 : vector<8x64xf32>, vector<8x64xf32>, vector<8x64xf32>, vector<8x64xf32>, vector<8x64xf32>, vector<8x64xf32>, vector<8x64xf32>, vector<8x64xf32> -> vector<64x64xf32>
    %62 = arith.mulf %61, %2 : vector<64x64xf32>
    %cst_44 = arith.constant dense<0.000000e+00> : vector<8x64xf32>
    %63 = tpu.matmul %60, %62, %cst_44 {dimension_numbers = #tpu.dot_dimension_numbers<[1], [0], [0], [1], [0, 0, 1, 1], [], []>} : vector<8x64xf32>, vector<64x64xf32>, vector<8x64xf32> -> vector<8x64xf32>
    %64 = vector.extract_strided_slice %42 {offsets = [8, 0], sizes = [8, 64], strides = [1, 1]} : vector<16x64xf32> to vector<8x64xf32>
    %65 = vector.extract_strided_slice %42 {offsets = [8, 0], sizes = [8, 64], strides = [1, 1]} : vector<16x64xf32> to vector<8x64xf32>
    %66 = vector.extract_strided_slice %42 {offsets = [8, 0], sizes = [8, 64], strides = [1, 1]} : vector<16x64xf32> to vector<8x64xf32>
    %67 = tpu.transpose %65, [1, 0] : vector<8x64xf32> -> vector<64x8xf32>
    %68 = tpu.concatenate %67, %67, %67, %67, %67, %67, %67, %67 in 1 : vector<64x8xf32>, vector<64x8xf32>, vector<64x8xf32>, vector<64x8xf32>, vector<64x8xf32>, vector<64x8xf32>, vector<64x8xf32>, vector<64x8xf32> -> vector<64x64xf32>
    %69 = arith.mulf %68, %2 : vector<64x64xf32>
    %cst_45 = arith.constant dense<0.000000e+00> : vector<8x64xf32>
    %70 = tpu.matmul %64, %69, %cst_45 {dimension_numbers = #tpu.dot_dimension_numbers<[1], [0], [0], [1], [0, 0, 1, 1], [], []>} : vector<8x64xf32>, vector<64x64xf32>, vector<8x64xf32> -> vector<8x64xf32>
    %71 = arith.addf %70, %9 : vector<8x64xf32>
    %cst_46 = arith.constant 0.353553385 : f32
    %72 = vector.broadcast %cst_46 : f32 to vector<8x64xf32>
    %73 = arith.mulf %71, %72 : vector<8x64xf32>
    %cst_47 = arith.constant dense<0xFF800000> : vector<8xf32>
    %74 = vector.multi_reduction <maximumf>, %73, %cst_47 [1] : vector<8x64xf32> to vector<8xf32>
    %75 = vector.shape_cast %74 : vector<8xf32> to vector<8x1xf32>
    %76 = vector.broadcast %75 : vector<8x1xf32> to vector<8x64xf32>
    %77 = arith.subf %73, %76 : vector<8x64xf32>
    %78 = math.exp %77 : vector<8x64xf32>
    %cst_48 = arith.constant dense<0.000000e+00> : vector<8x64xf32>
    %79 = tpu.matmul %78, %2, %cst_48 {dimension_numbers = #tpu.dot_dimension_numbers<[1], [0], [0], [1], [0, 0, 1, 1], [], []>} : vector<8x64xf32>, vector<64x64xf32>, vector<8x64xf32> -> vector<8x64xf32>
    %80 = tpu.reciprocal %79 {approx = true} : vector<8x64xf32> -> vector<8x64xf32>
    %81 = arith.mulf %78, %80 : vector<8x64xf32>
    %82 = tpu.concatenate %66, %66, %66, %66, %66, %66, %66, %66 in 0 : vector<8x64xf32>, vector<8x64xf32>, vector<8x64xf32>, vector<8x64xf32>, vector<8x64xf32>, vector<8x64xf32>, vector<8x64xf32>, vector<8x64xf32> -> vector<64x64xf32>
    %83 = arith.mulf %82, %2 : vector<64x64xf32>
    %cst_49 = arith.constant dense<0.000000e+00> : vector<8x64xf32>
    %84 = tpu.matmul %81, %83, %cst_49 {dimension_numbers = #tpu.dot_dimension_numbers<[1], [0], [0], [1], [0, 0, 1, 1], [], []>} : vector<8x64xf32>, vector<64x64xf32>, vector<8x64xf32> -> vector<8x64xf32>
    %85 = tpu.concatenate %63, %84 in 0 : vector<8x64xf32>, vector<8x64xf32> -> vector<16x64xf32>
    %cst_50 = arith.constant dense<0.000000e+00> : vector<16x64xf32>
    %86 = tpu.matmul %85, %23, %cst_50 {dimension_numbers = #tpu.dot_dimension_numbers<[1], [0], [0], [1], [0, 0, 1, 1], [], []>} : vector<16x64xf32>, vector<64x64xf32>, vector<16x64xf32> -> vector<16x64xf32>
    %87 = vector.broadcast %32 : vector<1x64xf32> to vector<16x64xf32>
    %88 = arith.addf %86, %87 : vector<16x64xf32>
    %89 = arith.addf %88, %0 : vector<16x64xf32>
    %cst_51 = arith.constant dense<0.000000e+00> : vector<16xf32>
    %90 = vector.multi_reduction <add>, %89, %cst_51 [1] : vector<16x64xf32> to vector<16xf32>
    %91 = vector.shape_cast %90 : vector<16xf32> to vector<16x1xf32>
    %cst_52 = arith.constant 6.400000e+01 : f32
    %92 = vector.broadcast %cst_52 : f32 to vector<16x1xf32>
    %93 = arith.divf %91, %92 : vector<16x1xf32>
    %94 = vector.broadcast %93 : vector<16x1xf32> to vector<16x64xf32>
    %95 = arith.subf %89, %94 : vector<16x64xf32>
    %96 = arith.mulf %95, %95 : vector<16x64xf32>
    %cst_53 = arith.constant dense<0.000000e+00> : vector<16xf32>
    %97 = vector.multi_reduction <add>, %96, %cst_53 [1] : vector<16x64xf32> to vector<16xf32>
    %98 = vector.shape_cast %97 : vector<16xf32> to vector<16x1xf32>
    %cst_54 = arith.constant 6.400000e+01 : f32
    %99 = vector.broadcast %cst_54 : f32 to vector<16x1xf32>
    %100 = arith.divf %98, %99 : vector<16x1xf32>
    %101 = vector.broadcast %93 : vector<16x1xf32> to vector<16x64xf32>
    %102 = arith.subf %89, %101 : vector<16x64xf32>
    %cst_55 = arith.constant 9.99999974E-6 : f32
    %103 = vector.broadcast %cst_55 : f32 to vector<16x1xf32>
    %104 = arith.addf %100, %103 : vector<16x1xf32>
    %105 = math.rsqrt %104 : vector<16x1xf32>
    %106 = vector.broadcast %105 : vector<16x1xf32> to vector<16x64xf32>
    %107 = arith.mulf %102, %106 : vector<16x64xf32>
    %108 = vector.broadcast %33 : vector<1x64xf32> to vector<16x64xf32>
    %109 = arith.mulf %107, %108 : vector<16x64xf32>
    %110 = vector.broadcast %34 : vector<1x64xf32> to vector<16x64xf32>
    %111 = arith.addf %109, %110 : vector<16x64xf32>
    %112 = tpu.concatenate %19, %0, %111 in 0 : vector<16x64xf32>, vector<16x64xf32>, vector<16x64xf32> -> vector<48x64xf32>
    %cst_56 = arith.constant dense<0.000000e+00> : vector<48x64xf32>
    %113 = tpu.matmul %112, %25, %cst_56 {dimension_numbers = #tpu.dot_dimension_numbers<[1], [0], [0], [1], [0, 0, 1, 1], [], []>} : vector<48x64xf32>, vector<64x64xf32>, vector<48x64xf32> -> vector<48x64xf32>
    %114 = vector.extract_strided_slice %113 {offsets = [0, 0], sizes = [16, 64], strides = [1, 1]} : vector<48x64xf32> to vector<16x64xf32>
    %115 = vector.extract_strided_slice %113 {offsets = [16, 0], sizes = [16, 64], strides = [1, 1]} : vector<48x64xf32> to vector<16x64xf32>
    %116 = vector.extract_strided_slice %113 {offsets = [32, 0], sizes = [16, 64], strides = [1, 1]} : vector<48x64xf32> to vector<16x64xf32>
    %117 = vector.extract_strided_slice %114 {offsets = [0, 0], sizes = [8, 64], strides = [1, 1]} : vector<16x64xf32> to vector<8x64xf32>
    %118 = vector.extract_strided_slice %115 {offsets = [0, 0], sizes = [8, 64], strides = [1, 1]} : vector<16x64xf32> to vector<8x64xf32>
    %119 = vector.extract_strided_slice %116 {offsets = [0, 0], sizes = [8, 64], strides = [1, 1]} : vector<16x64xf32> to vector<8x64xf32>
    %120 = tpu.transpose %118, [1, 0] : vector<8x64xf32> -> vector<64x8xf32>
    %121 = tpu.concatenate %120, %120, %120, %120, %120, %120, %120, %120 in 1 : vector<64x8xf32>, vector<64x8xf32>, vector<64x8xf32>, vector<64x8xf32>, vector<64x8xf32>, vector<64x8xf32>, vector<64x8xf32>, vector<64x8xf32> -> vector<64x64xf32>
    %122 = arith.mulf %121, %2 : vector<64x64xf32>
    %cst_57 = arith.constant dense<0.000000e+00> : vector<8x64xf32>
    %123 = tpu.matmul %117, %122, %cst_57 {dimension_numbers = #tpu.dot_dimension_numbers<[1], [0], [0], [1], [0, 0, 1, 1], [], []>} : vector<8x64xf32>, vector<64x64xf32>, vector<8x64xf32> -> vector<8x64xf32>
    %cst_58 = arith.constant 0.353553385 : f32
    %124 = vector.broadcast %cst_58 : f32 to vector<8x64xf32>
    %125 = arith.mulf %123, %124 : vector<8x64xf32>
    %cst_59 = arith.constant dense<0xFF800000> : vector<8xf32>
    %126 = vector.multi_reduction <maximumf>, %125, %cst_59 [1] : vector<8x64xf32> to vector<8xf32>
    %127 = vector.shape_cast %126 : vector<8xf32> to vector<8x1xf32>
    %128 = vector.broadcast %127 : vector<8x1xf32> to vector<8x64xf32>
    %129 = arith.subf %125, %128 : vector<8x64xf32>
    %130 = math.exp %129 : vector<8x64xf32>
    %cst_60 = arith.constant dense<0.000000e+00> : vector<8x64xf32>
    %131 = tpu.matmul %130, %2, %cst_60 {dimension_numbers = #tpu.dot_dimension_numbers<[1], [0], [0], [1], [0, 0, 1, 1], [], []>} : vector<8x64xf32>, vector<64x64xf32>, vector<8x64xf32> -> vector<8x64xf32>
    %132 = tpu.reciprocal %131 {approx = true} : vector<8x64xf32> -> vector<8x64xf32>
    %133 = arith.mulf %130, %132 : vector<8x64xf32>
    %134 = tpu.concatenate %119, %119, %119, %119, %119, %119, %119, %119 in 0 : vector<8x64xf32>, vector<8x64xf32>, vector<8x64xf32>, vector<8x64xf32>, vector<8x64xf32>, vector<8x64xf32>, vector<8x64xf32>, vector<8x64xf32> -> vector<64x64xf32>
    %135 = arith.mulf %134, %2 : vector<64x64xf32>
    %cst_61 = arith.constant dense<0.000000e+00> : vector<8x64xf32>
    %136 = tpu.matmul %133, %135, %cst_61 {dimension_numbers = #tpu.dot_dimension_numbers<[1], [0], [0], [1], [0, 0, 1, 1], [], []>} : vector<8x64xf32>, vector<64x64xf32>, vector<8x64xf32> -> vector<8x64xf32>
    %137 = vector.extract_strided_slice %114 {offsets = [8, 0], sizes = [8, 64], strides = [1, 1]} : vector<16x64xf32> to vector<8x64xf32>
    %138 = vector.extract_strided_slice %115 {offsets = [8, 0], sizes = [8, 64], strides = [1, 1]} : vector<16x64xf32> to vector<8x64xf32>
    %139 = vector.extract_strided_slice %116 {offsets = [8, 0], sizes = [8, 64], strides = [1, 1]} : vector<16x64xf32> to vector<8x64xf32>
    %140 = tpu.transpose %138, [1, 0] : vector<8x64xf32> -> vector<64x8xf32>
    %141 = tpu.concatenate %140, %140, %140, %140, %140, %140, %140, %140 in 1 : vector<64x8xf32>, vector<64x8xf32>, vector<64x8xf32>, vector<64x8xf32>, vector<64x8xf32>, vector<64x8xf32>, vector<64x8xf32>, vector<64x8xf32> -> vector<64x64xf32>
    %142 = arith.mulf %141, %2 : vector<64x64xf32>
    %cst_62 = arith.constant dense<0.000000e+00> : vector<8x64xf32>
    %143 = tpu.matmul %137, %142, %cst_62 {dimension_numbers = #tpu.dot_dimension_numbers<[1], [0], [0], [1], [0, 0, 1, 1], [], []>} : vector<8x64xf32>, vector<64x64xf32>, vector<8x64xf32> -> vector<8x64xf32>
    %cst_63 = arith.constant 0.353553385 : f32
    %144 = vector.broadcast %cst_63 : f32 to vector<8x64xf32>
    %145 = arith.mulf %143, %144 : vector<8x64xf32>
    %cst_64 = arith.constant dense<0xFF800000> : vector<8xf32>
    %146 = vector.multi_reduction <maximumf>, %145, %cst_64 [1] : vector<8x64xf32> to vector<8xf32>
    %147 = vector.shape_cast %146 : vector<8xf32> to vector<8x1xf32>
    %148 = vector.broadcast %147 : vector<8x1xf32> to vector<8x64xf32>
    %149 = arith.subf %145, %148 : vector<8x64xf32>
    %150 = math.exp %149 : vector<8x64xf32>
    %cst_65 = arith.constant dense<0.000000e+00> : vector<8x64xf32>
    %151 = tpu.matmul %150, %2, %cst_65 {dimension_numbers = #tpu.dot_dimension_numbers<[1], [0], [0], [1], [0, 0, 1, 1], [], []>} : vector<8x64xf32>, vector<64x64xf32>, vector<8x64xf32> -> vector<8x64xf32>
    %152 = tpu.reciprocal %151 {approx = true} : vector<8x64xf32> -> vector<8x64xf32>
    %153 = arith.mulf %150, %152 : vector<8x64xf32>
    %154 = tpu.concatenate %139, %139, %139, %139, %139, %139, %139, %139 in 0 : vector<8x64xf32>, vector<8x64xf32>, vector<8x64xf32>, vector<8x64xf32>, vector<8x64xf32>, vector<8x64xf32>, vector<8x64xf32>, vector<8x64xf32> -> vector<64x64xf32>
    %155 = arith.mulf %154, %2 : vector<64x64xf32>
    %cst_66 = arith.constant dense<0.000000e+00> : vector<8x64xf32>
    %156 = tpu.matmul %153, %155, %cst_66 {dimension_numbers = #tpu.dot_dimension_numbers<[1], [0], [0], [1], [0, 0, 1, 1], [], []>} : vector<8x64xf32>, vector<64x64xf32>, vector<8x64xf32> -> vector<8x64xf32>
    %157 = tpu.concatenate %136, %156 in 0 : vector<8x64xf32>, vector<8x64xf32> -> vector<16x64xf32>
    %cst_67 = arith.constant dense<0.000000e+00> : vector<16x64xf32>
    %158 = tpu.matmul %157, %27, %cst_67 {dimension_numbers = #tpu.dot_dimension_numbers<[1], [0], [0], [1], [0, 0, 1, 1], [], []>} : vector<16x64xf32>, vector<64x64xf32>, vector<16x64xf32> -> vector<16x64xf32>
    %159 = vector.broadcast %35 : vector<1x64xf32> to vector<16x64xf32>
    %160 = arith.addf %158, %159 : vector<16x64xf32>
    %161 = arith.addf %160, %111 : vector<16x64xf32>
    %cst_68 = arith.constant dense<0.000000e+00> : vector<16xf32>
    %162 = vector.multi_reduction <add>, %161, %cst_68 [1] : vector<16x64xf32> to vector<16xf32>
    %163 = vector.shape_cast %162 : vector<16xf32> to vector<16x1xf32>
    %cst_69 = arith.constant 6.400000e+01 : f32
    %164 = vector.broadcast %cst_69 : f32 to vector<16x1xf32>
    %165 = arith.divf %163, %164 : vector<16x1xf32>
    %166 = vector.broadcast %165 : vector<16x1xf32> to vector<16x64xf32>
    %167 = arith.subf %161, %166 : vector<16x64xf32>
    %168 = arith.mulf %167, %167 : vector<16x64xf32>
    %cst_70 = arith.constant dense<0.000000e+00> : vector<16xf32>
    %169 = vector.multi_reduction <add>, %168, %cst_70 [1] : vector<16x64xf32> to vector<16xf32>
    %170 = vector.shape_cast %169 : vector<16xf32> to vector<16x1xf32>
    %cst_71 = arith.constant 6.400000e+01 : f32
    %171 = vector.broadcast %cst_71 : f32 to vector<16x1xf32>
    %172 = arith.divf %170, %171 : vector<16x1xf32>
    %173 = vector.broadcast %165 : vector<16x1xf32> to vector<16x64xf32>
    %174 = arith.subf %161, %173 : vector<16x64xf32>
    %cst_72 = arith.constant 9.99999974E-6 : f32
    %175 = vector.broadcast %cst_72 : f32 to vector<16x1xf32>
    %176 = arith.addf %172, %175 : vector<16x1xf32>
    %177 = math.rsqrt %176 : vector<16x1xf32>
    %178 = vector.broadcast %177 : vector<16x1xf32> to vector<16x64xf32>
    %179 = arith.mulf %174, %178 : vector<16x64xf32>
    %180 = vector.broadcast %36 : vector<1x64xf32> to vector<16x64xf32>
    %181 = arith.mulf %179, %180 : vector<16x64xf32>
    %182 = vector.broadcast %37 : vector<1x64xf32> to vector<16x64xf32>
    %183 = arith.addf %181, %182 : vector<16x64xf32>
    %cst_73 = arith.constant dense<0.000000e+00> : vector<16x256xf32>
    %184 = tpu.matmul %183, %29, %cst_73 {dimension_numbers = #tpu.dot_dimension_numbers<[1], [0], [0], [1], [0, 0, 1, 1], [], []>} : vector<16x64xf32>, vector<64x256xf32>, vector<16x256xf32> -> vector<16x256xf32>
    %185 = vector.broadcast %41 : vector<1x256xf32> to vector<16x256xf32>
    %186 = arith.addf %184, %185 : vector<16x256xf32>
    %cst_74 = arith.constant 0.000000e+00 : f32
    %187 = vector.broadcast %cst_74 : f32 to vector<16x256xf32>
    %188 = arith.maximumf %186, %187 : vector<16x256xf32>
    %cst_75 = arith.constant dense<0.000000e+00> : vector<16x64xf32>
    %189 = tpu.matmul %188, %31, %cst_75 {dimension_numbers = #tpu.dot_dimension_numbers<[1], [0], [0], [1], [0, 0, 1, 1], [], []>} : vector<16x256xf32>, vector<256x64xf32>, vector<16x64xf32> -> vector<16x64xf32>
    %190 = vector.broadcast %38 : vector<1x64xf32> to vector<16x64xf32>
    %191 = arith.addf %189, %190 : vector<16x64xf32>
    %192 = arith.addf %191, %183 : vector<16x64xf32>
    %cst_76 = arith.constant dense<0.000000e+00> : vector<16xf32>
    %193 = vector.multi_reduction <add>, %192, %cst_76 [1] : vector<16x64xf32> to vector<16xf32>
    %194 = vector.shape_cast %193 : vector<16xf32> to vector<16x1xf32>
    %cst_77 = arith.constant 6.400000e+01 : f32
    %195 = vector.broadcast %cst_77 : f32 to vector<16x1xf32>
    %196 = arith.divf %194, %195 : vector<16x1xf32>
    %197 = vector.broadcast %196 : vector<16x1xf32> to vector<16x64xf32>
    %198 = arith.subf %192, %197 : vector<16x64xf32>
    %199 = arith.mulf %198, %198 : vector<16x64xf32>
    %cst_78 = arith.constant dense<0.000000e+00> : vector<16xf32>
    %200 = vector.multi_reduction <add>, %199, %cst_78 [1] : vector<16x64xf32> to vector<16xf32>
    %201 = vector.shape_cast %200 : vector<16xf32> to vector<16x1xf32>
    %cst_79 = arith.constant 6.400000e+01 : f32
    %202 = vector.broadcast %cst_79 : f32 to vector<16x1xf32>
    %203 = arith.divf %201, %202 : vector<16x1xf32>
    %204 = vector.broadcast %196 : vector<16x1xf32> to vector<16x64xf32>
    %205 = arith.subf %192, %204 : vector<16x64xf32>
    %cst_80 = arith.constant 9.99999974E-6 : f32
    %206 = vector.broadcast %cst_80 : f32 to vector<16x1xf32>
    %207 = arith.addf %203, %206 : vector<16x1xf32>
    %208 = math.rsqrt %207 : vector<16x1xf32>
    %209 = vector.broadcast %208 : vector<16x1xf32> to vector<16x64xf32>
    %210 = arith.mulf %205, %209 : vector<16x64xf32>
    %211 = vector.broadcast %39 : vector<1x64xf32> to vector<16x64xf32>
    %212 = arith.mulf %210, %211 : vector<16x64xf32>
    %213 = vector.broadcast %40 : vector<1x64xf32> to vector<16x64xf32>
    %214 = arith.addf %212, %213 : vector<16x64xf32>
    %c4 = arith.constant 4 : index
    %c0_81 = arith.constant 0 : index
    %c0_82 = arith.constant 0 : index
    %215 = vector.load %arg3[%c4, %c0_81, %c0_82] : memref<9x64x64xf32, #tpu.memory_space<vmem>>, vector<1x64x64xf32>
    %216 = vector.shape_cast %215 : vector<1x64x64xf32> to vector<64x64xf32>
    %c5 = arith.constant 5 : index
    %c0_83 = arith.constant 0 : index
    %c0_84 = arith.constant 0 : index
    %217 = vector.load %arg3[%c5, %c0_83, %c0_84] : memref<9x64x64xf32, #tpu.memory_space<vmem>>, vector<1x64x64xf32>
    %218 = vector.shape_cast %217 : vector<1x64x64xf32> to vector<64x64xf32>
    %c6 = arith.constant 6 : index
    %c0_85 = arith.constant 0 : index
    %c0_86 = arith.constant 0 : index
    %219 = vector.load %arg3[%c6, %c0_85, %c0_86] : memref<9x64x64xf32, #tpu.memory_space<vmem>>, vector<1x64x64xf32>
    %220 = vector.shape_cast %219 : vector<1x64x64xf32> to vector<64x64xf32>
    %c7 = arith.constant 7 : index
    %c0_87 = arith.constant 0 : index
    %c0_88 = arith.constant 0 : index
    %221 = vector.load %arg3[%c7, %c0_87, %c0_88] : memref<9x64x64xf32, #tpu.memory_space<vmem>>, vector<1x64x64xf32>
    %222 = vector.shape_cast %221 : vector<1x64x64xf32> to vector<64x64xf32>
    %c1_89 = arith.constant 1 : index
    %c0_90 = arith.constant 0 : index
    %c0_91 = arith.constant 0 : index
    %223 = vector.load %arg4[%c1_89, %c0_90, %c0_91] : memref<3x64x256xf32, #tpu.memory_space<vmem>>, vector<1x64x256xf32>
    %224 = vector.shape_cast %223 : vector<1x64x256xf32> to vector<64x256xf32>
    %c1_92 = arith.constant 1 : index
    %c0_93 = arith.constant 0 : index
    %c0_94 = arith.constant 0 : index
    %225 = vector.load %arg5[%c1_92, %c0_93, %c0_94] : memref<2x256x64xf32, #tpu.memory_space<vmem>>, vector<1x256x64xf32>
    %226 = vector.shape_cast %225 : vector<1x256x64xf32> to vector<256x64xf32>
    %c41 = arith.constant 41 : index
    %c0_95 = arith.constant 0 : index
    %227 = vector.load %arg6[%c41, %c0_95] : memref<50x64xf32, #tpu.memory_space<vmem>>, vector<1x64xf32>
    %c42 = arith.constant 42 : index
    %c0_96 = arith.constant 0 : index
    %228 = vector.load %arg6[%c42, %c0_96] : memref<50x64xf32, #tpu.memory_space<vmem>>, vector<1x64xf32>
    %c43 = arith.constant 43 : index
    %c0_97 = arith.constant 0 : index
    %229 = vector.load %arg6[%c43, %c0_97] : memref<50x64xf32, #tpu.memory_space<vmem>>, vector<1x64xf32>
    %c44 = arith.constant 44 : index
    %c0_98 = arith.constant 0 : index
    %230 = vector.load %arg6[%c44, %c0_98] : memref<50x64xf32, #tpu.memory_space<vmem>>, vector<1x64xf32>
    %c45 = arith.constant 45 : index
    %c0_99 = arith.constant 0 : index
    %231 = vector.load %arg6[%c45, %c0_99] : memref<50x64xf32, #tpu.memory_space<vmem>>, vector<1x64xf32>
    %c46 = arith.constant 46 : index
    %c0_100 = arith.constant 0 : index
    %232 = vector.load %arg6[%c46, %c0_100] : memref<50x64xf32, #tpu.memory_space<vmem>>, vector<1x64xf32>
    %c47 = arith.constant 47 : index
    %c0_101 = arith.constant 0 : index
    %233 = vector.load %arg6[%c47, %c0_101] : memref<50x64xf32, #tpu.memory_space<vmem>>, vector<1x64xf32>
    %c48 = arith.constant 48 : index
    %c0_102 = arith.constant 0 : index
    %234 = vector.load %arg6[%c48, %c0_102] : memref<50x64xf32, #tpu.memory_space<vmem>>, vector<1x64xf32>
    %c49 = arith.constant 49 : index
    %c0_103 = arith.constant 0 : index
    %235 = vector.load %arg6[%c49, %c0_103] : memref<50x64xf32, #tpu.memory_space<vmem>>, vector<1x64xf32>
    %c1_104 = arith.constant 1 : index
    %c0_105 = arith.constant 0 : index
    %236 = vector.load %arg7[%c1_104, %c0_105] : memref<3x256xf32, #tpu.memory_space<vmem>>, vector<1x256xf32>
    %cst_106 = arith.constant dense<0.000000e+00> : vector<16x64xf32>
    %237 = tpu.matmul %0, %216, %cst_106 {dimension_numbers = #tpu.dot_dimension_numbers<[1], [0], [0], [1], [0, 0, 1, 1], [], []>} : vector<16x64xf32>, vector<64x64xf32>, vector<16x64xf32> -> vector<16x64xf32>
    %238 = vector.extract_strided_slice %237 {offsets = [0, 0], sizes = [8, 64], strides = [1, 1]} : vector<16x64xf32> to vector<8x64xf32>
    %239 = vector.extract_strided_slice %237 {offsets = [0, 0], sizes = [8, 64], strides = [1, 1]} : vector<16x64xf32> to vector<8x64xf32>
    %240 = vector.extract_strided_slice %237 {offsets = [0, 0], sizes = [8, 64], strides = [1, 1]} : vector<16x64xf32> to vector<8x64xf32>
    %241 = tpu.transpose %239, [1, 0] : vector<8x64xf32> -> vector<64x8xf32>
    %242 = tpu.concatenate %241, %241, %241, %241, %241, %241, %241, %241 in 1 : vector<64x8xf32>, vector<64x8xf32>, vector<64x8xf32>, vector<64x8xf32>, vector<64x8xf32>, vector<64x8xf32>, vector<64x8xf32>, vector<64x8xf32> -> vector<64x64xf32>
    %243 = arith.mulf %242, %2 : vector<64x64xf32>
    %cst_107 = arith.constant dense<0.000000e+00> : vector<8x64xf32>
    %244 = tpu.matmul %238, %243, %cst_107 {dimension_numbers = #tpu.dot_dimension_numbers<[1], [0], [0], [1], [0, 0, 1, 1], [], []>} : vector<8x64xf32>, vector<64x64xf32>, vector<8x64xf32> -> vector<8x64xf32>
    %245 = arith.addf %244, %9 : vector<8x64xf32>
    %cst_108 = arith.constant 0.353553385 : f32
    %246 = vector.broadcast %cst_108 : f32 to vector<8x64xf32>
    %247 = arith.mulf %245, %246 : vector<8x64xf32>
    %cst_109 = arith.constant dense<0xFF800000> : vector<8xf32>
    %248 = vector.multi_reduction <maximumf>, %247, %cst_109 [1] : vector<8x64xf32> to vector<8xf32>
    %249 = vector.shape_cast %248 : vector<8xf32> to vector<8x1xf32>
    %250 = vector.broadcast %249 : vector<8x1xf32> to vector<8x64xf32>
    %251 = arith.subf %247, %250 : vector<8x64xf32>
    %252 = math.exp %251 : vector<8x64xf32>
    %cst_110 = arith.constant dense<0.000000e+00> : vector<8x64xf32>
    %253 = tpu.matmul %252, %2, %cst_110 {dimension_numbers = #tpu.dot_dimension_numbers<[1], [0], [0], [1], [0, 0, 1, 1], [], []>} : vector<8x64xf32>, vector<64x64xf32>, vector<8x64xf32> -> vector<8x64xf32>
    %254 = tpu.reciprocal %253 {approx = true} : vector<8x64xf32> -> vector<8x64xf32>
    %255 = arith.mulf %252, %254 : vector<8x64xf32>
    %256 = tpu.concatenate %240, %240, %240, %240, %240, %240, %240, %240 in 0 : vector<8x64xf32>, vector<8x64xf32>, vector<8x64xf32>, vector<8x64xf32>, vector<8x64xf32>, vector<8x64xf32>, vector<8x64xf32>, vector<8x64xf32> -> vector<64x64xf32>
    %257 = arith.mulf %256, %2 : vector<64x64xf32>
    %cst_111 = arith.constant dense<0.000000e+00> : vector<8x64xf32>
    %258 = tpu.matmul %255, %257, %cst_111 {dimension_numbers = #tpu.dot_dimension_numbers<[1], [0], [0], [1], [0, 0, 1, 1], [], []>} : vector<8x64xf32>, vector<64x64xf32>, vector<8x64xf32> -> vector<8x64xf32>
    %259 = vector.extract_strided_slice %237 {offsets = [8, 0], sizes = [8, 64], strides = [1, 1]} : vector<16x64xf32> to vector<8x64xf32>
    %260 = vector.extract_strided_slice %237 {offsets = [8, 0], sizes = [8, 64], strides = [1, 1]} : vector<16x64xf32> to vector<8x64xf32>
    %261 = vector.extract_strided_slice %237 {offsets = [8, 0], sizes = [8, 64], strides = [1, 1]} : vector<16x64xf32> to vector<8x64xf32>
    %262 = tpu.transpose %260, [1, 0] : vector<8x64xf32> -> vector<64x8xf32>
    %263 = tpu.concatenate %262, %262, %262, %262, %262, %262, %262, %262 in 1 : vector<64x8xf32>, vector<64x8xf32>, vector<64x8xf32>, vector<64x8xf32>, vector<64x8xf32>, vector<64x8xf32>, vector<64x8xf32>, vector<64x8xf32> -> vector<64x64xf32>
    %264 = arith.mulf %263, %2 : vector<64x64xf32>
    %cst_112 = arith.constant dense<0.000000e+00> : vector<8x64xf32>
    %265 = tpu.matmul %259, %264, %cst_112 {dimension_numbers = #tpu.dot_dimension_numbers<[1], [0], [0], [1], [0, 0, 1, 1], [], []>} : vector<8x64xf32>, vector<64x64xf32>, vector<8x64xf32> -> vector<8x64xf32>
    %266 = arith.addf %265, %9 : vector<8x64xf32>
    %cst_113 = arith.constant 0.353553385 : f32
    %267 = vector.broadcast %cst_113 : f32 to vector<8x64xf32>
    %268 = arith.mulf %266, %267 : vector<8x64xf32>
    %cst_114 = arith.constant dense<0xFF800000> : vector<8xf32>
    %269 = vector.multi_reduction <maximumf>, %268, %cst_114 [1] : vector<8x64xf32> to vector<8xf32>
    %270 = vector.shape_cast %269 : vector<8xf32> to vector<8x1xf32>
    %271 = vector.broadcast %270 : vector<8x1xf32> to vector<8x64xf32>
    %272 = arith.subf %268, %271 : vector<8x64xf32>
    %273 = math.exp %272 : vector<8x64xf32>
    %cst_115 = arith.constant dense<0.000000e+00> : vector<8x64xf32>
    %274 = tpu.matmul %273, %2, %cst_115 {dimension_numbers = #tpu.dot_dimension_numbers<[1], [0], [0], [1], [0, 0, 1, 1], [], []>} : vector<8x64xf32>, vector<64x64xf32>, vector<8x64xf32> -> vector<8x64xf32>
    %275 = tpu.reciprocal %274 {approx = true} : vector<8x64xf32> -> vector<8x64xf32>
    %276 = arith.mulf %273, %275 : vector<8x64xf32>
    %277 = tpu.concatenate %261, %261, %261, %261, %261, %261, %261, %261 in 0 : vector<8x64xf32>, vector<8x64xf32>, vector<8x64xf32>, vector<8x64xf32>, vector<8x64xf32>, vector<8x64xf32>, vector<8x64xf32>, vector<8x64xf32> -> vector<64x64xf32>
    %278 = arith.mulf %277, %2 : vector<64x64xf32>
    %cst_116 = arith.constant dense<0.000000e+00> : vector<8x64xf32>
    %279 = tpu.matmul %276, %278, %cst_116 {dimension_numbers = #tpu.dot_dimension_numbers<[1], [0], [0], [1], [0, 0, 1, 1], [], []>} : vector<8x64xf32>, vector<64x64xf32>, vector<8x64xf32> -> vector<8x64xf32>
    %280 = tpu.concatenate %258, %279 in 0 : vector<8x64xf32>, vector<8x64xf32> -> vector<16x64xf32>
    %cst_117 = arith.constant dense<0.000000e+00> : vector<16x64xf32>
    %281 = tpu.matmul %280, %218, %cst_117 {dimension_numbers = #tpu.dot_dimension_numbers<[1], [0], [0], [1], [0, 0, 1, 1], [], []>} : vector<16x64xf32>, vector<64x64xf32>, vector<16x64xf32> -> vector<16x64xf32>
    %282 = vector.broadcast %227 : vector<1x64xf32> to vector<16x64xf32>
    %283 = arith.addf %281, %282 : vector<16x64xf32>
    %284 = arith.addf %283, %0 : vector<16x64xf32>
    %cst_118 = arith.constant dense<0.000000e+00> : vector<16xf32>
    %285 = vector.multi_reduction <add>, %284, %cst_118 [1] : vector<16x64xf32> to vector<16xf32>
    %286 = vector.shape_cast %285 : vector<16xf32> to vector<16x1xf32>
    %cst_119 = arith.constant 6.400000e+01 : f32
    %287 = vector.broadcast %cst_119 : f32 to vector<16x1xf32>
    %288 = arith.divf %286, %287 : vector<16x1xf32>
    %289 = vector.broadcast %288 : vector<16x1xf32> to vector<16x64xf32>
    %290 = arith.subf %284, %289 : vector<16x64xf32>
    %291 = arith.mulf %290, %290 : vector<16x64xf32>
    %cst_120 = arith.constant dense<0.000000e+00> : vector<16xf32>
    %292 = vector.multi_reduction <add>, %291, %cst_120 [1] : vector<16x64xf32> to vector<16xf32>
    %293 = vector.shape_cast %292 : vector<16xf32> to vector<16x1xf32>
    %cst_121 = arith.constant 6.400000e+01 : f32
    %294 = vector.broadcast %cst_121 : f32 to vector<16x1xf32>
    %295 = arith.divf %293, %294 : vector<16x1xf32>
    %296 = vector.broadcast %288 : vector<16x1xf32> to vector<16x64xf32>
    %297 = arith.subf %284, %296 : vector<16x64xf32>
    %cst_122 = arith.constant 9.99999974E-6 : f32
    %298 = vector.broadcast %cst_122 : f32 to vector<16x1xf32>
    %299 = arith.addf %295, %298 : vector<16x1xf32>
    %300 = math.rsqrt %299 : vector<16x1xf32>
    %301 = vector.broadcast %300 : vector<16x1xf32> to vector<16x64xf32>
    %302 = arith.mulf %297, %301 : vector<16x64xf32>
    %303 = vector.broadcast %228 : vector<1x64xf32> to vector<16x64xf32>
    %304 = arith.mulf %302, %303 : vector<16x64xf32>
    %305 = vector.broadcast %229 : vector<1x64xf32> to vector<16x64xf32>
    %306 = arith.addf %304, %305 : vector<16x64xf32>
    %307 = tpu.concatenate %214, %0, %306 in 0 : vector<16x64xf32>, vector<16x64xf32>, vector<16x64xf32> -> vector<48x64xf32>
    %cst_123 = arith.constant dense<0.000000e+00> : vector<48x64xf32>
    %308 = tpu.matmul %307, %220, %cst_123 {dimension_numbers = #tpu.dot_dimension_numbers<[1], [0], [0], [1], [0, 0, 1, 1], [], []>} : vector<48x64xf32>, vector<64x64xf32>, vector<48x64xf32> -> vector<48x64xf32>
    %309 = vector.extract_strided_slice %308 {offsets = [0, 0], sizes = [16, 64], strides = [1, 1]} : vector<48x64xf32> to vector<16x64xf32>
    %310 = vector.extract_strided_slice %308 {offsets = [16, 0], sizes = [16, 64], strides = [1, 1]} : vector<48x64xf32> to vector<16x64xf32>
    %311 = vector.extract_strided_slice %308 {offsets = [32, 0], sizes = [16, 64], strides = [1, 1]} : vector<48x64xf32> to vector<16x64xf32>
    %312 = vector.extract_strided_slice %309 {offsets = [0, 0], sizes = [8, 64], strides = [1, 1]} : vector<16x64xf32> to vector<8x64xf32>
    %313 = vector.extract_strided_slice %310 {offsets = [0, 0], sizes = [8, 64], strides = [1, 1]} : vector<16x64xf32> to vector<8x64xf32>
    %314 = vector.extract_strided_slice %311 {offsets = [0, 0], sizes = [8, 64], strides = [1, 1]} : vector<16x64xf32> to vector<8x64xf32>
    %315 = tpu.transpose %313, [1, 0] : vector<8x64xf32> -> vector<64x8xf32>
    %316 = tpu.concatenate %315, %315, %315, %315, %315, %315, %315, %315 in 1 : vector<64x8xf32>, vector<64x8xf32>, vector<64x8xf32>, vector<64x8xf32>, vector<64x8xf32>, vector<64x8xf32>, vector<64x8xf32>, vector<64x8xf32> -> vector<64x64xf32>
    %317 = arith.mulf %316, %2 : vector<64x64xf32>
    %cst_124 = arith.constant dense<0.000000e+00> : vector<8x64xf32>
    %318 = tpu.matmul %312, %317, %cst_124 {dimension_numbers = #tpu.dot_dimension_numbers<[1], [0], [0], [1], [0, 0, 1, 1], [], []>} : vector<8x64xf32>, vector<64x64xf32>, vector<8x64xf32> -> vector<8x64xf32>
    %cst_125 = arith.constant 0.353553385 : f32
    %319 = vector.broadcast %cst_125 : f32 to vector<8x64xf32>
    %320 = arith.mulf %318, %319 : vector<8x64xf32>
    %cst_126 = arith.constant dense<0xFF800000> : vector<8xf32>
    %321 = vector.multi_reduction <maximumf>, %320, %cst_126 [1] : vector<8x64xf32> to vector<8xf32>
    %322 = vector.shape_cast %321 : vector<8xf32> to vector<8x1xf32>
    %323 = vector.broadcast %322 : vector<8x1xf32> to vector<8x64xf32>
    %324 = arith.subf %320, %323 : vector<8x64xf32>
    %325 = math.exp %324 : vector<8x64xf32>
    %cst_127 = arith.constant dense<0.000000e+00> : vector<8x64xf32>
    %326 = tpu.matmul %325, %2, %cst_127 {dimension_numbers = #tpu.dot_dimension_numbers<[1], [0], [0], [1], [0, 0, 1, 1], [], []>} : vector<8x64xf32>, vector<64x64xf32>, vector<8x64xf32> -> vector<8x64xf32>
    %327 = tpu.reciprocal %326 {approx = true} : vector<8x64xf32> -> vector<8x64xf32>
    %328 = arith.mulf %325, %327 : vector<8x64xf32>
    %329 = tpu.concatenate %314, %314, %314, %314, %314, %314, %314, %314 in 0 : vector<8x64xf32>, vector<8x64xf32>, vector<8x64xf32>, vector<8x64xf32>, vector<8x64xf32>, vector<8x64xf32>, vector<8x64xf32>, vector<8x64xf32> -> vector<64x64xf32>
    %330 = arith.mulf %329, %2 : vector<64x64xf32>
    %cst_128 = arith.constant dense<0.000000e+00> : vector<8x64xf32>
    %331 = tpu.matmul %328, %330, %cst_128 {dimension_numbers = #tpu.dot_dimension_numbers<[1], [0], [0], [1], [0, 0, 1, 1], [], []>} : vector<8x64xf32>, vector<64x64xf32>, vector<8x64xf32> -> vector<8x64xf32>
    %332 = vector.extract_strided_slice %309 {offsets = [8, 0], sizes = [8, 64], strides = [1, 1]} : vector<16x64xf32> to vector<8x64xf32>
    %333 = vector.extract_strided_slice %310 {offsets = [8, 0], sizes = [8, 64], strides = [1, 1]} : vector<16x64xf32> to vector<8x64xf32>
    %334 = vector.extract_strided_slice %311 {offsets = [8, 0], sizes = [8, 64], strides = [1, 1]} : vector<16x64xf32> to vector<8x64xf32>
    %335 = tpu.transpose %333, [1, 0] : vector<8x64xf32> -> vector<64x8xf32>
    %336 = tpu.concatenate %335, %335, %335, %335, %335, %335, %335, %335 in 1 : vector<64x8xf32>, vector<64x8xf32>, vector<64x8xf32>, vector<64x8xf32>, vector<64x8xf32>, vector<64x8xf32>, vector<64x8xf32>, vector<64x8xf32> -> vector<64x64xf32>
    %337 = arith.mulf %336, %2 : vector<64x64xf32>
    %cst_129 = arith.constant dense<0.000000e+00> : vector<8x64xf32>
    %338 = tpu.matmul %332, %337, %cst_129 {dimension_numbers = #tpu.dot_dimension_numbers<[1], [0], [0], [1], [0, 0, 1, 1], [], []>} : vector<8x64xf32>, vector<64x64xf32>, vector<8x64xf32> -> vector<8x64xf32>
    %cst_130 = arith.constant 0.353553385 : f32
    %339 = vector.broadcast %cst_130 : f32 to vector<8x64xf32>
    %340 = arith.mulf %338, %339 : vector<8x64xf32>
    %cst_131 = arith.constant dense<0xFF800000> : vector<8xf32>
    %341 = vector.multi_reduction <maximumf>, %340, %cst_131 [1] : vector<8x64xf32> to vector<8xf32>
    %342 = vector.shape_cast %341 : vector<8xf32> to vector<8x1xf32>
    %343 = vector.broadcast %342 : vector<8x1xf32> to vector<8x64xf32>
    %344 = arith.subf %340, %343 : vector<8x64xf32>
    %345 = math.exp %344 : vector<8x64xf32>
    %cst_132 = arith.constant dense<0.000000e+00> : vector<8x64xf32>
    %346 = tpu.matmul %345, %2, %cst_132 {dimension_numbers = #tpu.dot_dimension_numbers<[1], [0], [0], [1], [0, 0, 1, 1], [], []>} : vector<8x64xf32>, vector<64x64xf32>, vector<8x64xf32> -> vector<8x64xf32>
    %347 = tpu.reciprocal %346 {approx = true} : vector<8x64xf32> -> vector<8x64xf32>
    %348 = arith.mulf %345, %347 : vector<8x64xf32>
    %349 = tpu.concatenate %334, %334, %334, %334, %334, %334, %334, %334 in 0 : vector<8x64xf32>, vector<8x64xf32>, vector<8x64xf32>, vector<8x64xf32>, vector<8x64xf32>, vector<8x64xf32>, vector<8x64xf32>, vector<8x64xf32> -> vector<64x64xf32>
    %350 = arith.mulf %349, %2 : vector<64x64xf32>
    %cst_133 = arith.constant dense<0.000000e+00> : vector<8x64xf32>
    %351 = tpu.matmul %348, %350, %cst_133 {dimension_numbers = #tpu.dot_dimension_numbers<[1], [0], [0], [1], [0, 0, 1, 1], [], []>} : vector<8x64xf32>, vector<64x64xf32>, vector<8x64xf32> -> vector<8x64xf32>
    %352 = tpu.concatenate %331, %351 in 0 : vector<8x64xf32>, vector<8x64xf32> -> vector<16x64xf32>
    %cst_134 = arith.constant dense<0.000000e+00> : vector<16x64xf32>
    %353 = tpu.matmul %352, %222, %cst_134 {dimension_numbers = #tpu.dot_dimension_numbers<[1], [0], [0], [1], [0, 0, 1, 1], [], []>} : vector<16x64xf32>, vector<64x64xf32>, vector<16x64xf32> -> vector<16x64xf32>
    %354 = vector.broadcast %230 : vector<1x64xf32> to vector<16x64xf32>
    %355 = arith.addf %353, %354 : vector<16x64xf32>
    %356 = arith.addf %355, %306 : vector<16x64xf32>
    %cst_135 = arith.constant dense<0.000000e+00> : vector<16xf32>
    %357 = vector.multi_reduction <add>, %356, %cst_135 [1] : vector<16x64xf32> to vector<16xf32>
    %358 = vector.shape_cast %357 : vector<16xf32> to vector<16x1xf32>
    %cst_136 = arith.constant 6.400000e+01 : f32
    %359 = vector.broadcast %cst_136 : f32 to vector<16x1xf32>
    %360 = arith.divf %358, %359 : vector<16x1xf32>
    %361 = vector.broadcast %360 : vector<16x1xf32> to vector<16x64xf32>
    %362 = arith.subf %356, %361 : vector<16x64xf32>
    %363 = arith.mulf %362, %362 : vector<16x64xf32>
    %cst_137 = arith.constant dense<0.000000e+00> : vector<16xf32>
    %364 = vector.multi_reduction <add>, %363, %cst_137 [1] : vector<16x64xf32> to vector<16xf32>
    %365 = vector.shape_cast %364 : vector<16xf32> to vector<16x1xf32>
    %cst_138 = arith.constant 6.400000e+01 : f32
    %366 = vector.broadcast %cst_138 : f32 to vector<16x1xf32>
    %367 = arith.divf %365, %366 : vector<16x1xf32>
    %368 = vector.broadcast %360 : vector<16x1xf32> to vector<16x64xf32>
    %369 = arith.subf %356, %368 : vector<16x64xf32>
    %cst_139 = arith.constant 9.99999974E-6 : f32
    %370 = vector.broadcast %cst_139 : f32 to vector<16x1xf32>
    %371 = arith.addf %367, %370 : vector<16x1xf32>
    %372 = math.rsqrt %371 : vector<16x1xf32>
    %373 = vector.broadcast %372 : vector<16x1xf32> to vector<16x64xf32>
    %374 = arith.mulf %369, %373 : vector<16x64xf32>
    %375 = vector.broadcast %231 : vector<1x64xf32> to vector<16x64xf32>
    %376 = arith.mulf %374, %375 : vector<16x64xf32>
    %377 = vector.broadcast %232 : vector<1x64xf32> to vector<16x64xf32>
    %378 = arith.addf %376, %377 : vector<16x64xf32>
    %cst_140 = arith.constant dense<0.000000e+00> : vector<16x256xf32>
    %379 = tpu.matmul %378, %224, %cst_140 {dimension_numbers = #tpu.dot_dimension_numbers<[1], [0], [0], [1], [0, 0, 1, 1], [], []>} : vector<16x64xf32>, vector<64x256xf32>, vector<16x256xf32> -> vector<16x256xf32>
    %380 = vector.broadcast %236 : vector<1x256xf32> to vector<16x256xf32>
    %381 = arith.addf %379, %380 : vector<16x256xf32>
    %cst_141 = arith.constant 0.000000e+00 : f32
    %382 = vector.broadcast %cst_141 : f32 to vector<16x256xf32>
    %383 = arith.maximumf %381, %382 : vector<16x256xf32>
    %cst_142 = arith.constant dense<0.000000e+00> : vector<16x64xf32>
    %384 = tpu.matmul %383, %226, %cst_142 {dimension_numbers = #tpu.dot_dimension_numbers<[1], [0], [0], [1], [0, 0, 1, 1], [], []>} : vector<16x256xf32>, vector<256x64xf32>, vector<16x64xf32> -> vector<16x64xf32>
    %385 = vector.broadcast %233 : vector<1x64xf32> to vector<16x64xf32>
    %386 = arith.addf %384, %385 : vector<16x64xf32>
    %387 = arith.addf %386, %378 : vector<16x64xf32>
    %cst_143 = arith.constant dense<0.000000e+00> : vector<16xf32>
    %388 = vector.multi_reduction <add>, %387, %cst_143 [1] : vector<16x64xf32> to vector<16xf32>
    %389 = vector.shape_cast %388 : vector<16xf32> to vector<16x1xf32>
    %cst_144 = arith.constant 6.400000e+01 : f32
    %390 = vector.broadcast %cst_144 : f32 to vector<16x1xf32>
    %391 = arith.divf %389, %390 : vector<16x1xf32>
    %392 = vector.broadcast %391 : vector<16x1xf32> to vector<16x64xf32>
    %393 = arith.subf %387, %392 : vector<16x64xf32>
    %394 = arith.mulf %393, %393 : vector<16x64xf32>
    %cst_145 = arith.constant dense<0.000000e+00> : vector<16xf32>
    %395 = vector.multi_reduction <add>, %394, %cst_145 [1] : vector<16x64xf32> to vector<16xf32>
    %396 = vector.shape_cast %395 : vector<16xf32> to vector<16x1xf32>
    %cst_146 = arith.constant 6.400000e+01 : f32
    %397 = vector.broadcast %cst_146 : f32 to vector<16x1xf32>
    %398 = arith.divf %396, %397 : vector<16x1xf32>
    %399 = vector.broadcast %391 : vector<16x1xf32> to vector<16x64xf32>
    %400 = arith.subf %387, %399 : vector<16x64xf32>
    %cst_147 = arith.constant 9.99999974E-6 : f32
    %401 = vector.broadcast %cst_147 : f32 to vector<16x1xf32>
    %402 = arith.addf %398, %401 : vector<16x1xf32>
    %403 = math.rsqrt %402 : vector<16x1xf32>
    %404 = vector.broadcast %403 : vector<16x1xf32> to vector<16x64xf32>
    %405 = arith.mulf %400, %404 : vector<16x64xf32>
    %406 = vector.broadcast %234 : vector<1x64xf32> to vector<16x64xf32>
    %407 = arith.mulf %405, %406 : vector<16x64xf32>
    %408 = vector.broadcast %235 : vector<1x64xf32> to vector<16x64xf32>
    %409 = arith.addf %407, %408 : vector<16x64xf32>
    %c2_148 = arith.constant 2 : index
    %c0_149 = arith.constant 0 : index
    %c0_150 = arith.constant 0 : index
    %410 = vector.load %arg4[%c2_148, %c0_149, %c0_150] : memref<3x64x256xf32, #tpu.memory_space<vmem>>, vector<1x64x256xf32>
    %411 = vector.shape_cast %410 : vector<1x64x256xf32> to vector<64x256xf32>
    %c2_151 = arith.constant 2 : index
    %c0_152 = arith.constant 0 : index
    %412 = vector.load %arg7[%c2_151, %c0_152] : memref<3x256xf32, #tpu.memory_space<vmem>>, vector<1x256xf32>
    %cst_153 = arith.constant dense<0.000000e+00> : vector<16x256xf32>
    %413 = tpu.matmul %409, %411, %cst_153 {dimension_numbers = #tpu.dot_dimension_numbers<[1], [0], [0], [1], [0, 0, 1, 1], [], []>} : vector<16x64xf32>, vector<64x256xf32>, vector<16x256xf32> -> vector<16x256xf32>
    %414 = vector.broadcast %412 : vector<1x256xf32> to vector<16x256xf32>
    %415 = arith.addf %413, %414 : vector<16x256xf32>
    %416 = vector.extract_strided_slice %415 {offsets = [0, 0], sizes = [16, 16], strides = [1, 1]} : vector<16x256xf32> to vector<16x16xf32>
    %cst_154 = arith.constant dense<0xFF800000> : vector<16xf32>
    %417 = vector.multi_reduction <maximumf>, %416, %cst_154 [1] : vector<16x16xf32> to vector<16xf32>
    %418 = vector.shape_cast %417 : vector<16xf32> to vector<16x1xf32>
    %419 = vector.broadcast %418 : vector<16x1xf32> to vector<16x16xf32>
    %420 = arith.subf %416, %419 : vector<16x16xf32>
    %421 = math.exp %420 : vector<16x16xf32>
    %cst_155 = arith.constant dense<0.000000e+00> : vector<16xf32>
    %422 = vector.multi_reduction <add>, %421, %cst_155 [1] : vector<16x16xf32> to vector<16xf32>
    %423 = vector.shape_cast %422 : vector<16xf32> to vector<16x1xf32>
    %424 = vector.broadcast %423 : vector<16x1xf32> to vector<16x16xf32>
    %425 = arith.divf %421, %424 : vector<16x16xf32>
    %c0_156 = arith.constant 0 : index
    %c0_157 = arith.constant 0 : index
    %426 = vector.load %arg8[%c0_156, %c0_157] : memref<16x16xf32, #tpu.memory_space<vmem>>, vector<16x16xf32>
    tpu.vector_store %arg8[%c0_156, %c0_157], %425 {strides = array<i32>} : memref<16x16xf32, #tpu.memory_space<vmem>>, vector<16x16xf32>,
    return
  }
}

</mosaic_0001>

<bundles_post_ra>
// kernel: transformer_decoder.1
= control target key start
LH: loop header
LB: loop body
LE: loop exit
PB: predicated region body
PF: predicated region fallthrough
CT: control target
= control target key end

     0   :  { %13 = vsyncpa [#allocation3], 0  ;;  %s11036_s0 = inlined_call_operand.vmem [shape: s32[16,1], index: 0, kind: input, shape index: {}]   ;;  %s11037_s1 = inlined_call_operand.vmem [shape: f32[16,64], index: 1, kind: input, shape index: {}]   ;;  %s11038_s2 = inlined_call_operand.vmem [shape: f32[8,8], index: 2, kind: input, shape index: {}]   ;;  %s11039_s3 = inlined_call_operand.vmem [shape: f32[9,64,64], index: 3, kind: input, shape index: {}]   ;;  %s11040_s4 = inlined_call_operand.hbm [shape: f32[3,64,256], index: 4, kind: input, shape index: {}]   ;;  %s11041_s5 = inlined_call_operand.vmem [shape: f32[2,256,64], index: 5, kind: input, shape index: {}]   ;;  %s11042_s6 = inlined_call_operand.vmem [shape: f32[50,64], index: 6, kind: input, shape index: {}]   ;;  %s11043_s7 = inlined_call_operand.vmem [shape: f32[3,256], index: 7, kind: input, shape index: {}]   ;;  %s11044_s8 = inlined_call_operand.hbm [shape: f32[16,16], index: 8, kind: output, shape index: {}]  }
   0x1   :  { %14 = vsyncpa [#allocation4], 0  ;;  %s7778_s27 = smov [#allocation2]   ;;  %s7730_s9 = scalar_lea.hbm %s11040_s4, 6144 }
   0x2   :  { %s28_s28 = sshll.u32 %s7778_s27, 4  ;;  %p7731_p0 = scmp.ne.s32.totalorder %s11040_s4, %s7730_s9  ;;  %s29_s28 = int_to_ptr.vmem [resolvable:$true] %s28_s28 }
   0x3   :  { %p7734_p1 = scmp.lt.u32.totalorder %s7730_s9, %s11040_s4 }
   0x5   :  { %p7736_p2 = pnand %p7734_p1, %p7731_p0 }
   0x7   :  { %7739 = shalt.err (!%p7736_p2)
}
   0x8   :  { %s7740_s14 = scalar_lea.vmem %s29_s28, 6144  ;;  %p7745_p4 = scmp.lt.s32.totalorder %s29_s28, %s29_s28 }
   0x9   :  { %p7741_p3 = scmp.ne.s32.totalorder %s29_s28, %s7740_s14  ;;  %p7746_p5 = scmp.lt.s32.totalorder %s7740_s14, %s7740_s14 }
   0xb   :  { %p7747_p6 = por %p7746_p5, %p7745_p4 }
   0xd   :  { %p7748_p7 = pnand %p7747_p6, %p7741_p3 }
   0xf   :  { %7751 = shalt.err (!%p7748_p7)
}
  0x10   :  { %s7779_s15 = smov 256   ;;  %s7780_s16 = smov 16  }
  0x11   :  { %34 = dma.hbm_to_vmem [thread:$0]  %s11040_s4, 6144, %s29_s28, [#allocation3], %s7779_s15, %s7779_s15, %s7780_s16  }
  0x12   :  { %7774 = dma.done.wait [#allocation3], 6144  }
  0x13   :  { %7775 = vsyncadd [#allocation3], 4294961152  ;;  %v195_v0 = vld [vmem:[%s11039_s3] sm:$0xff]  ;;  %v196_v1 = vld [vmem:[%s11039_s3 + $0x8] sm:$0xff]  ;;  %vm288_vm0 = vcmask 523264   ;;  %v11045_v15 = vmov 0   ;;  %v11046_v23 = vlaneseq }
  0x14   :  { %v197_v2 = vld [vmem:[%s11039_s3 + $0x10] sm:$0xff]  ;;  %v7091_v3 = vpack.c.bf16 %v196_v1, %v195_v0  ;;  %v198_v4 = vld [vmem:[%s11039_s3 + $0x18] sm:$0xff]  ;;  %v199_v6 = vld [vmem:[%s11039_s3 + $0x20] sm:$0xff]  ;;  %7634 = vset.pattern.permute.xlu1 %v11045_v15  ;;  %vm82_vm1 = vcmask 130048   ;;  %v11049_v26 = vmov 0.0   ;;  %s7784_s25 = smov 24  }
  0x15   :  { %v7095_v5 = vpack.c.bf16 %v198_v4, %v197_v2  ;;  %v200_v7 = vld [vmem:[%s11039_s3 + $0x28] sm:$0xff]  ;;  %v44_v8 = vld [vmem:[%s11037_s1] sm:$0xff]  ;;  %v201_v10 = vld [vmem:[%s11039_s3 + $0x30] sm:$0xff]  ;;  %v97_v24 = vand.u32 127, %v11046_v23  ;;  %s7785_s26 = smov 56   ;;  %s7786_s4 = smov 32  }
  0x16   :  { %7092 = vmatprep.subr.bf16.mxu1 %v7091_v3  ;;  %6483 = vmatprep.mubr.msk.f32.mxu1 %vm288_vm0, %v44_v8  ;;  %v7099_v9 = vpack.c.bf16 %v200_v7, %v199_v6  ;;  %v202_v11 = vld [vmem:[%s11039_s3 + $0x38] sm:$0xff]  ;;  %v45_v13 = vld [vmem:[%s11037_s1 + $0x8] sm:$0xff]  ;;  %v94_v14 = vld [vmem:[%s11036_s0] sm:$0xff]  ;;  %s7787_s27 = smov 40   ;;  %s7788_s28 = smov 48   ;;  %v11047_v34 = vmov 0.0|0.0  }
  0x17   :  { %7094 = vmatpush3.bf16.msra.mxu1 %v7091_v3  ;;  %v7103_v12 = vpack.c.bf16 %v202_v11, %v201_v10  ;;  %99 = vperm.xlu1 %7634, %v94_v14   ;;  %v95_v16 = vld [vmem:[%s11036_s0 + $0x8] sm:$0xff]  ;;  %v110_v20 = vld [vmem:[%s11042_s6] sm:$0xff]  ;;  %s7783_s0 = smov 8   ;;  %vm7790_vm5 = vmmov 0   ;;  %vm80_vm6 = vcmask 64512   ;;  %vm84_vm7 = vcmask 195584  }
  0x18   :  { %7096 = vmatprep.subr.bf16.mxu1 %v7095_v5  ;;  %v111_v21 = vld [vmem:[%s11042_s6 + $0x8] sm:$0xff]  ;;  %v55_v37 = vld [vmem:[%s11038_s2] sm:$0xff]  ;;  %vm86_vm8 = vcmask 261120   ;;  %vm88_vm9 = vcmask 326656   ;;  %vm90_vm10 = vcmask 392192   ;;  %vm92_vm11 = vcmask 457728  }
  0x19   :  { %v7087_v22 = vpack.c.bf16 %v111_v21, %v110_v20  ;;  %vm56_vm4 = vcmp.eq.f32.partialorder %v55_v37, 0.0  ;;  %v8083_v6 = vld [vmem:[%s11039_s3 + $0x208] sm:$0xff] }
  0x1a   :  { %v8006_v38 = vsel %vm56_vm4, -1e+20, %v11049_v26 }
  0x1b   :  { %7098 = vmatpush3.bf16.msra.mxu1 %v7095_v5  ;;  %102 = vperm.xlu1 %7634, %v95_v16   ;;  %v8078_v5 = vld [vmem:[%s11039_s3 + $0x200] sm:$0xff] }
  0x1c   :  { %7100 = vmatprep.subr.bf16.mxu1 %v7099_v9  ;;  %7088 = vmatprep.subr.bf16.mxu0 %v7087_v22 }
  0x1d   :  { %7090 = vmatpush3.bf16.msra.mxu0 %v7087_v22 }
  0x1e   :  { %7107 = vmatprep.subr.bf16.mxu0 %v11047_v34 }
  0x1f   :  { %7102 = vmatpush3.bf16.msra.mxu1 %v7099_v9 }
  0x20   :  { %7104 = vmatprep.subr.bf16.mxu1 %v7103_v12 }
  0x23   :  { %7106 = vmatpush3.bf16.msra.mxu1 %v7103_v12 }
  0x24   :  { %7119 = vmatprep.subr.bf16.mxu1 %v11047_v34 }
  0x26   :  { %6484 = vmatmul.mubr.msk.f32.vlgmr.msra.gmra.mrb[0].mxu1 %vm288_vm0, %v45_v13 }
  0x27   :  { %6521 = vmatprep.mubr.msk.f32.mxu1 %vm7790_vm5, %v11049_v26 }
  0x96   :  { %v100_v19 = vpop.permute.xlu1 %99 }
  0x97   :  { %vm104_vm3 = vcmp.eq.s32.totalorder %v97_v24, %v100_v19 }
  0x98   :  { %v5910_v28 = vsel %vm104_vm3, 1.0, %v11049_v26 }
  0x99   :  { %6464 = vmatprep.mubr.msk.f32.mxu0 %vm82_vm1, %v5910_v28 }
  0x9a   :  { %v103_v25 = vpop.permute.xlu1 %102 }
  0x9b   :  { %vm105_vm2 = vcmp.eq.s32.totalorder %v97_v24, %v103_v25 }
  0x9c   :  { %v5911_v27 = vsel %vm105_vm2, 1.0, %v11049_v26 }
  0x9d   :  { %6465 = vmatmul.mubr.msk.f32.vlgmr.msra.gmra.mrb[0].mxu0 %vm82_vm1, %v5911_v27 }
  0x9e   :  { %6502 = vmatprep.mubr.msk.f32.mxu0 %vm7790_vm5, %v11049_v26 }
  0xf9   :  { %v7890_v17 = vpop.f32.mrb[0].mxu1 }
  0xfa   :  { %11112 = vst [vmem:[#allocation8_spill] sm:$0xff] %v7890_v17  ;;  %v7892_v18 = vpop.f32.mrb[1].mxu1 }
  0xfb   :  { %370 = vxpose.xlu0.b32.start.end [1/1] (short) (narrow) %v7892_v18, 64 }
 0x17b   :  { %v7906_v29 = vpop.trf.xlu0 }
 0x17c   :  { %434 = vrot.lane.b32.xlu1 %v7906_v29, %s7780_s16  ;;  %410 = vrot.lane.b32.xlu0 %v7906_v29, %s7783_s0 }
 0x17f   :  { %v7912_v30 = vpop.trf.xlu0 }
 0x180   :  { %458 = vrot.lane.b32.xlu1 %v7906_v29, %s7784_s25  ;;  %554 = vrot.lane.b32.xlu0 %v7906_v29, %s7785_s26 }
 0x183   :  { %v7918_v31 = vpop.trf.xlu0 }
 0x184   :  { %482 = vrot.lane.b32.xlu1 %v7906_v29, %s7786_s4  ;;  %486 = vrot.lane.b32.xlu0 %v7918_v31, %s7786_s4 }
 0x187   :  { %v7928_v32 = vpop.trf.xlu0 }
 0x188   :  { %506 = vrot.lane.b32.xlu1 %v7906_v29, %s7787_s27  ;;  %510 = vrot.lane.b32.xlu0 %v7918_v31, %s7787_s27 }
 0x18b   :  { %v7938_v33 = vpop.trf.xlu0 }
 0x18c   :  { %530 = vrot.lane.b32.xlu1 %v7906_v29, %s7788_s28  ;;  %534 = vrot.lane.b32.xlu0 %v7918_v31, %s7788_s28 }
 0x18f   :  { %v7962_v35 = vpop.trf.xlu0 }
 0x190   :  { %412 = vrot.lane.b32.xlu1 %v7912_v30, %s7783_s0  ;;  %558 = vrot.lane.b32.xlu0 %v7918_v31, %s7785_s26 }
 0x193   :  { %v7972_v36 = vpop.trf.xlu0 }
 0x194   :  { %436 = vrot.lane.b32.xlu1 %v7912_v30, %s7780_s16  ;;  %418 = vrot.lane.b32.xlu0 %v7938_v33, %s7783_s0 }
 0x197   :  { %v8034_v40 = vpop.trf.xlu0 }
 0x198   :  { %460 = vrot.lane.b32.xlu1 %v7912_v30, %s7784_s25  ;;  %442 = vrot.lane.b32.xlu0 %v7938_v33, %s7780_s16 }
 0x19c   :  { %484 = vrot.lane.b32.xlu1 %v7912_v30, %s7786_s4  ;;  %466 = vrot.lane.b32.xlu0 %v7938_v33, %s7784_s25 }
 0x1a0   :  { %508 = vrot.lane.b32.xlu1 %v7912_v30, %s7787_s27  ;;  %490 = vrot.lane.b32.xlu0 %v7938_v33, %s7786_s4 }
 0x1a4   :  { %532 = vrot.lane.b32.xlu1 %v7912_v30, %s7788_s28  ;;  %514 = vrot.lane.b32.xlu0 %v7938_v33, %s7787_s27 }
 0x1a8   :  { %556 = vrot.lane.b32.xlu1 %v7912_v30, %s7785_s26  ;;  %538 = vrot.lane.b32.xlu0 %v7938_v33, %s7788_s28 }
 0x1ac   :  { %414 = vrot.lane.b32.xlu1 %v7918_v31, %s7783_s0  ;;  %562 = vrot.lane.b32.xlu0 %v7938_v33, %s7785_s26 }
 0x1b0   :  { %438 = vrot.lane.b32.xlu1 %v7918_v31, %s7780_s16  ;;  %422 = vrot.lane.b32.xlu0 %v7972_v36, %s7783_s0 }
 0x1b4   :  { %462 = vrot.lane.b32.xlu1 %v7918_v31, %s7784_s25  ;;  %446 = vrot.lane.b32.xlu0 %v7972_v36, %s7780_s16 }
 0x1b8   :  { %416 = vrot.lane.b32.xlu1 %v7928_v32, %s7783_s0  ;;  %470 = vrot.lane.b32.xlu0 %v7972_v36, %s7784_s25 }
 0x1bc   :  { %440 = vrot.lane.b32.xlu1 %v7928_v32, %s7780_s16  ;;  %494 = vrot.lane.b32.xlu0 %v7972_v36, %s7786_s4 }
 0x1c0   :  { %464 = vrot.lane.b32.xlu1 %v7928_v32, %s7784_s25  ;;  %518 = vrot.lane.b32.xlu0 %v7972_v36, %s7787_s27 }
 0x1c4   :  { %488 = vrot.lane.b32.xlu1 %v7928_v32, %s7786_s4  ;;  %542 = vrot.lane.b32.xlu0 %v7972_v36, %s7788_s28 }
 0x1c8   :  { %512 = vrot.lane.b32.xlu1 %v7928_v32, %s7787_s27  ;;  %566 = vrot.lane.b32.xlu0 %v7972_v36, %s7785_s26 }
 0x1cc   :  { %536 = vrot.lane.b32.xlu1 %v7928_v32, %s7788_s28  ;;  %59 = vrot.lane.b32.xlu0 %v8006_v38, %s7783_s0 }
 0x1d0   :  { %560 = vrot.lane.b32.xlu1 %v7928_v32, %s7785_s26  ;;  %65 = vrot.lane.b32.xlu0 %v8006_v38, %s7784_s25 }
 0x1d4   :  { %420 = vrot.lane.b32.xlu1 %v7962_v35, %s7783_s0  ;;  %71 = vrot.lane.b32.xlu0 %v8006_v38, %s7787_s27 }
 0x1d8   :  { %444 = vrot.lane.b32.xlu1 %v7962_v35, %s7780_s16  ;;  %77 = vrot.lane.b32.xlu0 %v8006_v38, %s7785_s26 }
 0x1dc   :  { %468 = vrot.lane.b32.xlu1 %v7962_v35, %s7784_s25 }
 0x1e0   :  { %492 = vrot.lane.b32.xlu1 %v7962_v35, %s7786_s4 }
 0x1e4   :  { %516 = vrot.lane.b32.xlu1 %v7962_v35, %s7787_s27 }
 0x1e8   :  { %540 = vrot.lane.b32.xlu1 %v7962_v35, %s7788_s28 }
 0x1ec   :  { %564 = vrot.lane.b32.xlu1 %v7962_v35, %s7785_s26 }
 0x1ee   :  { %v435_v39 = vpop.permute.xlu1 %434  ;;  %v411_v46 = vpop.permute.xlu0 %410 }
 0x1ef   :  { %v578_v51 = vsel %vm80_vm6, %v7906_v29, %v411_v46 }
 0x1f0   :  { %424 = vrot.lane.b32.xlu1 %v8034_v40, %s7783_s0  ;;  %v586_v53 = vsel %vm82_vm1, %v578_v51, %v435_v39 }
 0x1f2   :  { %v459_v41 = vpop.permute.xlu1 %458  ;;  %v555_v48 = vpop.permute.xlu0 %554 }
 0x1f3   :  { %v594_v55 = vsel %vm84_vm7, %v586_v53, %v459_v41 }
 0x1f4   :  { %448 = vrot.lane.b32.xlu1 %v8034_v40, %s7780_s16 }
 0x1f6   :  { %v483_v42 = vpop.permute.xlu1 %482  ;;  %v487_v52 = vpop.permute.xlu0 %486 }
 0x1f7   :  { %v602_v56 = vsel %vm86_vm8, %v594_v55, %v483_v42  ;;  %v8117_v55 = vld [vmem:[%s11039_s3 + $0x218] sm:$0xff] }
 0x1f8   :  { %472 = vrot.lane.b32.xlu1 %v8034_v40, %s7784_s25 }
 0x1fa   :  { %v507_v43 = vpop.permute.xlu1 %506  ;;  %v511_v59 = vpop.permute.xlu0 %510 }
 0x1fb   :  { %v610_v57 = vsel %vm88_vm9, %v602_v56, %v507_v43  ;;  %v8095_v43 = vpop.f32.mrb[0].mxu0 }
 0x1fc   :  { %496 = vrot.lane.b32.xlu1 %v8034_v40, %s7786_s4  ;;  %11113 = vst [vmem:[#allocation9_spill] sm:$0xff] %v8095_v43 }
 0x1fe   :  { %v531_v44 = vpop.permute.xlu1 %530  ;;  %v535_v9 = vpop.permute.xlu0 %534 }
 0x1ff   :  { %v618_v60 = vsel %vm90_vm10, %v610_v57, %v531_v44  ;;  %v8097_v44 = vpop.f32.mrb[1].mxu0 }
 0x200   :  { %520 = vrot.lane.b32.xlu1 %v8034_v40, %s7787_s27  ;;  %v626_v1 = vsel %vm92_vm11, %v618_v60, %v555_v48  ;;  %11114 = vst [vmem:[#allocation10_spill] sm:$0xff] %v8097_v44 }
 0x201   :  { %v634_v8 = vmul.f32 %v8078_v5, %v626_v1 }
 0x202   :  { %v413_v45 = vpop.permute.xlu1 %412  ;;  %v559_v13 = vpop.permute.xlu0 %558 }
 0x203   :  { %v579_v58 = vsel %vm80_vm6, %v7912_v30, %v413_v45 }
 0x204   :  { %544 = vrot.lane.b32.xlu1 %v8034_v40, %s7788_s28 }
 0x206   :  { %v437_v47 = vpop.permute.xlu1 %436  ;;  %v419_v19 = vpop.permute.xlu0 %418 }
 0x207   :  { %v587_v61 = vsel %vm82_vm1, %v579_v58, %v437_v47 }
 0x208   :  { %568 = vrot.lane.b32.xlu1 %v8034_v40, %s7785_s26 }
 0x20a   :  { %v461_v49 = vpop.permute.xlu1 %460  ;;  %v443_v21 = vpop.permute.xlu0 %442 }
 0x20b   :  { %v595_v63 = vsel %vm84_vm7, %v587_v61, %v461_v49 }
 0x20c   :  { %62 = vrot.lane.b32.xlu1 %v8006_v38, %s7780_s16 }
 0x20e   :  { %v485_v50 = vpop.permute.xlu1 %484  ;;  %v467_v27 = vpop.permute.xlu0 %466 }
 0x20f   :  { %v603_v0 = vsel %vm86_vm8, %v595_v63, %v485_v50 }
 0x210   :  { %68 = vrot.lane.b32.xlu1 %v8006_v38, %s7786_s4 }
 0x212   :  { %v509_v54 = vpop.permute.xlu1 %508  ;;  %v491_v39 = vpop.permute.xlu0 %490 }
 0x213   :  { %v611_v2 = vsel %vm88_vm9, %v603_v0, %v509_v54 }
 0x214   :  { %74 = vrot.lane.b32.xlu1 %v8006_v38, %s7788_s28 }
 0x216   :  { %v533_v62 = vpop.permute.xlu1 %532  ;;  %v515_v49 = vpop.permute.xlu0 %514 }
 0x217   :  { %v619_v3 = vsel %vm90_vm10, %v611_v2, %v533_v62 }
 0x21a   :  { %v557_v4 = vpop.permute.xlu1 %556 }
 0x21b   :  { %v627_v7 = vsel %vm92_vm11, %v619_v3, %v557_v4  ;;  %v582_v4 = vsel %vm80_vm6, %v7938_v33, %v419_v19 }
 0x21c   :  { %v635_v10 = vmul.f32 %v8083_v6, %v627_v7  ;;  %v590_v7 = vsel %vm82_vm1, %v582_v4, %v443_v21 }
 0x21e   :  { %v7108_v11 = vpack.c.bf16 %v635_v10, %v634_v8  ;;  %v415_v12 = vpop.permute.xlu1 %414 }
 0x21f   :  { %v580_v25 = vsel %vm80_vm6, %v7918_v31, %v415_v12 }
 0x220   :  { %7109 = vmatpush3.bf16.msra.mxu0 %v7108_v11 }
 0x221   :  { %7110 = vmatprep.subr.bf16.mxu0 %v11047_v34 }
 0x222   :  { %v439_v14 = vpop.permute.xlu1 %438 }
 0x223   :  { %v588_v28 = vsel %vm82_vm1, %v580_v25, %v439_v14  ;;  %v8141_v25 = vld [vmem:[%s11039_s3 + $0x220] sm:$0xff] }
 0x224   :  { %11115 = vst [vmem:[#allocation11_spill] sm:$0xff] %v8141_v25 }
 0x226   :  { %v463_v16 = vpop.permute.xlu1 %462 }
 0x227   :  { %v596_v29 = vsel %vm84_vm7, %v588_v28, %v463_v16 }
 0x228   :  { %v604_v37 = vsel %vm86_vm8, %v596_v29, %v487_v52 }
 0x229   :  { %v612_v42 = vsel %vm88_vm9, %v604_v37, %v511_v59  ;;  %v539_v59 = vpop.permute.xlu0 %538 }
 0x22a   :  { %v417_v20 = vpop.permute.xlu1 %416  ;;  %v620_v31 = vsel %vm90_vm10, %v612_v42, %v535_v9  ;;  %v598_v9 = vsel %vm84_vm7, %v590_v7, %v467_v27  ;;  %v8146_v27 = vld [vmem:[%s11039_s3 + $0x228] sm:$0xff] }
 0x22b   :  { %v581_v45 = vsel %vm80_vm6, %v7928_v32, %v417_v20  ;;  %v628_v52 = vsel %vm92_vm11, %v620_v31, %v559_v13  ;;  %v8112_v32 = vld [vmem:[%s11039_s3 + $0x210] sm:$0xff]  ;;  %v606_v11 = vsel %vm86_vm8, %v598_v9, %v491_v39  ;;  %11116 = vst [vmem:[#allocation12_spill] sm:$0xff] %v8146_v27  ;;  %v798_v9 = vmul.f32 %v8083_v6, %v7892_v18 }
 0x22c   :  { %v636_v57 = vmul.f32 %v8112_v32, %v628_v52  ;;  %v614_v14 = vsel %vm88_vm9, %v606_v11, %v515_v49  ;;  %v799_v11 = vmul.f32 %v8112_v32, %v7892_v18 }
 0x22d   :  { %v563_v63 = vpop.permute.xlu0 %562  ;;  %v622_v20 = vsel %vm90_vm10, %v614_v14, %v539_v59  ;;  %v801_v14 = vmul.f32 %v8141_v25, %v7892_v18 }
 0x22e   :  { %v441_v22 = vpop.permute.xlu1 %440  ;;  %v630_v19 = vsel %vm92_vm11, %v622_v20, %v563_v63 }
 0x22f   :  { %v589_v46 = vsel %vm82_vm1, %v581_v45, %v441_v22  ;;  %v638_v29 = vmul.f32 %v8141_v25, %v630_v19 }
 0x231   :  { %v423_v1 = vpop.permute.xlu0 %422 }
 0x232   :  { %v465_v24 = vpop.permute.xlu1 %464  ;;  %v584_v49 = vsel %vm80_vm6, %v7972_v36, %v423_v1  ;;  %v8175_v1 = vld [vmem:[%s11039_s3 + $0x238] sm:$0xff] }
 0x233   :  { %v597_v48 = vsel %vm84_vm7, %v589_v46, %v465_v24  ;;  %11118 = vst [vmem:[#allocation14_spill] sm:$0xff] %v8175_v1  ;;  %v804_v19 = vmul.f32 %v8175_v1, %v7892_v18 }
 0x235   :  { %v447_v8 = vpop.permute.xlu0 %446 }
 0x236   :  { %v489_v30 = vpop.permute.xlu1 %488 }
 0x237   :  { %v605_v50 = vsel %vm86_vm8, %v597_v48, %v489_v30 }
 0x239   :  { %v471_v22 = vpop.permute.xlu0 %470 }
 0x23a   :  { %v513_v41 = vpop.permute.xlu1 %512 }
 0x23b   :  { %v613_v51 = vsel %vm88_vm9, %v605_v50, %v513_v41  ;;  %v592_v50 = vsel %vm82_vm1, %v584_v49, %v447_v8  ;;  %v797_v8 = vmul.f32 %v8078_v5, %v7892_v18 }
 0x23d   :  { %878 = vxpose.xlu1.b32.start.end [1/1] (short) (narrow) %v7890_v17, 64  ;;  %v495_v41 = vpop.permute.xlu0 %494 }
 0x23e   :  { %v537_v47 = vpop.permute.xlu1 %536 }
 0x23f   :  { %v621_v53 = vsel %vm90_vm10, %v613_v51, %v537_v47  ;;  %v600_v51 = vsel %vm84_vm7, %v592_v50, %v471_v22 }
 0x241   :  { %v519_v45 = vpop.permute.xlu0 %518 }
 0x242   :  { %v561_v54 = vpop.permute.xlu1 %560 }
 0x243   :  { %v629_v56 = vsel %vm92_vm11, %v621_v53, %v561_v54  ;;  %v608_v53 = vsel %vm86_vm8, %v600_v51, %v495_v41 }
 0x244   :  { %v637_v58 = vmul.f32 %v8117_v55, %v629_v56 }
 0x245   :  { %v543_v47 = vpop.permute.xlu0 %542 }
 0x246   :  { %v7111_v60 = vpack.c.bf16 %v637_v58, %v636_v57  ;;  %v421_v61 = vpop.permute.xlu1 %420  ;;  %v616_v58 = vsel %vm88_vm9, %v608_v53, %v519_v45 }
 0x247   :  { %v583_v10 = vsel %vm80_vm6, %v7962_v35, %v421_v61 }
 0x248   :  { %7112 = vmatpush3.bf16.msra.mxu0 %v7111_v60  ;;  %v624_v60 = vsel %vm90_vm10, %v616_v58, %v543_v47  ;;  %v8327_v47 = vpack.c.bf16 %v8083_v6, %v8078_v5 }
 0x249   :  { %7113 = vmatprep.subr.bf16.mxu0 %v11047_v34  ;;  %v567_v54 = vpop.permute.xlu0 %566 }
 0x24a   :  { %v445_v62 = vpop.permute.xlu1 %444  ;;  %v632_v61 = vsel %vm92_vm11, %v624_v60, %v567_v54  ;;  %11120 = vst [vmem:[#allocation16_spill] sm:$0xff] %v8327_v47  ;;  %7121 = vmatpush3.bf16.msra.mxu1 %v8327_v47 }
 0x24b   :  { %v591_v12 = vsel %vm82_vm1, %v583_v10, %v445_v62  ;;  %v7132_v10 = vpack.c.bf16 %v798_v9, %v797_v8  ;;  %7122 = vmatprep.subr.bf16.mxu1 %v11047_v34  ;;  %v8377_v9 = vpack.c.bf16 %v8117_v55, %v8112_v32 }
 0x24d   :  { %11122 = vst [vmem:[#allocation18_spill] sm:$0xff] %v8377_v9 }
 0x24e   :  { %v469_v0 = vpop.permute.xlu1 %468  ;;  %7124 = vmatpush3.bf16.msra.mxu1 %v8377_v9 }
 0x24f   :  { %v599_v16 = vsel %vm84_vm7, %v591_v12, %v469_v0  ;;  %v8170_v0 = vld [vmem:[%s11039_s3 + $0x230] sm:$0xff]  ;;  %v800_v12 = vmul.f32 %v8117_v55, %v7892_v18  ;;  %7125 = vmatprep.subr.bf16.mxu1 %v11047_v34 }
 0x250   :  { %11117 = vst [vmem:[#allocation13_spill] sm:$0xff] %v8170_v0 }
 0x252   :  { %v493_v2 = vpop.permute.xlu1 %492 }
 0x253   :  { %v607_v33 = vsel %vm86_vm8, %v599_v16, %v493_v2  ;;  %v802_v16 = vmul.f32 %v8146_v27, %v7892_v18 }
 0x255   :  { %v7138_v20 = vpack.c.bf16 %v802_v16, %v801_v14 }
 0x256   :  { %v517_v3 = vpop.permute.xlu1 %516 }
 0x257   :  { %v615_v21 = vsel %vm88_vm9, %v607_v33, %v517_v3  ;;  %v640_v3 = vmul.f32 %v8170_v0, %v632_v61  ;;  %v803_v33 = vmul.f32 %v8170_v0, %v7892_v18 }
 0x25a   :  { %v541_v13 = vpop.permute.xlu1 %540 }
 0x25b   :  { %v623_v35 = vsel %vm90_vm10, %v615_v21, %v541_v13  ;;  %v7135_v13 = vpack.c.bf16 %v800_v12, %v799_v11  ;;  %v7141_v21 = vpack.c.bf16 %v804_v19, %v803_v33  ;;  %v8384_v11 = vpack.c.bf16 %v8146_v27, %v8141_v25 }
 0x25c   :  { %v8392_v12 = vpack.c.bf16 %v8175_v1, %v8170_v0 }
 0x25d   :  { %11123 = vst [vmem:[#allocation19_spill] sm:$0xff] %v8384_v11  ;;  %7127 = vmatpush3.bf16.msra.mxu1 %v8384_v11 }
 0x25e   :  { %v565_v24 = vpop.permute.xlu1 %564  ;;  %11124 = vst [vmem:[#allocation20_spill] sm:$0xff] %v8392_v12  ;;  %7128 = vmatprep.subr.bf16.mxu1 %v11047_v34 }
 0x25f   :  { %v631_v28 = vsel %vm92_vm11, %v623_v35, %v565_v24 }
 0x260   :  { %v639_v30 = vmul.f32 %v8146_v27, %v631_v28 }
 0x261   :  { %7130 = vmatpush3.bf16.msra.mxu1 %v8392_v12 }
 0x262   :  { %v7114_v37 = vpack.c.bf16 %v639_v30, %v638_v29  ;;  %v425_v39 = vpop.permute.xlu1 %424  ;;  %7143 = vmatprep.subr.bf16.mxu1 %v11047_v34 }
 0x263   :  { %v585_v52 = vsel %vm80_vm6, %v8034_v40, %v425_v39 }
 0x264   :  { %7115 = vmatpush3.bf16.msra.mxu0 %v7114_v37 }
 0x265   :  { %7116 = vmatprep.subr.bf16.mxu0 %v11047_v34 }
 0x266   :  { %v449_v42 = vpop.permute.xlu1 %448 }
 0x267   :  { %v593_v56 = vsel %vm82_vm1, %v585_v52, %v449_v42  ;;  %v60_v42 = vpop.permute.xlu0 %59 }
 0x268   :  { %v81_v53 = vsel %vm80_vm6, %v8006_v38, %v60_v42 }
 0x26a   :  { %v473_v31 = vpop.permute.xlu1 %472 }
 0x26b   :  { %v601_v59 = vsel %vm84_vm7, %v593_v56, %v473_v31  ;;  %v66_v31 = vpop.permute.xlu0 %65 }
 0x26e   :  { %v497_v46 = vpop.permute.xlu1 %496 }
 0x26f   :  { %v609_v36 = vsel %vm86_vm8, %v601_v59, %v497_v46  ;;  %v72_v46 = vpop.permute.xlu0 %71 }
 0x272   :  { %v521_v48 = vpop.permute.xlu1 %520 }
 0x273   :  { %v617_v62 = vsel %vm88_vm9, %v609_v36, %v521_v48  ;;  %v78_v48 = vpop.permute.xlu0 %77 }
 0x276   :  { %v545_v57 = vpop.permute.xlu1 %544 }
 0x277   :  { %v625_v40 = vsel %vm90_vm10, %v617_v62, %v545_v57 }
 0x27a   :  { %v569_v63 = vpop.permute.xlu1 %568 }
 0x27b   :  { %v633_v2 = vsel %vm92_vm11, %v625_v40, %v569_v63 }
 0x27c   :  { %v641_v4 = vmul.f32 %v8175_v1, %v633_v2 }
 0x27e   :  { %v7117_v7 = vpack.c.bf16 %v641_v4, %v640_v3  ;;  %v8205_v22 = vpop.permute.xlu1 %62 }
 0x27f   :  { %v83_v54 = vsel %vm82_vm1, %v81_v53, %v8205_v22 }
 0x280   :  { %7118 = vmatpush3.bf16.msra.mxu0 %v7117_v7  ;;  %v85_v57 = vsel %vm84_vm7, %v83_v54, %v66_v31 }
 0x281   :  { %7131 = vmatprep.subr.bf16.mxu0 %v11047_v34 }
 0x282   :  { %v8207_v35 = vpop.permute.xlu1 %68 }
 0x283   :  { %6503 = vmatmul.mubr.msk.f32.vlgmr.msra.gmra.mrb[2].mxu0 %vm288_vm0, %v7892_v18  ;;  %v87_v58 = vsel %vm86_vm8, %v85_v57, %v8207_v35 }
 0x284   :  { %7133 = vmatpush3.bf16.msra.mxu0 %v7132_v10  ;;  %6540 = vmatprep.mubr.msk.f32.mxu0 %vm7790_vm5, %v11049_v26  ;;  %v89_v60 = vsel %vm88_vm9, %v87_v58, %v72_v46 }
 0x285   :  { %7134 = vmatprep.subr.bf16.mxu0 %v11047_v34 }
 0x286   :  { %v8209_v24 = vpop.permute.xlu1 %74 }
 0x287   :  { %v91_v36 = vsel %vm90_vm10, %v89_v60, %v8209_v24 }
 0x288   :  { %7136 = vmatpush3.bf16.msra.mxu0 %v7135_v13  ;;  %v8364_v38 = vsel %vm92_vm11, %v91_v36, %v78_v48 }
 0x289   :  { %7137 = vmatprep.subr.bf16.mxu0 %v11047_v34  ;;  %11121 = vst [vmem:[#allocation17_spill] sm:$0xff] %v8364_v38 }
 0x28c   :  { %7139 = vmatpush3.bf16.msra.mxu0 %v7138_v20 }
 0x28d   :  { %7140 = vmatprep.subr.bf16.mxu0 %v11047_v34 }
 0x290   :  { %7142 = vmatpush3.bf16.msra.mxu0 %v7141_v21 }
 0x291   :  { %7155 = vmatprep.subr.bf16.mxu0 %v11047_v34 }
 0x2bd   :  { %v8211_v28 = vpop.trf.xlu1 }
 0x2be   :  { %918 = vrot.lane.b32.xlu0 %v8211_v28, %s7783_s0 }
 0x2c1   :  { %v8215_v29 = vpop.trf.xlu1 }
 0x2c2   :  { %942 = vrot.lane.b32.xlu0 %v8211_v28, %s7780_s16  ;;  %920 = vrot.lane.b32.xlu1 %v8215_v29, %s7783_s0 }
 0x2c5   :  { %v8225_v18 = vpop.trf.xlu1 }
 0x2c6   :  { %944 = vrot.lane.b32.xlu0 %v8215_v29, %s7780_s16  ;;  %1038 = vrot.lane.b32.xlu1 %v8211_v28, %s7788_s28 }
 0x2c9   :  { %v8231_v30 = vpop.trf.xlu1 }
 0x2ca   :  { %966 = vrot.lane.b32.xlu0 %v8211_v28, %s7784_s25  ;;  %970 = vrot.lane.b32.xlu1 %v8225_v18, %s7784_s25 }
 0x2cd   :  { %v8241_v37 = vpop.trf.xlu1 }
 0x2ce   :  { %968 = vrot.lane.b32.xlu0 %v8215_v29, %s7784_s25  ;;  %1062 = vrot.lane.b32.xlu1 %v8211_v28, %s7785_s26 }
 0x2d1   :  { %v8263_v39 = vpop.trf.xlu1 }
 0x2d2   :  { %990 = vrot.lane.b32.xlu0 %v8211_v28, %s7786_s4  ;;  %994 = vrot.lane.b32.xlu1 %v8225_v18, %s7786_s4 }
 0x2d5   :  { %v8273_v41 = vpop.trf.xlu1 }
 0x2d6   :  { %992 = vrot.lane.b32.xlu0 %v8215_v29, %s7786_s4  ;;  %926 = vrot.lane.b32.xlu1 %v8241_v37, %s7783_s0  ;;  %11119 = vst [vmem:[#allocation15_spill] sm:$0xff] %v8273_v41 }
 0x2d9   :  { %v8317_v45 = vpop.trf.xlu1 }
 0x2da   :  { %922 = vrot.lane.b32.xlu0 %v8225_v18, %s7783_s0  ;;  %1018 = vrot.lane.b32.xlu1 %v8225_v18, %s7787_s27 }
 0x2de   :  { %924 = vrot.lane.b32.xlu0 %v8231_v30, %s7783_s0  ;;  %950 = vrot.lane.b32.xlu1 %v8241_v37, %s7780_s16 }
 0x2e2   :  { %1014 = vrot.lane.b32.xlu0 %v8211_v28, %s7787_s27  ;;  %1042 = vrot.lane.b32.xlu1 %v8225_v18, %s7788_s28 }
 0x2e6   :  { %1016 = vrot.lane.b32.xlu0 %v8215_v29, %s7787_s27  ;;  %974 = vrot.lane.b32.xlu1 %v8241_v37, %s7784_s25 }
 0x2ea   :  { %946 = vrot.lane.b32.xlu0 %v8225_v18, %s7780_s16  ;;  %1066 = vrot.lane.b32.xlu1 %v8225_v18, %s7785_s26 }
 0x2ee   :  { %948 = vrot.lane.b32.xlu0 %v8231_v30, %s7780_s16  ;;  %998 = vrot.lane.b32.xlu1 %v8241_v37, %s7786_s4 }
 0x2f2   :  { %1040 = vrot.lane.b32.xlu0 %v8215_v29, %s7788_s28  ;;  %930 = vrot.lane.b32.xlu1 %v8273_v41, %s7783_s0 }
 0x2f6   :  { %972 = vrot.lane.b32.xlu0 %v8231_v30, %s7784_s25  ;;  %1022 = vrot.lane.b32.xlu1 %v8241_v37, %s7787_s27 }
 0x2fa   :  { %1064 = vrot.lane.b32.xlu0 %v8215_v29, %s7785_s26  ;;  %954 = vrot.lane.b32.xlu1 %v8273_v41, %s7780_s16 }
 0x2fe   :  { %996 = vrot.lane.b32.xlu0 %v8231_v30, %s7786_s4  ;;  %1046 = vrot.lane.b32.xlu1 %v8241_v37, %s7788_s28 }
 0x302   :  { %928 = vrot.lane.b32.xlu0 %v8263_v39, %s7783_s0  ;;  %978 = vrot.lane.b32.xlu1 %v8273_v41, %s7784_s25 }
 0x306   :  { %1020 = vrot.lane.b32.xlu0 %v8231_v30, %s7787_s27  ;;  %1070 = vrot.lane.b32.xlu1 %v8241_v37, %s7785_s26 }
 0x30a   :  { %952 = vrot.lane.b32.xlu0 %v8263_v39, %s7780_s16  ;;  %1002 = vrot.lane.b32.xlu1 %v8273_v41, %s7786_s4 }
 0x30e   :  { %1044 = vrot.lane.b32.xlu0 %v8231_v30, %s7788_s28  ;;  %1026 = vrot.lane.b32.xlu1 %v8273_v41, %s7787_s27 }
 0x312   :  { %976 = vrot.lane.b32.xlu0 %v8263_v39, %s7784_s25  ;;  %1050 = vrot.lane.b32.xlu1 %v8273_v41, %s7788_s28 }
 0x316   :  { %1068 = vrot.lane.b32.xlu0 %v8231_v30, %s7785_s26  ;;  %1074 = vrot.lane.b32.xlu1 %v8273_v41, %s7785_s26 }
 0x31a   :  { %1000 = vrot.lane.b32.xlu0 %v8263_v39, %s7786_s4 }
 0x31e   :  { %932 = vrot.lane.b32.xlu0 %v8317_v45, %s7783_s0 }
 0x322   :  { %1024 = vrot.lane.b32.xlu0 %v8263_v39, %s7787_s27 }
 0x326   :  { %956 = vrot.lane.b32.xlu0 %v8317_v45, %s7780_s16 }
 0x32a   :  { %1048 = vrot.lane.b32.xlu0 %v8263_v39, %s7788_s28 }
 0x32e   :  { %980 = vrot.lane.b32.xlu0 %v8317_v45, %s7784_s25 }
 0x330   :  { %v8335_v49 = vpop.permute.xlu0 %918 }
 0x332   :  { %1072 = vrot.lane.b32.xlu0 %v8263_v39, %s7785_s26 }
 0x334   :  { %v8341_v50 = vpop.permute.xlu0 %942  ;;  %v921_v16 = vpop.permute.xlu1 %920 }
 0x336   :  { %1004 = vrot.lane.b32.xlu0 %v8317_v45, %s7786_s4 }
 0x338   :  { %v8343_v51 = vpop.permute.xlu0 %944  ;;  %v1039_v33 = vpop.permute.xlu1 %1038 }
 0x33c   :  { %v8345_v52 = vpop.permute.xlu0 %966  ;;  %v971_v21 = vpop.permute.xlu1 %970 }
 0x340   :  { %v8351_v56 = vpop.permute.xlu0 %968  ;;  %v1063_v35 = vpop.permute.xlu1 %1062 }
 0x344   :  { %v8356_v59 = vpop.permute.xlu0 %990  ;;  %v995_v42 = vpop.permute.xlu1 %994 }
 0x348   :  { %v8361_v61 = vpop.permute.xlu0 %992  ;;  %v927_v46 = vpop.permute.xlu1 %926 }
 0x34c   :  { %v923_v3 = vpop.permute.xlu0 %922  ;;  %v1019_v53 = vpop.permute.xlu1 %1018 }
 0x34d   :  { %v1088_v0 = vsel %vm80_vm6, %v8225_v18, %v923_v3  ;;  %v1087_v18 = vsel %vm80_vm6, %v8215_v29, %v921_v16 }
 0x34e   :  { %v1095_v3 = vsel %vm82_vm1, %v1087_v18, %v8343_v51 }
 0x350   :  { %v8371_v7 = vpop.permute.xlu0 %924  ;;  %v951_v57 = vpop.permute.xlu1 %950 }
 0x351   :  { %v1089_v51 = vsel %vm80_vm6, %v8231_v30, %v8371_v7  ;;  %v1090_v30 = vsel %vm80_vm6, %v8241_v37, %v927_v46 }
 0x354   :  { %v8373_v8 = vpop.permute.xlu0 %1014  ;;  %v1043_v60 = vpop.permute.xlu1 %1042 }
 0x356   :  { %v711_v62 = vpop.f32.mrb[2].mxu0 }
 0x357   :  { %v712_v40 = vadd.f32 %v711_v62, %v8364_v38  ;;  %v6504_v63 = vpop.f32.mrb[3].mxu0 }
 0x358   :  { %v8379_v10 = vpop.permute.xlu0 %1016  ;;  %v975_v62 = vpop.permute.xlu1 %974 }
 0x359   :  { %v8367_v2 = vmul.f32 0.35355338, %v712_v40 }
 0x35b   :  { %v716_v4 = vsel %vm288_vm0, %v8367_v2, -inf }
 0x35c   :  { %717 = vmax.xlane.f32.xlu0 %v716_v4  ;;  %v947_v13 = vpop.permute.xlu0 %946  ;;  %v1067_v63 = vpop.permute.xlu1 %1066 }
 0x35d   :  { %v1096_v25 = vsel %vm82_vm1, %v1088_v0, %v947_v13 }
 0x360   :  { %v949_v14 = vpop.permute.xlu0 %948  ;;  %v999_v15 = vpop.permute.xlu1 %998 }
 0x364   :  { %v1041_v20 = vpop.permute.xlu0 %1040  ;;  %v8401_v34 = vpop.permute.xlu1 %930 }
 0x368   :  { %v973_v19 = vpop.permute.xlu0 %972  ;;  %v8403_v43 = vpop.permute.xlu1 %1022 }
 0x369   :  { %11125 = vst [vmem:[#allocation21_spill] sm:$0xff] %v8403_v43  ;;  %v1104_v43 = vsel %vm84_vm7, %v1096_v25, %v971_v21 }
 0x36a   :  { %v1112_v25 = vsel %vm86_vm8, %v1104_v43, %v995_v42 }
 0x36c   :  { %v1065_v22 = vpop.permute.xlu0 %1064  ;;  %v8407_v12 = vpop.permute.xlu1 %954 }
 0x36d   :  { %11126 = vst [vmem:[#allocation22_spill] sm:$0xff] %v8407_v12  ;;  %v1086_v12 = vsel %vm80_vm6, %v8211_v28, %v8335_v49 }
 0x370   :  { %v997_v24 = vpop.permute.xlu0 %996  ;;  %v8409_v9 = vpop.permute.xlu1 %1046 }
 0x371   :  { %11127 = vst [vmem:[#allocation23_spill] sm:$0xff] %v8409_v9 }
 0x372   :  { %1028 = vrot.lane.b32.xlu0 %v8317_v45, %s7787_s27 }
 0x374   :  { %v929_v31 = vpop.permute.xlu0 %928  ;;  %v8413_v47 = vpop.permute.xlu1 %978  ;;  %v11133_v18 = vld [vmem:[#allocation22_spill] sm:$0xff] }
 0x375   :  { %11129 = vst [vmem:[#allocation25_spill] sm:$0xff] %v8413_v47 }
 0x376   :  { %1052 = vrot.lane.b32.xlu0 %v8317_v45, %s7788_s28 }
 0x378   :  { %v1021_v48 = vpop.permute.xlu0 %1020  ;;  %v8417_v1 = vpop.permute.xlu1 %1070 }
 0x37a   :  { %1076 = vrot.lane.b32.xlu0 %v8317_v45, %s7785_s26 }
 0x37c   :  { %v953_v54 = vpop.permute.xlu0 %952  ;;  %v8426_v47 = vpop.permute.xlu1 %1002 }
 0x380   :  { %v1045_v58 = vpop.permute.xlu0 %1044 }
 0x384   :  { %v977_v36 = vpop.permute.xlu0 %976 }
 0x388   :  { %v1069_v40 = vpop.permute.xlu0 %1068 }
 0x38c   :  { %v1001_v4 = vpop.permute.xlu0 %1000 }
 0x390   :  { %v933_v23 = vpop.permute.xlu0 %932 }
 0x394   :  { %v1025_v26 = vpop.permute.xlu0 %1024 }
 0x398   :  { %v8405_v44 = vpop.permute.xlu0 %956 }
 0x39c   :  { %v1049_v11 = vpop.permute.xlu0 %1048 }
 0x3a0   :  { %v8411_v38 = vpop.permute.xlu0 %980 }
 0x3a1   :  { %11128 = vst [vmem:[#allocation24_spill] sm:$0xff] %v8411_v38  ;;  %v1094_v38 = vsel %vm82_vm1, %v1086_v12, %v8341_v50  ;;  %v1103_v50 = vsel %vm84_vm7, %v1095_v3, %v8351_v56  ;;  %v1097_v56 = vsel %vm82_vm1, %v1089_v51, %v949_v14  ;;  %v11135_v3 = vmov 0.0   ;;  %v11138_v51 = vld [vmem:[#allocation12_spill] sm:$0xff] }
 0x3a2   :  { %v1102_v0 = vsel %vm84_vm7, %v1094_v38, %v8345_v52  ;;  %v1111_v29 = vsel %vm86_vm8, %v1103_v50, %v8361_v61  ;;  %v1120_v52 = vsel %vm88_vm9, %v1112_v25, %v1019_v53  ;;  %v1105_v61 = vsel %vm84_vm7, %v1097_v56, %v973_v19 }
 0x3a3   :  { %v1110_v28 = vsel %vm86_vm8, %v1102_v0, %v8356_v59  ;;  %v1128_v12 = vsel %vm90_vm10, %v1120_v52, %v1043_v60  ;;  %v1113_v13 = vsel %vm86_vm8, %v1105_v61, %v997_v24  ;;  %v1093_v53 = vsel %vm80_vm6, %v8317_v45, %v933_v23  ;;  %v11134_v0 = vld [vmem:[#allocation23_spill] sm:$0xff] }
 0x3a4   :  { %v1073_v17 = vpop.permute.xlu0 %1072  ;;  %v1121_v14 = vsel %vm88_vm9, %v1113_v13, %v1021_v48  ;;  %v1136_v19 = vsel %vm92_vm11, %v1128_v12, %v1067_v63  ;;  %v11131_v63 = vld [vmem:[#allocation21_spill] sm:$0xff]  ;;  %v11139_v61 = vld [vmem:[#allocation11_spill] sm:$0xff]  ;;  %v11140_v12 = vld [vmem:[#allocation14_spill] sm:$0xff] }
 0x3a5   :  { %v1144_v48 = vmul.f32 %v8112_v32, %v1136_v19 }
 0x3a8   :  { %v1005_v27 = vpop.permute.xlu0 %1004  ;;  %v11132_v23 = vld [vmem:[#allocation24_spill] sm:$0xff] }
 0x3e9   :  { %v718_v9 = vpop.xlane.xlu0 %717 }
 0x3ea   :  { %v719_v41 = vsub.f32 %v8367_v2, %v718_v9  ;;  %v1118_v2 = vsel %vm88_vm9, %v1110_v28, %v8373_v8  ;;  %v1027_v8 = vpop.permute.xlu1 %1026  ;;  %v11136_v28 = vld [vmem:[#allocation25_spill] sm:$0xff] }
 0x3eb   :  { %v1126_v59 = vsel %vm90_vm10, %v1118_v2, %v1039_v33  ;;  %v1129_v33 = vsel %vm90_vm10, %v1121_v14, %v1045_v58  ;;  %v11137_v2 = vmov 0.0|0.0  }
 0x3ec   :  { %v720_v49 = vmul.f32 1.442695, %v719_v41  ;;  %v1119_v41 = vsel %vm88_vm9, %v1111_v29, %v8379_v10  ;;  %v1134_v7 = vsel %vm92_vm11, %v1126_v59, %v1063_v35  ;;  %v1091_v10 = vsel %vm80_vm6, %v8263_v39, %v929_v31 }
 0x3ed   :  { %v1029_v43 = vpop.permute.xlu0 %1028  ;;  %v1127_v38 = vsel %vm90_vm10, %v1119_v41, %v1041_v20  ;;  %v1099_v20 = vsel %vm82_vm1, %v1091_v10, %v953_v54  ;;  %v1137_v35 = vsel %vm92_vm11, %v1129_v33, %v1069_v40  ;;  %v1142_v39 = vmul.f32 %v8078_v5, %v1134_v7  ;;  %v11130_v40 = vld [vmem:[#allocation15_spill] sm:$0xff]  ;;  %v11142_v10 = vld [vmem:[#allocation8_spill] sm:$0xff] }
 0x3ee   :  { %7636 = vpow2.f32 %v720_v49  ;;  %v1135_v9 = vsel %vm92_vm11, %v1127_v38, %v1065_v22  ;;  %v1098_v22 = vsel %vm82_vm1, %v1090_v30, %v951_v57  ;;  %v1107_v37 = vsel %vm84_vm7, %v1099_v20, %v977_v36  ;;  %v1051_v42 = vpop.permute.xlu1 %1050  ;;  %v11141_v30 = vld [vmem:[#allocation13_spill] sm:$0xff] }
 0x3ef   :  { %v1143_v16 = vmul.f32 %v8083_v6, %v1135_v9  ;;  %v1106_v24 = vsel %vm84_vm7, %v1098_v22, %v975_v62  ;;  %v1115_v31 = vsel %vm86_vm8, %v1107_v37, %v1001_v4  ;;  %v1145_v60 = vmul.f32 %v8117_v55, %v1137_v35 }
 0x3f0   :  { %v1114_v46 = vsel %vm86_vm8, %v1106_v24, %v999_v15  ;;  %v1123_v54 = vsel %vm88_vm9, %v1115_v31, %v1025_v26  ;;  %v1101_v36 = vsel %vm82_vm1, %v1093_v53, %v8405_v44  ;;  %v1092_v15 = vsel %vm80_vm6, %v11130_v40, %v8401_v34  ;;  %v11143_v31 = vld [vmem:[#allocation16_spill] sm:$0xff] }
 0x3f1   :  { %v1053_v21 = vpop.permute.xlu0 %1052  ;;  %v7144_v58 = vpack.c.bf16 %v1143_v16, %v1142_v39  ;;  %v1131_v62 = vsel %vm90_vm10, %v1123_v54, %v1049_v11  ;;  %v1122_v4 = vsel %vm88_vm9, %v1114_v46, %v11131_v63  ;;  %v1109_v26 = vsel %vm84_vm7, %v1101_v36, %v11132_v23  ;;  %v11146_v36 = vld [vmem:[#allocation19_spill] sm:$0xff] }
 0x3f2   :  { %v1139_v45 = vsel %vm92_vm11, %v1131_v62, %v1073_v17  ;;  %v1100_v44 = vsel %vm82_vm1, %v1092_v15, %v11133_v18  ;;  %v1130_v11 = vsel %vm90_vm10, %v1122_v4, %v11134_v0  ;;  %v1117_v25 = vsel %vm86_vm8, %v1109_v26, %v1005_v27  ;;  %v1075_v52 = vpop.permute.xlu1 %1074  ;;  %v11147_v62 = vld [vmem:[#allocation20_spill] sm:$0xff]  ;;  %v5923_v18 = vld [vmem:[%s11039_s3 + $0x88] sm:$0xff]  ;;  %v5914_v0 = vld [vmem:[%s11039_s3 + $0x40] sm:$0xff] }
 0x3f3   :  { %v1108_v49 = vsel %vm84_vm7, %v1100_v44, %v11136_v28  ;;  %v1138_v17 = vsel %vm92_vm11, %v1130_v11, %v8417_v1  ;;  %v1125_v50 = vsel %vm88_vm9, %v1117_v25, %v1029_v43  ;;  %v7147_v27 = vpack.c.bf16 %v1145_v60, %v1144_v48  ;;  %v11144_v48 = vld [vmem:[#allocation17_spill] sm:$0xff]  ;;  %v11145_v60 = vld [vmem:[#allocation18_spill] sm:$0xff]  ;;  %v5915_v11 = vld [vmem:[%s11039_s3 + $0x48] sm:$0xff] }
 0x3f4   :  { %v1116_v29 = vsel %vm86_vm8, %v1108_v49, %v8426_v47  ;;  %v1147_v41 = vmul.f32 %v11138_v51, %v1139_v45  ;;  %v1133_v59 = vsel %vm90_vm10, %v1125_v50, %v1053_v21  ;;  %v1146_v9 = vmul.f32 %v11139_v61, %v1138_v17  ;;  %v5922_v45 = vld [vmem:[%s11039_s3 + $0x80] sm:$0xff]  ;;  %v5916_v25 = vld [vmem:[%s11039_s3 + $0x50] sm:$0xff]  ;;  %v5917_v28 = vld [vmem:[%s11039_s3 + $0x58] sm:$0xff] }
 0x3f5   :  { %v1077_v34 = vpop.permute.xlu0 %1076  ;;  %v1124_v56 = vsel %vm88_vm9, %v1116_v29, %v1027_v8  ;;  %v1305_v14 = vmul.f32 %v11142_v10, %v8078_v5  ;;  %v1306_v16 = vmul.f32 %v11142_v10, %v8083_v6  ;;  %v1307_v33 = vmul.f32 %v11142_v10, %v8112_v32  ;;  %v5918_v17 = vld [vmem:[%s11039_s3 + $0x60] sm:$0xff]  ;;  %v5919_v50 = vld [vmem:[%s11039_s3 + $0x68] sm:$0xff] }
 0x3f6   :  { %v1141_v38 = vsel %vm92_vm11, %v1133_v59, %v1077_v34  ;;  %v1132_v1 = vsel %vm90_vm10, %v1124_v56, %v1051_v42  ;;  %v7150_v47 = vpack.c.bf16 %v1147_v41, %v1146_v9  ;;  %v1308_v19 = vmul.f32 %v11142_v10, %v8117_v55  ;;  %v5924_v56 = vld [vmem:[%s11039_s3 + $0x90] sm:$0xff] }
 0x3f7   :  { %v1140_v43 = vsel %vm92_vm11, %v1132_v1, %v1075_v52  ;;  %v1149_v13 = vmul.f32 %v11140_v12, %v1141_v38  ;;  %v7168_v20 = vpack.c.bf16 %v1306_v16, %v1305_v14  ;;  %v1309_v6 = vmul.f32 %v11142_v10, %v11139_v61  ;;  %v5920_v52 = vld [vmem:[%s11039_s3 + $0x70] sm:$0xff]  ;;  %v5925_v38 = vld [vmem:[%s11039_s3 + $0x98] sm:$0xff] }
 0x3f8   :  { %v8478_v57 = vpop.eup %7636  ;;  %v1148_v7 = vmul.f32 %v11141_v30, %v1140_v43  ;;  %v7171_v5 = vpack.c.bf16 %v1308_v19, %v1307_v33  ;;  %v1310_v21 = vmul.f32 %v11142_v10, %v11138_v51  ;;  %v1311_v55 = vmul.f32 %v11142_v10, %v11141_v30  ;;  %v112_v61 = vld [vmem:[%s11042_s6 + $0x10] sm:$0xff]  ;;  %v5927_v30 = vld [vmem:[%s11039_s3 + $0xa8] sm:$0xff]  ;;  %v113_v16 = vld [vmem:[%s11042_s6 + $0x18] sm:$0xff] }
 0x3f9   :  { %6522 = vmatmul.mubr.msk.f32.vlgmr.msra.gmra.mrb[2].mxu1 %vm288_vm0, %v8478_v57  ;;  %v1312_v22 = vmul.f32 %v11142_v10, %v11140_v12  ;;  %v7195_v44 = vpack.c.bf16 %v5923_v18, %v5922_v45  ;;  %v7179_v34 = vpack.c.bf16 %v5915_v11, %v5914_v0  ;;  %v7183_v49 = vpack.c.bf16 %v5917_v28, %v5916_v25  ;;  %v8623_v19 = vld [vmem:[%s11037_s1] sm:$0xff] }
 0x3fa   :  { %7145 = vmatpush3.bf16.msra.mxu1 %v7144_v58  ;;  %6559 = vmatprep.mubr.msk.f32.mxu1 %vm7790_vm5, %v11135_v3  ;;  %v7153_v8 = vpack.c.bf16 %v1149_v13, %v1148_v7  ;;  %v7174_v32 = vpack.c.bf16 %v1310_v21, %v1309_v6  ;;  %v7187_v29 = vpack.c.bf16 %v5919_v50, %v5918_v17  ;;  %v5926_v13 = vld [vmem:[%s11039_s3 + $0xa0] sm:$0xff] }
 0x3fb   :  { %7146 = vmatprep.subr.bf16.mxu1 %v11137_v2  ;;  %v7177_v37 = vpack.c.bf16 %v1312_v22, %v1311_v55  ;;  %v7199_v43 = vpack.c.bf16 %v5925_v38, %v5924_v56  ;;  %v7203_v7 = vpack.c.bf16 %v5927_v30, %v5926_v13 }
 0x3fe   :  { %7148 = vmatpush3.bf16.msra.mxu1 %v7147_v27  ;;  %v5921_v27 = vld [vmem:[%s11039_s3 + $0x78] sm:$0xff] }
 0x3ff   :  { %7149 = vmatprep.subr.bf16.mxu1 %v11137_v2  ;;  %v7191_v51 = vpack.c.bf16 %v5921_v27, %v5920_v52 }
 0x402   :  { %7151 = vmatpush3.bf16.msra.mxu1 %v7150_v47  ;;  %v11148_v47 = vld [vmem:[#allocation10_spill] sm:$0xff] }
 0x403   :  { %7152 = vmatprep.subr.bf16.mxu1 %v11137_v2  ;;  %v187_v12 = vadd.f32 %v11148_v47, %v112_v61 }
 0x406   :  { %7154 = vmatpush3.bf16.msra.mxu1 %v7153_v8  ;;  %v5928_v8 = vld [vmem:[%s11039_s3 + $0xb0] sm:$0xff] }
 0x407   :  { %7167 = vmatprep.subr.bf16.mxu1 %v11137_v2 }
 0x409   :  { %6560 = vmatmul.mubr.msk.f32.vlgmr.msra.gmra.mrb[4].mxu1 %vm288_vm0, %v11142_v10  ;;  %v5929_v10 = vld [vmem:[%s11039_s3 + $0xb8] sm:$0xff] }
 0x40a   :  { %7169 = vmatpush3.bf16.msra.mxu1 %v7168_v20  ;;  %6597 = vmatprep.mubr.msk.f32.mxu1 %vm7790_vm5, %v11135_v3  ;;  %v7207_v14 = vpack.c.bf16 %v5929_v10, %v5928_v8  ;;  %v11149_v20 = vld [vmem:[#allocation9_spill] sm:$0xff] }
 0x40b   :  { %7170 = vmatprep.subr.bf16.mxu1 %v11137_v2  ;;  %v192_v33 = vadd.f32 %v11149_v20, %v113_v16  ;;  %v8808_v20 = vld [vmem:[%s11039_s3 + $0x200] sm:$0xff] }
 0x40e   :  { %7172 = vmatpush3.bf16.msra.mxu1 %v7171_v5  ;;  %v8632_v5 = vld [vmem:[%s11037_s1 + $0x8] sm:$0xff] }
 0x40f   :  { %7173 = vmatprep.subr.bf16.mxu1 %v11137_v2 }
 0x412   :  { %7175 = vmatpush3.bf16.msra.mxu1 %v7174_v32 }
 0x413   :  { %7176 = vmatprep.subr.bf16.mxu1 %v11137_v2 }
 0x416   :  { %7178 = vmatpush3.bf16.msra.mxu1 %v7177_v37 }
 0x417   :  { %7196 = vmatprep.subr.bf16.mxu1 %v7195_v44 }
 0x4cc   :  { %v791_v35 = vpop.f32.mrb[2].mxu1 }
 0x4cd   :  { %7638 = vrcp.f32 %v791_v35  ;;  %v6523_v24 = vpop.f32.mrb[3].mxu1 }
 0x4d7   :  { %v7639_v39 = vpop.eup %7638 }
 0x4d8   :  { %v796_v42 = vmul.f32 %v7639_v39, %v8478_v57 }
 0x4da   :  { %6541 = vmatmul.mubr.msk.f32.vlgmr.msra.gmra.mrb[4].mxu0 %vm288_vm0, %v796_v42 }
 0x4db   :  { %7157 = vmatpush3.bf16.msra.mxu0 %v11143_v31  ;;  %6578 = vmatprep.mubr.msk.f32.mxu0 %vm7790_vm5, %v11135_v3 }
 0x4dc   :  { %v1219_v46 = vpop.f32.mrb[4].mxu1  ;;  %7158 = vmatprep.subr.bf16.mxu0 %v11137_v2 }
 0x4dd   :  { %v1220_v53 = vadd.f32 %v1219_v46, %v11144_v48  ;;  %v6561_v54 = vpop.f32.mrb[5].mxu1 }
 0x4df   :  { %v1223_v58 = vmul.f32 0.35355338, %v1220_v53  ;;  %7160 = vmatpush3.bf16.msra.mxu0 %v11145_v60 }
 0x4e0   :  { %7161 = vmatprep.subr.bf16.mxu0 %v11137_v2 }
 0x4e1   :  { %v1224_v57 = vsel %vm288_vm0, %v1223_v58, -inf }
 0x4e2   :  { %1225 = vmax.xlane.f32.xlu1 %v1224_v57  ;;  %v5946_v57 = vld [vmem:[%s11042_s6 + $0x20] ss:$0 sm:$0xff] }
 0x4e3   :  { %7163 = vmatpush3.bf16.msra.mxu0 %v11146_v36 }
 0x4e4   :  { %7164 = vmatprep.subr.bf16.mxu0 %v11137_v2 }
 0x4e7   :  { %7166 = vmatpush3.bf16.msra.mxu0 %v11147_v62 }
 0x4e8   :  { %7180 = vmatprep.subr.bf16.mxu0 %v7179_v34 }
 0x56f   :  { %v1226_v40 = vpop.xlane.xlu1 %1225 }
 0x570   :  { %v1227_v15 = vsub.f32 %v1223_v58, %v1226_v40 }
 0x572   :  { %v1228_v63 = vmul.f32 1.442695, %v1227_v15 }
 0x574   :  { %7640 = vpow2.f32 %v1228_v63 }
 0x57e   :  { %v7641_v4 = vpop.eup %7640 }
 0x57f   :  { %6579 = vmatmul.mubr.msk.f32.vlgmr.msra.gmra.mrb[6].mxu0 %vm288_vm0, %v7641_v4 }
 0x580   :  { %7182 = vmatpush3.bf16.msra.mxu0 %v7179_v34 }
 0x581   :  { %7184 = vmatprep.subr.bf16.mxu0 %v7183_v49 }
 0x584   :  { %7186 = vmatpush3.bf16.msra.mxu0 %v7183_v49 }
 0x585   :  { %7188 = vmatprep.subr.bf16.mxu0 %v7187_v29 }
 0x588   :  { %7190 = vmatpush3.bf16.msra.mxu0 %v7187_v29 }
 0x589   :  { %7192 = vmatprep.subr.bf16.mxu0 %v7191_v51 }
 0x58c   :  { %7194 = vmatpush3.bf16.msra.mxu0 %v7191_v51 }
 0x58d   :  { %7211 = vmatprep.subr.bf16.mxu0 %v11137_v2 }
 0x5ad   :  { %v874_v23 = vpop.f32.mrb[4].mxu0 }
 0x5ae   :  { %v6542_v26 = vpop.f32.mrb[5].mxu0  ;;  %6616 = vmatprep.mubr.msk.f32.mxu0 %vm288_vm0, %v874_v23 }
 0x652   :  { %v1299_v41 = vpop.f32.mrb[6].mxu0 }
 0x653   :  { %7642 = vrcp.f32 %v1299_v41  ;;  %v6580_v59 = vpop.f32.mrb[7].mxu0 }
 0x65d   :  { %v7643_v9 = vpop.eup %7642 }
 0x65e   :  { %v1304_v1 = vmul.f32 %v7643_v9, %v7641_v4 }
 0x660   :  { %6598 = vmatmul.mubr.msk.f32.vlgmr.msra.gmra.mrb[6].mxu1 %vm288_vm0, %v1304_v1 }
 0x661   :  { %7198 = vmatpush3.bf16.msra.mxu1 %v7195_v44  ;;  %6635 = vmatprep.mubr.msk.f32.mxu1 %vm288_vm0, %v187_v12 }
 0x662   :  { %7200 = vmatprep.subr.bf16.mxu1 %v7199_v43 }
 0x665   :  { %7202 = vmatpush3.bf16.msra.mxu1 %v7199_v43 }
 0x666   :  { %7204 = vmatprep.subr.bf16.mxu1 %v7203_v7 }
 0x669   :  { %7206 = vmatpush3.bf16.msra.mxu1 %v7203_v7 }
 0x66a   :  { %7208 = vmatprep.subr.bf16.mxu1 %v7207_v14 }
 0x66d   :  { %7210 = vmatpush3.bf16.msra.mxu1 %v7207_v14 }
 0x66e   :  { %7223 = vmatprep.subr.bf16.mxu1 %v11137_v2 }
 0x670   :  { %6636 = vmatmul.mubr.msk.f32.vlgmr.msra.gmra.mrb[8].mxu1 %vm288_vm0, %v192_v33 }
 0x671   :  { %6638 = vmatprep.mubr.msk.f32.mxu1 %vm288_vm0, %v8623_v19  ;;  %7225 = vmatpush3.bf16.msra.mxu1 %v11143_v31 }
 0x672   :  { %7226 = vmatprep.subr.bf16.mxu1 %v11137_v2 }
 0x674   :  { %6639 = vmatmul.mubr.msk.f32.gmra.mrb[10].mxu1 %vm288_vm0, %v8632_v5 }
 0x675   :  { %7228 = vmatpush3.bf16.msra.mxu1 %v11145_v60 }
 0x676   :  { %7229 = vmatprep.subr.bf16.mxu1 %v11137_v2 }
 0x679   :  { %7231 = vmatpush3.bf16.msra.mxu1 %v11146_v36 }
 0x67a   :  { %7232 = vmatprep.subr.bf16.mxu1 %v11137_v2 }
 0x67d   :  { %7234 = vmatpush3.bf16.msra.mxu1 %v11147_v62 }
 0x67e   :  { %7247 = vmatprep.subr.bf16.mxu1 %v11137_v2 }
 0x733   :  { %v1382_v6 = vpop.f32.mrb[6].mxu1 }
 0x734   :  { %v6599_v21 = vpop.f32.mrb[7].mxu1  ;;  %6617 = vmatmul.mubr.msk.f32.vlgmr.msra.gmra.mrb[8].mxu0 %vm288_vm0, %v1382_v6  ;;  %v8814_v6 = vld [vmem:[%s11039_s3 + $0x208] sm:$0xff] }
 0x735   :  { %6660 = vmatprep.mubr.msk.f32.mxu0 %vm7790_vm5, %v11135_v3 }
 0x743   :  { %v8645_v32 = vpop.f32.mrb[8].mxu1 }
 0x744   :  { %11150 = vst [vmem:[#allocation15_spill] sm:$0xff] %v8645_v32  ;;  %v8647_v55 = vpop.f32.mrb[9].mxu1 }
 0x747   :  { %v8649_v22 = vpop.f32.mrb[10].mxu1 }
 0x748   :  { %v1600_v37 = vpop.f32.mrb[11].mxu1 }
 0x749   :  { %1619 = vxpose.xlu0.b32.start.end [1/1] (short) (narrow) %v1600_v37, 64 }
 0x7c9   :  { %v8651_v35 = vpop.trf.xlu0 }
 0x7ca   :  { %1683 = vrot.lane.b32.xlu1 %v8651_v35, %s7780_s16  ;;  %1659 = vrot.lane.b32.xlu0 %v8651_v35, %s7783_s0 }
 0x7cd   :  { %v8657_v24 = vpop.trf.xlu0 }
 0x7ce   :  { %1707 = vrot.lane.b32.xlu1 %v8651_v35, %s7784_s25  ;;  %1781 = vrot.lane.b32.xlu0 %v8657_v24, %s7788_s28 }
 0x7d1   :  { %v8663_v39 = vpop.trf.xlu0 }
 0x7d2   :  { %1731 = vrot.lane.b32.xlu1 %v8651_v35, %s7786_s4  ;;  %1805 = vrot.lane.b32.xlu0 %v8657_v24, %s7785_s26 }
 0x7d5   :  { %v8669_v42 = vpop.trf.xlu0 }
 0x7d6   :  { %1755 = vrot.lane.b32.xlu1 %v8651_v35, %s7787_s27  ;;  %1713 = vrot.lane.b32.xlu0 %v8669_v42, %s7784_s25 }
 0x7d9   :  { %v8683_v46 = vpop.trf.xlu0 }
 0x7da   :  { %1779 = vrot.lane.b32.xlu1 %v8651_v35, %s7788_s28  ;;  %1737 = vrot.lane.b32.xlu0 %v8669_v42, %s7786_s4 }
 0x7dd   :  { %v8693_v53 = vpop.trf.xlu0 }
 0x7de   :  { %1803 = vrot.lane.b32.xlu1 %v8651_v35, %s7785_s26  ;;  %1761 = vrot.lane.b32.xlu0 %v8669_v42, %s7787_s27 }
 0x7e1   :  { %v8715_v54 = vpop.trf.xlu0 }
 0x7e2   :  { %1661 = vrot.lane.b32.xlu1 %v8657_v24, %s7783_s0  ;;  %1785 = vrot.lane.b32.xlu0 %v8669_v42, %s7788_s28 }
 0x7e5   :  { %v8725_v58 = vpop.trf.xlu0 }
 0x7e6   :  { %1685 = vrot.lane.b32.xlu1 %v8657_v24, %s7780_s16  ;;  %1809 = vrot.lane.b32.xlu0 %v8669_v42, %s7785_s26 }
 0x7ea   :  { %1709 = vrot.lane.b32.xlu1 %v8657_v24, %s7784_s25  ;;  %1669 = vrot.lane.b32.xlu0 %v8693_v53, %s7783_s0 }
 0x7ee   :  { %1733 = vrot.lane.b32.xlu1 %v8657_v24, %s7786_s4  ;;  %1693 = vrot.lane.b32.xlu0 %v8693_v53, %s7780_s16 }
 0x7f2   :  { %1757 = vrot.lane.b32.xlu1 %v8657_v24, %s7787_s27  ;;  %1717 = vrot.lane.b32.xlu0 %v8693_v53, %s7784_s25 }
 0x7f6   :  { %1663 = vrot.lane.b32.xlu1 %v8663_v39, %s7783_s0  ;;  %1741 = vrot.lane.b32.xlu0 %v8693_v53, %s7786_s4 }
 0x7fa   :  { %1687 = vrot.lane.b32.xlu1 %v8663_v39, %s7780_s16  ;;  %1765 = vrot.lane.b32.xlu0 %v8693_v53, %s7787_s27 }
 0x7fe   :  { %1711 = vrot.lane.b32.xlu1 %v8663_v39, %s7784_s25  ;;  %1789 = vrot.lane.b32.xlu0 %v8693_v53, %s7788_s28 }
 0x802   :  { %1735 = vrot.lane.b32.xlu1 %v8663_v39, %s7786_s4  ;;  %1813 = vrot.lane.b32.xlu0 %v8693_v53, %s7785_s26 }
 0x806   :  { %1759 = vrot.lane.b32.xlu1 %v8663_v39, %s7787_s27  ;;  %1673 = vrot.lane.b32.xlu0 %v8725_v58, %s7783_s0 }
 0x807   :  { %v6618_v40 = vpop.f32.mrb[8].mxu0 }
 0x808   :  { %v1462_v15 = vpop.f32.mrb[9].mxu0  ;;  %v1468_v4 = vadd.f32 %v6618_v40, %v5946_v57 }
 0x809   :  { %v8734_v63 = vadd.f32 %v5946_v57, %v1462_v15 }
 0x80a   :  { %1783 = vrot.lane.b32.xlu1 %v8663_v39, %s7788_s28  ;;  %1697 = vrot.lane.b32.xlu0 %v8725_v58, %s7780_s16  ;;  %v8773_v23 = vadd.f32 %v8632_v5, %v1468_v4 }
 0x80c   :  { %v1476_v45 = vsel %vm288_vm0, %v8773_v23, 0.0 }
 0x80e   :  { %1807 = vrot.lane.b32.xlu1 %v8663_v39, %s7785_s26  ;;  %1721 = vrot.lane.b32.xlu0 %v8725_v58, %s7784_s25 }
 0x812   :  { %1665 = vrot.lane.b32.xlu1 %v8669_v42, %s7783_s0  ;;  %1745 = vrot.lane.b32.xlu0 %v8725_v58, %s7786_s4 }
 0x816   :  { %1689 = vrot.lane.b32.xlu1 %v8669_v42, %s7780_s16  ;;  %1769 = vrot.lane.b32.xlu0 %v8725_v58, %s7787_s27 }
 0x81a   :  { %1667 = vrot.lane.b32.xlu1 %v8683_v46, %s7783_s0  ;;  %1793 = vrot.lane.b32.xlu0 %v8725_v58, %s7788_s28 }
 0x81e   :  { %1691 = vrot.lane.b32.xlu1 %v8683_v46, %s7780_s16  ;;  %1817 = vrot.lane.b32.xlu0 %v8725_v58, %s7785_s26 }
 0x822   :  { %1715 = vrot.lane.b32.xlu1 %v8683_v46, %s7784_s25 }
 0x826   :  { %1739 = vrot.lane.b32.xlu1 %v8683_v46, %s7786_s4 }
 0x82a   :  { %1763 = vrot.lane.b32.xlu1 %v8683_v46, %s7787_s27 }
 0x82e   :  { %1787 = vrot.lane.b32.xlu1 %v8683_v46, %s7788_s28 }
 0x832   :  { %1811 = vrot.lane.b32.xlu1 %v8683_v46, %s7785_s26 }
 0x836   :  { %1671 = vrot.lane.b32.xlu1 %v8715_v54, %s7783_s0 }
 0x83a   :  { %1695 = vrot.lane.b32.xlu1 %v8715_v54, %s7780_s16 }
 0x83c   :  { %v1684_v26 = vpop.permute.xlu1 %1683  ;;  %v1660_v18 = vpop.permute.xlu0 %1659 }
 0x83d   :  { %1477 = vadd.xlane.f32.xlu0 %v1476_v45  ;;  %v1827_v41 = vsel %vm80_vm6, %v8651_v35, %v1660_v18 }
 0x83e   :  { %1719 = vrot.lane.b32.xlu1 %v8715_v54, %s7784_s25  ;;  %v1835_v59 = vsel %vm82_vm1, %v1827_v41, %v1684_v26 }
 0x840   :  { %v1708_v44 = vpop.permute.xlu1 %1707  ;;  %v1782_v0 = vpop.permute.xlu0 %1781 }
 0x841   :  { %v1843_v38 = vsel %vm84_vm7, %v1835_v59, %v1708_v44 }
 0x842   :  { %1743 = vrot.lane.b32.xlu1 %v8715_v54, %s7786_s4 }
 0x844   :  { %v1732_v11 = vpop.permute.xlu1 %1731  ;;  %v1806_v34 = vpop.permute.xlu0 %1805 }
 0x845   :  { %v1851_v9 = vsel %vm86_vm8, %v1843_v38, %v1732_v11 }
 0x846   :  { %1767 = vrot.lane.b32.xlu1 %v8715_v54, %s7787_s27 }
 0x848   :  { %v1756_v25 = vpop.permute.xlu1 %1755  ;;  %v1714_v49 = vpop.permute.xlu0 %1713 }
 0x849   :  { %v1859_v47 = vsel %vm88_vm9, %v1851_v9, %v1756_v25 }
 0x84a   :  { %1791 = vrot.lane.b32.xlu1 %v8715_v54, %s7788_s28 }
 0x84c   :  { %v1780_v28 = vpop.permute.xlu1 %1779  ;;  %v1738_v29 = vpop.permute.xlu0 %1737 }
 0x84d   :  { %v1867_v13 = vsel %vm90_vm10, %v1859_v47, %v1780_v28 }
 0x84e   :  { %1815 = vrot.lane.b32.xlu1 %v8715_v54, %s7785_s26 }
 0x850   :  { %v1804_v17 = vpop.permute.xlu1 %1803  ;;  %v1762_v27 = vpop.permute.xlu0 %1761 }
 0x851   :  { %v1875_v8 = vsel %vm92_vm11, %v1867_v13, %v1804_v17 }
 0x852   :  { %v1883_v33 = vmul.f32 %v8808_v20, %v1875_v8 }
 0x854   :  { %v1662_v50 = vpop.permute.xlu1 %1661  ;;  %v1786_v1 = vpop.permute.xlu0 %1785 }
 0x855   :  { %v1828_v61 = vsel %vm80_vm6, %v8657_v24, %v1662_v50 }
 0x858   :  { %v1686_v52 = vpop.permute.xlu1 %1685  ;;  %v1810_v5 = vpop.permute.xlu0 %1809 }
 0x859   :  { %v1836_v43 = vsel %vm82_vm1, %v1828_v61, %v1686_v52 }
 0x85c   :  { %v1710_v51 = vpop.permute.xlu1 %1709  ;;  %v1670_v57 = vpop.permute.xlu0 %1669 }
 0x85d   :  { %v1844_v12 = vsel %vm84_vm7, %v1836_v43, %v1710_v51 }
 0x860   :  { %v1734_v56 = vpop.permute.xlu1 %1733  ;;  %v1694_v15 = vpop.permute.xlu0 %1693 }
 0x861   :  { %v1852_v30 = vsel %vm86_vm8, %v1844_v12, %v1734_v56  ;;  %v8838_v12 = vld [vmem:[%s11039_s3 + $0x210] sm:$0xff] }
 0x864   :  { %v1758_v7 = vpop.permute.xlu1 %1757  ;;  %v1718_v45 = vpop.permute.xlu0 %1717 }
 0x865   :  { %v1860_v10 = vsel %vm88_vm9, %v1852_v30, %v1758_v7 }
 0x866   :  { %v1868_v14 = vsel %vm90_vm10, %v1860_v10, %v1782_v0 }
 0x867   :  { %v1876_v16 = vsel %vm92_vm11, %v1868_v14, %v1806_v34 }
 0x868   :  { %v1884_v21 = vmul.f32 %v8814_v6, %v1876_v16  ;;  %v1664_v37 = vpop.permute.xlu1 %1663  ;;  %v1742_v44 = vpop.permute.xlu0 %1741  ;;  %v1832_v16 = vsel %vm80_vm6, %v8693_v53, %v1670_v57 }
 0x869   :  { %v1829_v25 = vsel %vm80_vm6, %v8663_v39, %v1664_v37 }
 0x86a   :  { %2127 = vxpose.xlu0.b32.start.end [1/1] (short) (narrow) %v8649_v22, 64  ;;  %v7212_v35 = vpack.c.bf16 %v1884_v21, %v1883_v33  ;;  %v1840_v33 = vsel %vm82_vm1, %v1832_v16, %v1694_v15  ;;  %v8896_v16 = vld [vmem:[%s11039_s3 + $0x238] sm:$0xff] }
 0x86b   :  { %v1848_v21 = vsel %vm84_vm7, %v1840_v33, %v1718_v45  ;;  %11154 = vst [vmem:[#allocation23_spill] sm:$0xff] %v8896_v16 }
 0x86c   :  { %v1688_v24 = vpop.permute.xlu1 %1687  ;;  %7213 = vmatpush3.bf16.msra.mxu0 %v7212_v35  ;;  %v1766_v34 = vpop.permute.xlu0 %1765  ;;  %v1856_v35 = vsel %vm86_vm8, %v1848_v21, %v1742_v44 }
 0x86d   :  { %7214 = vmatprep.subr.bf16.mxu0 %v11137_v2  ;;  %v1837_v22 = vsel %vm82_vm1, %v1829_v25, %v1688_v24 }
 0x870   :  { %v1712_v40 = vpop.permute.xlu1 %1711  ;;  %v1790_v38 = vpop.permute.xlu0 %1789 }
 0x871   :  { %v1845_v28 = vsel %vm84_vm7, %v1837_v22, %v1712_v40 }
 0x874   :  { %v1736_v4 = vpop.permute.xlu1 %1735  ;;  %v1814_v7 = vpop.permute.xlu0 %1813 }
 0x875   :  { %v1853_v52 = vsel %vm86_vm8, %v1845_v28, %v1736_v4  ;;  %v1864_v4 = vsel %vm88_vm9, %v1856_v35, %v1766_v34  ;;  %v8873_v34 = vld [vmem:[%s11039_s3 + $0x220] sm:$0xff] }
 0x876   :  { %11153 = vst [vmem:[#allocation22_spill] sm:$0xff] %v8873_v34 }
 0x878   :  { %v1760_v26 = vpop.permute.xlu1 %1759  ;;  %v1674_v8 = vpop.permute.xlu0 %1673 }
 0x879   :  { %v1861_v41 = vsel %vm88_vm9, %v1853_v52, %v1760_v26 }
 0x87c   :  { %v1784_v18 = vpop.permute.xlu1 %1783 }
 0x87d   :  { %v1869_v56 = vsel %vm90_vm10, %v1861_v41, %v1784_v18  ;;  %v1872_v18 = vsel %vm90_vm10, %v1864_v4, %v1790_v38  ;;  %v1834_v38 = vsel %vm80_vm6, %v8725_v58, %v1674_v8 }
 0x87e   :  { %v1880_v57 = vsel %vm92_vm11, %v1872_v18, %v1814_v7 }
 0x880   :  { %v1808_v0 = vpop.permute.xlu1 %1807 }
 0x881   :  { %v1877_v61 = vsel %vm92_vm11, %v1869_v56, %v1808_v0 }
 0x884   :  { %v1666_v11 = vpop.permute.xlu1 %1665 }
 0x885   :  { %v1830_v17 = vsel %vm80_vm6, %v8669_v42, %v1666_v11  ;;  %v8867_v11 = vld [vmem:[%s11039_s3 + $0x228] sm:$0xff] }
 0x886   :  { %11152 = vst [vmem:[#allocation24_spill] sm:$0xff] %v8867_v11  ;;  %v1888_v25 = vmul.f32 %v8867_v11, %v1880_v57 }
 0x888   :  { %v1690_v50 = vpop.permute.xlu1 %1689 }
 0x889   :  { %v1838_v51 = vsel %vm82_vm1, %v1830_v17, %v1690_v50 }
 0x88a   :  { %v1846_v59 = vsel %vm84_vm7, %v1838_v51, %v1714_v49  ;;  %v1885_v49 = vmul.f32 %v8838_v12, %v1877_v61 }
 0x88b   :  { %v1854_v39 = vsel %vm86_vm8, %v1846_v59, %v1738_v29  ;;  %v8844_v29 = vld [vmem:[%s11039_s3 + $0x218] sm:$0xff] }
 0x88c   :  { %v1862_v9 = vsel %vm88_vm9, %v1854_v39, %v1762_v27  ;;  %v1668_v43 = vpop.permute.xlu1 %1667  ;;  %11151 = vst [vmem:[#allocation21_spill] sm:$0xff] %v8844_v29 }
 0x88d   :  { %v1870_v42 = vsel %vm90_vm10, %v1862_v9, %v1786_v1  ;;  %v1831_v37 = vsel %vm80_vm6, %v8683_v46, %v1668_v43 }
 0x88e   :  { %v1878_v47 = vsel %vm92_vm11, %v1870_v42, %v1810_v5  ;;  %v1698_v5 = vpop.permute.xlu0 %1697 }
 0x88f   :  { %v1886_v13 = vmul.f32 %v8844_v29, %v1878_v47  ;;  %v1842_v61 = vsel %vm82_vm1, %v1834_v38, %v1698_v5  ;;  %v8902_v5 = vld [vmem:[%s11039_s3 + $0x230] sm:$0xff] }
 0x890   :  { %v1692_v27 = vpop.permute.xlu1 %1691  ;;  %11155 = vst [vmem:[#allocation25_spill] sm:$0xff] %v8902_v5 }
 0x891   :  { %v7215_v30 = vpack.c.bf16 %v1886_v13, %v1885_v49  ;;  %v1839_v24 = vsel %vm82_vm1, %v1831_v37, %v1692_v27 }
 0x892   :  { %v1722_v45 = vpop.permute.xlu0 %1721 }
 0x893   :  { %7216 = vmatpush3.bf16.msra.mxu0 %v7215_v30  ;;  %v1850_v9 = vsel %vm84_vm7, %v1842_v61, %v1722_v45 }
 0x894   :  { %v1716_v1 = vpop.permute.xlu1 %1715  ;;  %7217 = vmatprep.subr.bf16.mxu0 %v11137_v2 }
 0x895   :  { %v1847_v26 = vsel %vm84_vm7, %v1839_v24, %v1716_v1 }
 0x896   :  { %v1746_v50 = vpop.permute.xlu0 %1745 }
 0x897   :  { %v1858_v42 = vsel %vm86_vm8, %v1850_v9, %v1746_v50 }
 0x898   :  { %v1740_v10 = vpop.permute.xlu1 %1739 }
 0x899   :  { %v1855_v53 = vsel %vm86_vm8, %v1847_v26, %v1740_v10 }
 0x89a   :  { %v1770_v51 = vpop.permute.xlu0 %1769 }
 0x89b   :  { %v1866_v27 = vsel %vm88_vm9, %v1858_v42, %v1770_v51  ;;  %v1471_v51 = vadd.f32 %v8623_v19, %v8734_v63 }
 0x89c   :  { %v1764_v14 = vpop.permute.xlu1 %1763 }
 0x89d   :  { %v1863_v15 = vsel %vm88_vm9, %v1855_v53, %v1764_v14 }
 0x89e   :  { %v1794_v56 = vpop.permute.xlu0 %1793 }
 0x89f   :  { %v1874_v7 = vsel %vm90_vm10, %v1866_v27, %v1794_v56 }
 0x8a0   :  { %v1788_v40 = vpop.permute.xlu1 %1787 }
 0x8a1   :  { %v1871_v46 = vsel %vm90_vm10, %v1863_v15, %v1788_v40 }
 0x8a2   :  { %v1818_v47 = vpop.permute.xlu0 %1817 }
 0x8a3   :  { %v1882_v1 = vsel %vm92_vm11, %v1874_v7, %v1818_v47 }
 0x8a4   :  { %v1812_v0 = vpop.permute.xlu1 %1811  ;;  %v1890_v33 = vmul.f32 %v8896_v16, %v1882_v1 }
 0x8a5   :  { %v1879_v44 = vsel %vm92_vm11, %v1871_v46, %v1812_v0 }
 0x8a6   :  { %v1887_v22 = vmul.f32 %v8873_v34, %v1879_v44 }
 0x8a8   :  { %v7218_v28 = vpack.c.bf16 %v1888_v25, %v1887_v22  ;;  %v1672_v17 = vpop.permute.xlu1 %1671 }
 0x8a9   :  { %v1833_v43 = vsel %vm80_vm6, %v8715_v54, %v1672_v17 }
 0x8aa   :  { %7219 = vmatpush3.bf16.msra.mxu0 %v7218_v28 }
 0x8ab   :  { %7220 = vmatprep.subr.bf16.mxu0 %v11137_v2 }
 0x8ac   :  { %v1696_v52 = vpop.permute.xlu1 %1695 }
 0x8ad   :  { %v1841_v49 = vsel %vm82_vm1, %v1833_v43, %v1696_v52 }
 0x8b0   :  { %v1720_v41 = vpop.permute.xlu1 %1719 }
 0x8b1   :  { %v1849_v30 = vsel %vm84_vm7, %v1841_v49, %v1720_v41 }
 0x8b4   :  { %v1744_v59 = vpop.permute.xlu1 %1743 }
 0x8b5   :  { %v1857_v58 = vsel %vm86_vm8, %v1849_v30, %v1744_v59  ;;  %v1473_v59 = vsel %vm288_vm0, %v1471_v51, 0.0 }
 0x8b8   :  { %v1768_v39 = vpop.permute.xlu1 %1767 }
 0x8b9   :  { %v1865_v8 = vsel %vm88_vm9, %v1857_v58, %v1768_v39 }
 0x8bc   :  { %v1792_v13 = vpop.permute.xlu1 %1791 }
 0x8bd   :  { %v1873_v54 = vsel %vm90_vm10, %v1865_v8, %v1792_v13 }
 0x8c0   :  { %v1816_v10 = vpop.permute.xlu1 %1815 }
 0x8c1   :  { %v1881_v14 = vsel %vm92_vm11, %v1873_v54, %v1816_v10 }
 0x8c2   :  { %v1889_v21 = vmul.f32 %v8902_v5, %v1881_v14 }
 0x8c4   :  { %v7221_v37 = vpack.c.bf16 %v1890_v33, %v1889_v21 }
 0x8c6   :  { %7222 = vmatpush3.bf16.msra.mxu0 %v7221_v37 }
 0x8c7   :  { %7235 = vmatprep.subr.bf16.mxu0 %v11137_v2 }
 0x8c9   :  { %6661 = vmatmul.mubr.msk.f32.vlgmr.msra.gmra.mrb[10].mxu0 %vm288_vm0, %v8647_v55 }
 0x8ca   :  { %6698 = vmatprep.mubr.msk.f32.mxu0 %vm7790_vm5, %v11135_v3  ;;  %v8910_v35 = vpop.xlane.xlu0 %1477 }
 0x8cb   :  { %v1481_v63 = vmul.f32 0.015625, %v8910_v35 }
 0x8cd   :  { %v1483_v49 = vsub.f32 %v8773_v23, %v1481_v63 }
 0x8cf   :  { %v1485_v27 = vmul.f32 %v1483_v49, %v1483_v49 }
 0x8d1   :  { %v1489_v30 = vsel %vm288_vm0, %v1485_v27, 0.0 }
 0x8ea   :  { %v8912_v24 = vpop.trf.xlu0 }
 0x8eb   :  { %2215 = vrot.lane.b32.xlu0 %v8912_v24, %s7784_s25  ;;  %2167 = vrot.lane.b32.xlu1 %v8912_v24, %s7783_s0 }
 0x8ee   :  { %v8918_v40 = vpop.trf.xlu0 }
 0x8ef   :  { %2169 = vrot.lane.b32.xlu1 %v8918_v40, %s7783_s0 }
 0x8f2   :  { %v8922_v4 = vpop.trf.xlu0 }
 0x8f3   :  { %2191 = vrot.lane.b32.xlu1 %v8912_v24, %s7780_s16 }
 0x8f6   :  { %v8926_v55 = vpop.trf.xlu0 }
 0x8f7   :  { %2193 = vrot.lane.b32.xlu1 %v8918_v40, %s7780_s16 }
 0x8fa   :  { %v8930_v26 = vpop.trf.xlu0 }
 0x8fb   :  { %2217 = vrot.lane.b32.xlu1 %v8918_v40, %s7784_s25 }
 0x8fe   :  { %v8934_v18 = vpop.trf.xlu0 }
 0x8ff   :  { %2239 = vrot.lane.b32.xlu1 %v8912_v24, %s7786_s4  ;;  %2177 = vrot.lane.b32.xlu0 %v8934_v18, %s7783_s0 }
 0x902   :  { %v8956_v53 = vpop.trf.xlu0 }
 0x903   :  { %2241 = vrot.lane.b32.xlu1 %v8918_v40, %s7786_s4  ;;  %2269 = vrot.lane.b32.xlu0 %v8926_v55, %s7787_s27 }
 0x906   :  { %v8966_v57 = vpop.trf.xlu0 }
 0x907   :  { %2171 = vrot.lane.b32.xlu1 %v8922_v4, %s7783_s0  ;;  %2201 = vrot.lane.b32.xlu0 %v8934_v18, %s7780_s16 }
 0x90b   :  { %2173 = vrot.lane.b32.xlu1 %v8926_v55, %s7783_s0  ;;  %2293 = vrot.lane.b32.xlu0 %v8926_v55, %s7788_s28 }
 0x90f   :  { %2263 = vrot.lane.b32.xlu1 %v8912_v24, %s7787_s27  ;;  %2225 = vrot.lane.b32.xlu0 %v8934_v18, %s7784_s25 }
 0x913   :  { %2265 = vrot.lane.b32.xlu1 %v8918_v40, %s7787_s27  ;;  %2317 = vrot.lane.b32.xlu0 %v8926_v55, %s7785_s26 }
 0x917   :  { %2195 = vrot.lane.b32.xlu1 %v8922_v4, %s7780_s16  ;;  %2249 = vrot.lane.b32.xlu0 %v8934_v18, %s7786_s4 }
 0x91b   :  { %2197 = vrot.lane.b32.xlu1 %v8926_v55, %s7780_s16  ;;  %2181 = vrot.lane.b32.xlu0 %v8966_v57, %s7783_s0 }
 0x91f   :  { %2287 = vrot.lane.b32.xlu1 %v8912_v24, %s7788_s28  ;;  %2273 = vrot.lane.b32.xlu0 %v8934_v18, %s7787_s27 }
 0x923   :  { %2289 = vrot.lane.b32.xlu1 %v8918_v40, %s7788_s28  ;;  %2205 = vrot.lane.b32.xlu0 %v8966_v57, %s7780_s16 }
 0x927   :  { %2219 = vrot.lane.b32.xlu1 %v8922_v4, %s7784_s25  ;;  %2297 = vrot.lane.b32.xlu0 %v8934_v18, %s7788_s28 }
 0x92b   :  { %2221 = vrot.lane.b32.xlu1 %v8926_v55, %s7784_s25  ;;  %2229 = vrot.lane.b32.xlu0 %v8966_v57, %s7784_s25 }
 0x92f   :  { %2311 = vrot.lane.b32.xlu1 %v8912_v24, %s7785_s26  ;;  %2321 = vrot.lane.b32.xlu0 %v8934_v18, %s7785_s26 }
 0x933   :  { %2313 = vrot.lane.b32.xlu1 %v8918_v40, %s7785_s26  ;;  %2253 = vrot.lane.b32.xlu0 %v8966_v57, %s7786_s4 }
 0x937   :  { %2243 = vrot.lane.b32.xlu1 %v8922_v4, %s7786_s4  ;;  %2277 = vrot.lane.b32.xlu0 %v8966_v57, %s7787_s27 }
 0x93b   :  { %2245 = vrot.lane.b32.xlu1 %v8926_v55, %s7786_s4  ;;  %2301 = vrot.lane.b32.xlu0 %v8966_v57, %s7788_s28 }
 0x93f   :  { %2175 = vrot.lane.b32.xlu1 %v8930_v26, %s7783_s0  ;;  %2325 = vrot.lane.b32.xlu0 %v8966_v57, %s7785_s26 }
 0x943   :  { %2267 = vrot.lane.b32.xlu1 %v8922_v4, %s7787_s27 }
 0x947   :  { %2199 = vrot.lane.b32.xlu1 %v8930_v26, %s7780_s16 }
 0x94b   :  { %2291 = vrot.lane.b32.xlu1 %v8922_v4, %s7788_s28 }
 0x94f   :  { %2223 = vrot.lane.b32.xlu1 %v8930_v26, %s7784_s25 }
 0x953   :  { %2315 = vrot.lane.b32.xlu1 %v8922_v4, %s7785_s26 }
 0x957   :  { %2247 = vrot.lane.b32.xlu1 %v8930_v26, %s7786_s4 }
 0x95b   :  { %2179 = vrot.lane.b32.xlu1 %v8956_v53, %s7783_s0 }
 0x95d   :  { %v9022_v15 = vpop.permute.xlu1 %2167  ;;  %v2216_v32 = vpop.permute.xlu0 %2215 }
 0x95f   :  { %2271 = vrot.lane.b32.xlu1 %v8930_v26, %s7787_s27 }
 0x961   :  { %v9026_v45 = vpop.permute.xlu1 %2169 }
 0x963   :  { %2203 = vrot.lane.b32.xlu1 %v8956_v53, %s7780_s16 }
 0x965   :  { %v9030_v46 = vpop.permute.xlu1 %2191 }
 0x967   :  { %2295 = vrot.lane.b32.xlu1 %v8930_v26, %s7788_s28 }
 0x969   :  { %v9034_v0 = vpop.permute.xlu1 %2193 }
 0x96b   :  { %2227 = vrot.lane.b32.xlu1 %v8956_v53, %s7784_s25 }
 0x96d   :  { %v9038_v44 = vpop.permute.xlu1 %2217 }
 0x96f   :  { %2319 = vrot.lane.b32.xlu1 %v8930_v26, %s7785_s26 }
 0x971   :  { %v9042_v25 = vpop.permute.xlu1 %2239  ;;  %v9118_v16 = vpop.permute.xlu0 %2177 }
 0x973   :  { %2251 = vrot.lane.b32.xlu1 %v8956_v53, %s7786_s4 }
 0x975   :  { %v9046_v22 = vpop.permute.xlu1 %2241  ;;  %v9120_v5 = vpop.permute.xlu0 %2269 }
 0x979   :  { %v9048_v28 = vpop.permute.xlu1 %2171 }
 0x97d   :  { %v9050_v17 = vpop.permute.xlu1 %2173 }
 0x981   :  { %v9052_v50 = vpop.permute.xlu1 %2263 }
 0x985   :  { %v9054_v52 = vpop.permute.xlu1 %2265 }
 0x989   :  { %v9058_v41 = vpop.permute.xlu1 %2195 }
 0x98d   :  { %v9061_v56 = vpop.permute.xlu1 %2197 }
 0x991   :  { %v9063_v61 = vpop.permute.xlu1 %2287 }
 0x995   :  { %v9065_v9 = vpop.permute.xlu1 %2289 }
 0x997   :  { %1474 = vadd.xlane.f32.xlu1 %v1473_v59 }
 0x999   :  { %v9069_v43 = vpop.permute.xlu1 %2219 }
 0x99c   :  { %v1960_v39 = vpop.f32.mrb[10].mxu0 }
 0x99d   :  { %v6662_v38 = vpop.f32.mrb[11].mxu0  ;;  %v9071_v42 = vpop.permute.xlu1 %2221  ;;  %v1964_v60 = vmul.f32 0.35355338, %v1960_v39 }
 0x99f   :  { %v1965_v31 = vsel %vm288_vm0, %v1964_v60, -inf }
 0x9a1   :  { %v9073_v19 = vpop.permute.xlu1 %2311 }
 0x9a5   :  { %v9076_v47 = vpop.permute.xlu1 %2313 }
 0x9a8   :  { %2275 = vrot.lane.b32.xlu1 %v8956_v53, %s7787_s27 }
 0x9a9   :  { %v9079_v13 = vpop.permute.xlu1 %2243 }
 0x9ad   :  { %v9082_v7 = vpop.permute.xlu1 %2245 }
 0x9b1   :  { %v9084_v58 = vpop.permute.xlu1 %2175 }
 0x9b5   :  { %v9086_v1 = vpop.permute.xlu1 %2267 }
 0x9b9   :  { %v9088_v8 = vpop.permute.xlu1 %2199 }
 0x9bd   :  { %v9090_v54 = vpop.permute.xlu1 %2291 }
 0x9c1   :  { %v9092_v10 = vpop.permute.xlu1 %2223 }
 0x9c5   :  { %v9094_v14 = vpop.permute.xlu1 %2315 }
 0x9c9   :  { %v9096_v23 = vpop.permute.xlu1 %2247 }
 0x9cc   :  { %1490 = vadd.xlane.f32.xlu1 %v1489_v30 }
 0x9cd   :  { %v9098_v33 = vpop.permute.xlu1 %2179 }
 0x9d1   :  { %v9100_v21 = vpop.permute.xlu1 %2271 }
 0x9d5   :  { %v9102_v37 = vpop.permute.xlu1 %2203 }
 0x9d6   :  { %11156 = vst [vmem:[#allocation12_spill] sm:$0xff] %v9102_v37 }
 0x9d9   :  { %v9104_v35 = vpop.permute.xlu1 %2295 }
 0x9da   :  { %11157 = vst [vmem:[#allocation11_spill] sm:$0xff] %v9104_v35 }
 0x9dd   :  { %v9106_v59 = vpop.permute.xlu1 %2227 }
 0x9de   :  { %11158 = vst [vmem:[#allocation14_spill] sm:$0xff] %v9106_v59 }
 0x9e1   :  { %v9108_v38 = vpop.permute.xlu1 %2319 }
 0x9e2   :  { %11159 = vst [vmem:[#allocation13_spill] sm:$0xff] %v9108_v38 }
 0x9e5   :  { %v9110_v63 = vpop.permute.xlu1 %2251 }
 0x9e6   :  { %11160 = vst [vmem:[#allocation8_spill] sm:$0xff] %v9110_v63 }
 0xa24   :  { %v1475_v27 = vpop.xlane.xlu1 %1474 }
 0xa25   :  { %v1480_v30 = vmul.f32 0.015625, %v1475_v27 }
 0xa27   :  { %v1482_v48 = vsub.f32 %v1471_v51, %v1480_v30 }
 0xa28   :  { %v9122_v51 = vpop.permute.xlu1 %2275 }
 0xa29   :  { %v1484_v62 = vmul.f32 %v1482_v48, %v1482_v48  ;;  %11161 = vst [vmem:[#allocation10_spill] sm:$0xff] %v9122_v51 }
 0xa2b   :  { %v1486_v36 = vsel %vm288_vm0, %v1484_v62, 0.0  ;;  %v9124_v62 = vpop.permute.xlu0 %2201 }
 0xa2c   :  { %1487 = vadd.xlane.f32.xlu1 %v1486_v36 }
 0xa2f   :  { %v9126_v30 = vpop.permute.xlu0 %2293 }
 0xa33   :  { %v9128_v34 = vpop.permute.xlu0 %2225 }
 0xa37   :  { %v9130_v63 = vpop.permute.xlu0 %2317 }
 0xa3b   :  { %v9132_v59 = vpop.permute.xlu0 %2249 }
 0xa3d   :  { %2299 = vrot.lane.b32.xlu1 %v8956_v53, %s7788_s28 }
 0xa59   :  { %v1491_v27 = vpop.xlane.xlu1 %1490 }
 0xa5a   :  { %v1493_v36 = vmul.f32 0.015625, %v1491_v27  ;;  %v5949_v27 = vld [vmem:[%s11042_s6 + $0x21] ss:$0 sm:$0xff] }
 0xa5c   :  { %v1495_v39 = vadd.f32 1e-05, %v1493_v36 }
 0xa5e   :  { %7644 = vrsqrt.f32 %v1495_v39 }
 0xa61   :  { %1966 = vmax.xlane.f32.xlu1 %v1965_v31 }
 0xa68   :  { %v7645_v29 = vpop.eup %7644 }
 0xa69   :  { %v1499_v38 = vmul.f32 %v7645_v29, %v1483_v49 }
 0xa6b   :  { %v1505_v36 = vmul.f32 %v5949_v27, %v1499_v38 }
 0xa72   :  { %2323 = vrot.lane.b32.xlu1 %v8956_v53, %s7785_s26 }
 0xab9   :  { %v1488_v11 = vpop.xlane.xlu1 %1487 }
 0xaba   :  { %v1492_v31 = vmul.f32 0.015625, %v1488_v11  ;;  %v5950_v11 = vld [vmem:[%s11042_s6 + $0x22] ss:$0 sm:$0xff] }
 0xabb   :  { %v9142_v37 = vadd.f32 %v5950_v11, %v1505_v36 }
 0xabc   :  { %v1494_v2 = vadd.f32 1e-05, %v1492_v31  ;;  %v2182_v31 = vpop.permute.xlu0 %2181 }
 0xabd   :  { %11163 = vst [vmem:[#allocation26_spill] sm:$0xff] %v9142_v37  ;;  %v9154_v38 = vpop.permute.xlu1 %2299 }
 0xabe   :  { %7646 = vrsqrt.f32 %v1494_v2  ;;  %11164 = vst [vmem:[#allocation27_spill] sm:$0xff] %v9154_v38 }
 0xac8   :  { %v7647_v51 = vpop.eup %7646 }
 0xac9   :  { %v1498_v35 = vmul.f32 %v7647_v51, %v1482_v48  ;;  %v9150_v48 = vpop.permute.xlu0 %2273 }
 0xacb   :  { %v1504_v39 = vmul.f32 %v5949_v27, %v1498_v35 }
 0xacd   :  { %v9140_v2 = vadd.f32 %v5950_v11, %v1504_v39  ;;  %v2206_v29 = vpop.permute.xlu0 %2205  ;;  %v2335_v39 = vsel %vm80_vm6, %v8912_v24, %v9022_v15 }
 0xace   :  { %v2343_v38 = vsel %vm82_vm1, %v2335_v39, %v9030_v46 }
 0xacf   :  { %11162 = vst [vmem:[#allocation9_spill] sm:$0xff] %v9140_v2  ;;  %6641 = vmatprep.mubr.msk.f32.mxu1 %vm288_vm0, %v9140_v2  ;;  %v2338_v2 = vsel %vm80_vm6, %v8926_v55, %v9050_v17  ;;  %v2351_v46 = vsel %vm84_vm7, %v2343_v38, %v2216_v32  ;;  %v11168_v38 = vld [vmem:[#allocation14_spill] sm:$0xff] }
 0xad0   :  { %6642 = vmatmul.mubr.msk.f32.gmra.mrb[12].mxu1 %vm288_vm0, %v9142_v37  ;;  %v2336_v37 = vsel %vm80_vm6, %v8918_v40, %v9026_v45  ;;  %v2342_v40 = vsel %vm80_vm6, %v8966_v57, %v2182_v31  ;;  %v2359_v57 = vsel %vm86_vm8, %v2351_v46, %v9042_v25 }
 0xad1   :  { %6679 = vmatprep.mubr.msk.f32.mxu1 %vm7790_vm5, %v11135_v3  ;;  %v9152_v49 = vpop.permute.xlu0 %2297  ;;  %v2367_v32 = vsel %vm88_vm9, %v2359_v57, %v9052_v50 }
 0xad5   :  { %v2230_v35 = vpop.permute.xlu0 %2229 }
 0xad9   :  { %v9156_v51 = vpop.permute.xlu0 %2321 }
 0xada   :  { %11165 = vst [vmem:[#allocation28_spill] sm:$0xff] %v9156_v51  ;;  %v2344_v51 = vsel %vm82_vm1, %v2336_v37, %v9034_v0  ;;  %v2337_v0 = vsel %vm80_vm6, %v8922_v4, %v9048_v28 }
 0xadb   :  { %v2352_v24 = vsel %vm84_vm7, %v2344_v51, %v9038_v44  ;;  %v2345_v17 = vsel %vm82_vm1, %v2337_v0, %v9058_v41  ;;  %v2375_v41 = vsel %vm90_vm10, %v2367_v32, %v9063_v61 }
 0xadc   :  { %v2360_v55 = vsel %vm86_vm8, %v2352_v24, %v9046_v22  ;;  %v2353_v4 = vsel %vm84_vm7, %v2345_v17, %v9069_v43  ;;  %v2383_v43 = vsel %vm92_vm11, %v2375_v41, %v9073_v19  ;;  %v11176_v17 = vld [vmem:[#allocation27_spill] sm:$0xff] }
 0xadd   :  { %v2254_v36 = vpop.permute.xlu0 %2253  ;;  %v2368_v44 = vsel %vm88_vm9, %v2360_v55, %v9054_v52  ;;  %v2340_v52 = vsel %vm80_vm6, %v8934_v18, %v9118_v16  ;;  %v11179_v41 = vld [vmem:[#allocation23_spill] sm:$0xff] }
 0xade   :  { %v2376_v22 = vsel %vm90_vm10, %v2368_v44, %v9065_v9  ;;  %v2361_v9 = vsel %vm86_vm8, %v2353_v4, %v9079_v13  ;;  %v2348_v19 = vsel %vm82_vm1, %v2340_v52, %v9124_v62 }
 0xadf   :  { %v2384_v28 = vsel %vm92_vm11, %v2376_v22, %v9076_v47  ;;  %v2339_v47 = vsel %vm80_vm6, %v8930_v26, %v9084_v58  ;;  %v2356_v58 = vsel %vm84_vm7, %v2348_v19, %v9128_v34 }
 0xae0   :  { %v2392_v16 = vmul.f32 %v8814_v6, %v2384_v28  ;;  %v2347_v61 = vsel %vm82_vm1, %v2339_v47, %v9088_v8  ;;  %v2364_v62 = vsel %vm86_vm8, %v2356_v58, %v9132_v59 }
 0xae1   :  { %v2355_v26 = vsel %vm84_vm7, %v2347_v61, %v9092_v10  ;;  %v11172_v24 = vld [vmem:[#allocation28_spill] sm:$0xff] }
 0xae2   :  { %v2363_v8 = vsel %vm86_vm8, %v2355_v26, %v9096_v23 }
 0xae3   :  { %v2371_v34 = vsel %vm88_vm9, %v2363_v8, %v9100_v21 }
 0xaee   :  { %v1967_v27 = vpop.xlane.xlu1 %1966 }
 0xaef   :  { %v1968_v11 = vsub.f32 %v1964_v60, %v1967_v27  ;;  %v2346_v60 = vsel %vm82_vm1, %v2338_v2, %v9061_v56  ;;  %v2350_v56 = vsel %vm82_vm1, %v2342_v40, %v2206_v29  ;;  %v11166_v2 = vld [vmem:[#allocation12_spill] sm:$0xff] }
 0xaf0   :  { %v2354_v15 = vsel %vm84_vm7, %v2346_v60, %v9071_v42  ;;  %v2278_v42 = vpop.permute.xlu0 %2277  ;;  %v2358_v50 = vsel %vm84_vm7, %v2350_v56, %v2230_v35  ;;  %v11167_v35 = vld [vmem:[#allocation11_spill] sm:$0xff]  ;;  %v11171_v60 = vld [vmem:[#allocation8_spill] sm:$0xff] }
 0xaf1   :  { %v1969_v27 = vmul.f32 1.442695, %v1968_v11  ;;  %v2362_v45 = vsel %vm86_vm8, %v2354_v15, %v9082_v7  ;;  %v2366_v37 = vsel %vm86_vm8, %v2358_v50, %v2254_v36  ;;  %v2379_v59 = vsel %vm90_vm10, %v2371_v34, %v11167_v35  ;;  %v11170_v11 = vld [vmem:[#allocation21_spill] sm:$0xff]  ;;  %v11173_v15 = vld [vmem:[#allocation10_spill] sm:$0xff] }
 0xaf2   :  { %v2370_v25 = vsel %vm88_vm9, %v2362_v45, %v9120_v5  ;;  %v2369_v5 = vsel %vm88_vm9, %v2361_v9, %v9086_v1  ;;  %v2391_v1 = vmul.f32 %v8808_v20, %v2383_v43  ;;  %v2374_v51 = vsel %vm88_vm9, %v2366_v37, %v2278_v42  ;;  %v11177_v42 = vld [vmem:[#allocation24_spill] sm:$0xff]  ;;  %v11180_v43 = vld [vmem:[#allocation15_spill] sm:$0xff] }
 0xaf3   :  { %7648 = vpow2.f32 %v1969_v27  ;;  %v2378_v18 = vsel %vm90_vm10, %v2370_v25, %v9126_v30  ;;  %v2377_v13 = vsel %vm90_vm10, %v2369_v5, %v9090_v54  ;;  %v11174_v45 = vmov 0.0|0.0   ;;  %v11178_v25 = vld [vmem:[#allocation25_spill] sm:$0xff] }
 0xaf4   :  { %v2385_v7 = vsel %vm92_vm11, %v2377_v13, %v9094_v14  ;;  %v2302_v54 = vpop.permute.xlu0 %2301  ;;  %v2386_v10 = vsel %vm92_vm11, %v2378_v18, %v9130_v63  ;;  %v2341_v14 = vsel %vm80_vm6, %v8956_v53, %v9098_v33  ;;  %v7248_v31 = vpack.c.bf16 %v2392_v16, %v2391_v1  ;;  %v11169_v33 = vld [vmem:[#allocation13_spill] sm:$0xff] }
 0xaf5   :  { %v2393_v23 = vmul.f32 %v8838_v12, %v2385_v7  ;;  %v2349_v29 = vsel %vm82_vm1, %v2341_v14, %v11166_v2  ;;  %v2372_v63 = vsel %vm88_vm9, %v2364_v62, %v9150_v48  ;;  %v2387_v21 = vsel %vm92_vm11, %v2379_v59, %v11169_v33  ;;  %v2324_v48 = vpop.permute.xlu1 %2323  ;;  %v11181_v33 = vld [vmem:[#allocation16_spill] sm:$0xff] }
 0xaf6   :  { %v2357_v53 = vsel %vm84_vm7, %v2349_v29, %v11168_v38  ;;  %v2380_v36 = vsel %vm90_vm10, %v2372_v63, %v9152_v49  ;;  %v2394_v39 = vmul.f32 %v11170_v11, %v2386_v10  ;;  %v11175_v49 = vld [vmem:[#allocation22_spill] sm:$0xff]  ;;  %v2382_v44 = vsel %vm90_vm10, %v2374_v51, %v2302_v54 }
 0xaf7   :  { %v2365_v27 = vsel %vm86_vm8, %v2357_v53, %v11171_v60  ;;  %v2388_v40 = vsel %vm92_vm11, %v2380_v36, %v11172_v24  ;;  %v2395_v0 = vmul.f32 %v11175_v49, %v2387_v21  ;;  %v11184_v60 = vld [vmem:[#allocation20_spill] sm:$0xff] }
 0xaf8   :  { %v2373_v55 = vsel %vm88_vm9, %v2365_v27, %v11173_v15  ;;  %v7251_v46 = vpack.c.bf16 %v2394_v39, %v2393_v23  ;;  %v2326_v57 = vpop.permute.xlu0 %2325  ;;  %v2396_v32 = vmul.f32 %v11177_v42, %v2388_v40  ;;  %v11182_v39 = vld [vmem:[#allocation18_spill] sm:$0xff] }
 0xaf9   :  { %v2381_v22 = vsel %vm90_vm10, %v2373_v55, %v11176_v17  ;;  %v2390_v4 = vsel %vm92_vm11, %v2382_v44, %v2326_v57  ;;  %v5933_v57 = vld [vmem:[%s11039_s3 + $0xd8] sm:$0xff] }
 0xafa   :  { %v2389_v56 = vsel %vm92_vm11, %v2381_v22, %v2324_v48  ;;  %v7254_v28 = vpack.c.bf16 %v2396_v32, %v2395_v0  ;;  %v2398_v9 = vmul.f32 %v11179_v41, %v2390_v4  ;;  %v5932_v0 = vld [vmem:[%s11039_s3 + $0xd0] sm:$0xff]  ;;  %v5934_v22 = vld [vmem:[%s11039_s3 + $0xe0] sm:$0xff]  ;;  %v5937_v4 = vld [vmem:[%s11039_s3 + $0xf8] sm:$0xff] }
 0xafb   :  { %v2397_v52 = vmul.f32 %v11178_v25, %v2389_v56  ;;  %v7287_v17 = vpack.c.bf16 %v5933_v57, %v5932_v0  ;;  %v5935_v56 = vld [vmem:[%s11039_s3 + $0xe8] sm:$0xff]  ;;  %v5936_v32 = vld [vmem:[%s11039_s3 + $0xf0] sm:$0xff]  ;;  %v5973_v57 = vld [vmem:[%s11039_s3 + $0x100] sm:$0xff] }
 0xafd   :  { %v9247_v30 = vpop.eup %7648  ;;  %v7257_v50 = vpack.c.bf16 %v2398_v9, %v2397_v52 }
 0xafe   :  { %6680 = vmatmul.mubr.msk.f32.vlgmr.msra.gmra.mrb[14].mxu1 %vm288_vm0, %v9247_v30 }
 0xaff   :  { %7249 = vmatpush3.bf16.msra.mxu1 %v7248_v31  ;;  %6717 = vmatprep.mubr.msk.f32.mxu1 %vm7790_vm5, %v11135_v3 }
 0xb00   :  { %7250 = vmatprep.subr.bf16.mxu1 %v11174_v45 }
 0xb03   :  { %7252 = vmatpush3.bf16.msra.mxu1 %v7251_v46  ;;  %v5930_v46 = vld [vmem:[%s11039_s3 + $0xc0] sm:$0xff] }
 0xb04   :  { %7253 = vmatprep.subr.bf16.mxu1 %v11174_v45 }
 0xb07   :  { %7255 = vmatpush3.bf16.msra.mxu1 %v7254_v28  ;;  %v7295_v28 = vpack.c.bf16 %v5937_v4, %v5936_v32  ;;  %v263_v32 = vld [vmem:[%s11041_s5 + $0x88] sm:$0xff]  ;;  %v246_v4 = vld [vmem:[%s11041_s5] sm:$0xff] }
 0xb08   :  { %7256 = vmatprep.subr.bf16.mxu1 %v11174_v45 }
 0xb0b   :  { %7258 = vmatpush3.bf16.msra.mxu1 %v7257_v50 }
 0xb0c   :  { %7271 = vmatprep.subr.bf16.mxu1 %v11174_v45 }
 0xb0e   :  { %6718 = vmatmul.mubr.msk.f32.vlgmr.msra.gmra.mrb[16].mxu1 %vm288_vm0, %v11180_v43 }
 0xb0f   :  { %6755 = vmatprep.mubr.msk.f32.mxu1 %vm7790_vm5, %v11135_v3 }
 0xba3   :  { %v6643_v47 = vpop.f32.mrb[12].mxu1 }
 0xba4   :  { %v1610_v5 = vpop.f32.mrb[13].mxu1  ;;  %v2554_v16 = vmul.f32 %v8808_v20, %v6643_v47  ;;  %v2555_v18 = vmul.f32 %v8814_v6, %v6643_v47  ;;  %v2556_v26 = vmul.f32 %v8838_v12, %v6643_v47  ;;  %v2557_v7 = vmul.f32 %v11170_v11, %v6643_v47 }
 0xba5   :  { %v2046_v61 = vmul.f32 %v8808_v20, %v1610_v5  ;;  %v2047_v13 = vmul.f32 %v8814_v6, %v1610_v5  ;;  %v2048_v1 = vmul.f32 %v8838_v12, %v1610_v5  ;;  %v2049_v8 = vmul.f32 %v11170_v11, %v1610_v5 }
 0xba6   :  { %v7272_v19 = vpack.c.bf16 %v2555_v18, %v2554_v16  ;;  %v7275_v37 = vpack.c.bf16 %v2557_v7, %v2556_v26  ;;  %v2558_v20 = vmul.f32 %v11175_v49, %v6643_v47  ;;  %v2559_v6 = vmul.f32 %v11177_v42, %v6643_v47  ;;  %v11186_v26 = vld [vmem:[#allocation26_spill] sm:$0xff] }
 0xba7   :  { %v7236_v58 = vpack.c.bf16 %v2047_v13, %v2046_v61  ;;  %v7239_v54 = vpack.c.bf16 %v2049_v8, %v2048_v1  ;;  %v2050_v62 = vmul.f32 %v11175_v49, %v1610_v5  ;;  %v2051_v10 = vmul.f32 %v11177_v42, %v1610_v5  ;;  %v5931_v49 = vld [vmem:[%s11039_s3 + $0xc8] sm:$0xff]  ;;  %v11185_v13 = vld [vmem:[#allocation9_spill] sm:$0xff] }
 0xba8   :  { %7273 = vmatpush3.bf16.msra.mxu1 %v7272_v19  ;;  %v7278_v12 = vpack.c.bf16 %v2559_v6, %v2558_v20  ;;  %v2560_v14 = vmul.f32 %v11178_v25, %v6643_v47  ;;  %v2561_v34 = vmul.f32 %v11179_v41, %v6643_v47  ;;  %v2052_v23 = vmul.f32 %v11178_v25, %v1610_v5  ;;  %v5963_v47 = vld [vmem:[%s11042_s6 + $0x23] ss:$0 sm:$0xff] }
 0xba9   :  { %7237 = vmatpush3.bf16.msra.mxu0 %v7236_v58  ;;  %7274 = vmatprep.subr.bf16.mxu1 %v11174_v45  ;;  %v7242_v31 = vpack.c.bf16 %v2051_v10, %v2050_v62  ;;  %v2053_v2 = vmul.f32 %v11179_v41, %v1610_v5  ;;  %v7283_v44 = vpack.c.bf16 %v5931_v49, %v5930_v46  ;;  %v245_v46 = vld [vmem:[#allocation2 + $0x78] sm:$0xff]  ;;  %v242_v49 = vld [vmem:[#allocation2 + $0x60] sm:$0xff] }
 0xbaa   :  { %7238 = vmatprep.subr.bf16.mxu0 %v11174_v45  ;;  %v7281_v29 = vpack.c.bf16 %v2561_v34, %v2560_v14  ;;  %v7291_v42 = vpack.c.bf16 %v5935_v56, %v5934_v22 }
 0xbab   :  { %v7245_v35 = vpack.c.bf16 %v2053_v2, %v2052_v23  ;;  %v233_v23 = vld [vmem:[#allocation2 + $0x18] sm:$0xff] }
 0xbac   :  { %7276 = vmatpush3.bf16.msra.mxu1 %v7275_v37 }
 0xbad   :  { %7240 = vmatpush3.bf16.msra.mxu0 %v7239_v54  ;;  %7277 = vmatprep.subr.bf16.mxu1 %v11174_v45 }
 0xbae   :  { %7241 = vmatprep.subr.bf16.mxu0 %v11174_v45 }
 0xbb0   :  { %7279 = vmatpush3.bf16.msra.mxu1 %v7278_v12 }
 0xbb1   :  { %7243 = vmatpush3.bf16.msra.mxu0 %v7242_v31  ;;  %7280 = vmatprep.subr.bf16.mxu1 %v11174_v45  ;;  %v231_v31 = vld [vmem:[#allocation2 + $0x8] sm:$0xff] }
 0xbb2   :  { %7244 = vmatprep.subr.bf16.mxu0 %v11174_v45  ;;  %v7299_v2 = vpack.c.bf16 %v233_v23, %v231_v31  ;;  %v272_v31 = vld [vmem:[%s11041_s5 + $0xd0] sm:$0xff]  ;;  %v273_v23 = vld [vmem:[%s11041_s5 + $0xd8] sm:$0xff] }
 0xbb4   :  { %7282 = vmatpush3.bf16.msra.mxu1 %v7281_v29  ;;  %v230_v29 = vld [vmem:[#allocation2] sm:$0xff] }
 0xbb5   :  { %7246 = vmatpush3.bf16.msra.mxu0 %v7245_v35  ;;  %v232_v35 = vld [vmem:[#allocation2 + $0x10] sm:$0xff]  ;;  %7300 = vmatprep.subr.bf16.mxu1 %v7299_v2 }
 0xbb6   :  { %7259 = vmatprep.subr.bf16.mxu0 %v11174_v45 }
 0xbd1   :  { %v2040_v59 = vpop.f32.mrb[14].mxu1 }
 0xbd2   :  { %7650 = vrcp.f32 %v2040_v59  ;;  %v6681_v63 = vpop.f32.mrb[15].mxu1  ;;  %v7301_v59 = vpack.c.bf16 %v232_v35, %v230_v29  ;;  %v7335_v29 = vpack.c.bf16 %v273_v23, %v272_v31  ;;  %v256_v35 = vld [vmem:[%s11041_s5 + $0x50] sm:$0xff] }
 0xbd3   :  { %v235_v63 = vld [vmem:[#allocation2 + $0x28] sm:$0xff] }
 0xbdc   :  { %v7651_v38 = vpop.eup %7650 }
 0xbdd   :  { %v2045_v53 = vmul.f32 %v7651_v38, %v9247_v30  ;;  %v11183_v30 = vld [vmem:[#allocation19_spill] sm:$0xff]  ;;  %v237_v38 = vld [vmem:[#allocation2 + $0x38] sm:$0xff] }
 0xbdf   :  { %6699 = vmatmul.mubr.msk.f32.vlgmr.msra.gmra.mrb[12].mxu0 %vm288_vm0, %v2045_v53  ;;  %v7303_v53 = vpack.c.bf16 %v237_v38, %v235_v63  ;;  %v274_v63 = vld [vmem:[%s11041_s5 + $0xe0] sm:$0xff]  ;;  %v275_v38 = vld [vmem:[%s11041_s5 + $0xe8] sm:$0xff] }
 0xbe0   :  { %7261 = vmatpush3.bf16.msra.mxu0 %v11181_v33  ;;  %6736 = vmatprep.mubr.msk.f32.mxu0 %vm7790_vm5, %v11135_v3 }
 0xbe1   :  { %v2468_v21 = vpop.f32.mrb[16].mxu1  ;;  %7262 = vmatprep.subr.bf16.mxu0 %v11174_v45 }
 0xbe2   :  { %v2472_v51 = vmul.f32 0.35355338, %v2468_v21  ;;  %v6719_v36 = vpop.f32.mrb[17].mxu1  ;;  %v234_v21 = vld [vmem:[#allocation2 + $0x20] sm:$0xff] }
 0xbe4   :  { %v2473_v11 = vsel %vm288_vm0, %v2472_v51, -inf  ;;  %7264 = vmatpush3.bf16.msra.mxu0 %v11182_v39 }
 0xbe5   :  { %2474 = vmax.xlane.f32.xlu1 %v2473_v11  ;;  %7265 = vmatprep.subr.bf16.mxu0 %v11174_v45  ;;  %v239_v11 = vld [vmem:[#allocation2 + $0x48] sm:$0xff] }
 0xbe8   :  { %7267 = vmatpush3.bf16.msra.mxu0 %v11183_v30 }
 0xbe9   :  { %7268 = vmatprep.subr.bf16.mxu0 %v11174_v45 }
 0xbec   :  { %7270 = vmatpush3.bf16.msra.mxu0 %v11184_v60 }
 0xbed   :  { %7284 = vmatprep.subr.bf16.mxu0 %v7283_v44 }
 0xc72   :  { %v2475_v27 = vpop.xlane.xlu1 %2474 }
 0xc73   :  { %v2476_v48 = vsub.f32 %v2472_v51, %v2475_v27  ;;  %v236_v51 = vld [vmem:[#allocation2 + $0x30] sm:$0xff]  ;;  %v241_v27 = vld [vmem:[#allocation2 + $0x58] sm:$0xff] }
 0xc74   :  { %v7305_v36 = vpack.c.bf16 %v236_v51, %v234_v21  ;;  %v7339_v21 = vpack.c.bf16 %v275_v38, %v274_v63 }
 0xc75   :  { %v2477_v24 = vmul.f32 1.442695, %v2476_v48  ;;  %v7307_v48 = vpack.c.bf16 %v241_v27, %v239_v11 }
 0xc77   :  { %7652 = vpow2.f32 %v2477_v24  ;;  %v238_v24 = vld [vmem:[#allocation2 + $0x40] sm:$0xff] }
 0xc81   :  { %v7653_v40 = vpop.eup %7652 }
 0xc82   :  { %6737 = vmatmul.mubr.msk.f32.vlgmr.msra.gmra.mrb[14].mxu0 %vm288_vm0, %v7653_v40 }
 0xc83   :  { %7286 = vmatpush3.bf16.msra.mxu0 %v7283_v44  ;;  %v244_v44 = vld [vmem:[#allocation2 + $0x70] sm:$0xff] }
 0xc84   :  { %7288 = vmatprep.subr.bf16.mxu0 %v7287_v17  ;;  %v7313_v22 = vpack.c.bf16 %v244_v44, %v242_v49  ;;  %v5975_v49 = vld [vmem:[%s11039_s3 + $0x110] sm:$0xff] }
 0xc87   :  { %7290 = vmatpush3.bf16.msra.mxu0 %v7287_v17  ;;  %v5974_v17 = vld [vmem:[%s11039_s3 + $0x108] sm:$0xff] }
 0xc88   :  { %7292 = vmatprep.subr.bf16.mxu0 %v7291_v42  ;;  %v9378_v56 = vpack.c.bf16 %v5974_v17, %v5973_v57 }
 0xc8b   :  { %7294 = vmatpush3.bf16.msra.mxu0 %v7291_v42  ;;  %v262_v42 = vld [vmem:[%s11041_s5 + $0x80] sm:$0xff] }
 0xc8c   :  { %7296 = vmatprep.subr.bf16.mxu0 %v7295_v28 }
 0xc8f   :  { %7298 = vmatpush3.bf16.msra.mxu0 %v7295_v28  ;;  %v7315_v28 = vpack.c.bf16 %v263_v32, %v262_v42  ;;  %v5978_v32 = vld [vmem:[%s11039_s3 + $0x128] sm:$0xff] }
 0xc91   :  { %7316 = vmatprep.subr.bf16.mxu0 %v7315_v28 }
 0xcb2   :  { %v2123_v15 = vpop.f32.mrb[12].mxu0 }
 0xcb3   :  { %v6700_v55 = vpop.f32.mrb[13].mxu0  ;;  %6774 = vmatprep.mubr.msk.f32.mxu0 %vm288_vm0, %v2123_v15 }
 0xcb4   :  { %v243_v55 = vld [vmem:[#allocation2 + $0x68] sm:$0xff] }
 0xcb5   :  { %v7311_v0 = vpack.c.bf16 %v245_v46, %v243_v55  ;;  %v5967_v46 = vld [vmem:[%s11042_s6 + $0x25] ss:$0 sm:$0xff] }
 0xd55   :  { %v2548_v25 = vpop.f32.mrb[14].mxu0 }
 0xd56   :  { %7654 = vrcp.f32 %v2548_v25  ;;  %v6738_v52 = vpop.f32.mrb[15].mxu0  ;;  %v247_v25 = vld [vmem:[%s11041_s5 + $0x8] sm:$0xff] }
 0xd57   :  { %v264_v52 = vld [vmem:[%s11041_s5 + $0x90] sm:$0xff] }
 0xd60   :  { %v7655_v41 = vpop.eup %7654 }
 0xd61   :  { %v2553_v9 = vmul.f32 %v7655_v41, %v7653_v40  ;;  %v240_v40 = vld [vmem:[#allocation2 + $0x50] sm:$0xff]  ;;  %v265_v41 = vld [vmem:[%s11041_s5 + $0x98] sm:$0xff] }
 0xd62   :  { %v7309_v15 = vpack.c.bf16 %v240_v40, %v238_v24 }
 0xd63   :  { %6756 = vmatmul.mubr.msk.f32.vlgmr.msra.gmra.mrb[18].mxu1 %vm288_vm0, %v2553_v9  ;;  %v7317_v9 = vpack.c.bf16 %v247_v25, %v246_v4  ;;  %v5979_v25 = vld [vmem:[%s11039_s3 + $0x130] sm:$0xff] }
 0xd64   :  { %2841 = vmatprep.mubr.f32.mxu1 %v11135_v3  ;;  %7302 = vmatpush1.bf16.msra.mxu1 %v7301_v59  ;;  %v257_v59 = vld [vmem:[%s11041_s5 + $0x58] sm:$0xff] }
 0xd65   :  { %7304 = vmatprep.subr.bf16.mxu1 %v7303_v53  ;;  %v7337_v53 = vpack.c.bf16 %v257_v59, %v256_v35 }
 0xd68   :  { %7306 = vmatpush1.bf16.msra.mxu1 %v7305_v36 }
 0xd69   :  { %7308 = vmatprep.subr.bf16.mxu1 %v7307_v48 }
 0xd6c   :  { %7310 = vmatpush1.bf16.msra.mxu1 %v7309_v15  ;;  %v5966_v15 = vld [vmem:[%s11042_s6 + $0x24] ss:$0 sm:$0xff] }
 0xd6d   :  { %7312 = vmatprep.subr.bf16.mxu1 %v7311_v0  ;;  %v5976_v0 = vld [vmem:[%s11039_s3 + $0x118] sm:$0xff] }
 0xd70   :  { %7314 = vmatpush1.bf16.msra.mxu1 %v7313_v22  ;;  %v7351_v22 = vpack.c.bf16 %v5976_v0, %v5975_v49 }
 0xd71   :  { %7348 = vmatprep.subr.bf16.mxu1 %v9378_v56 }
 0xe36   :  { %v2631_v50 = vpop.f32.mrb[18].mxu1 }
 0xe37   :  { %v6757_v43 = vpop.f32.mrb[19].mxu1  ;;  %6775 = vmatmul.mubr.msk.f32.vlgmr.msra.gmra.mrb[16].mxu0 %vm288_vm0, %v2631_v50  ;;  %v7319_v50 = vpack.c.bf16 %v265_v41, %v264_v52  ;;  %v5980_v52 = vld [vmem:[%s11039_s3 + $0x138] sm:$0xff] }
 0xe38   :  { %v248_v43 = vld [vmem:[%s11041_s5 + $0x10] sm:$0xff]  ;;  %7318 = vmatpush3.bf16.msra.mxu0 %v7317_v9  ;;  %v7359_v41 = vpack.c.bf16 %v5980_v52, %v5979_v25  ;;  %v7711_v9 = vld [vmem:[%s11037_s1 + $0x8] sm:$0xff] }
 0xe39   :  { %7320 = vmatprep.subr.bf16.mxu0 %v7319_v50  ;;  %v258_v50 = vld [vmem:[%s11041_s5 + $0x60] sm:$0xff] }
 0xf0a   :  { %v6776_v5 = vpop.f32.mrb[16].mxu0 }
 0xf0b   :  { %v2711_v16 = vpop.f32.mrb[17].mxu0  ;;  %v2717_v18 = vadd.f32 %v6776_v5, %v5963_v47  ;;  %v266_v5 = vld [vmem:[%s11041_s5 + $0xa0] sm:$0xff] }
 0xf0c   :  { %v2712_v61 = vadd.f32 %v5963_v47, %v2711_v16  ;;  %v249_v47 = vld [vmem:[%s11041_s5 + $0x18] sm:$0xff]  ;;  %v267_v16 = vld [vmem:[%s11041_s5 + $0xa8] sm:$0xff] }
 0xf0d   :  { %v2721_v7 = vadd.f32 %v2717_v18, %v11186_v26  ;;  %v7321_v18 = vpack.c.bf16 %v249_v47, %v248_v43  ;;  %v268_v26 = vld [vmem:[%s11041_s5 + $0xb0] sm:$0xff]  ;;  %v259_v43 = vld [vmem:[%s11041_s5 + $0x68] sm:$0xff] }
 0xf0e   :  { %v2720_v19 = vadd.f32 %v2712_v61, %v11185_v13  ;;  %v7323_v61 = vpack.c.bf16 %v267_v16, %v266_v5  ;;  %v250_v13 = vld [vmem:[%s11041_s5 + $0x20] sm:$0xff]  ;;  %v7341_v47 = vpack.c.bf16 %v259_v43, %v258_v50  ;;  %v276_v5 = vld [vmem:[%s11041_s5 + $0xf0] sm:$0xff]  ;;  %v277_v16 = vld [vmem:[%s11041_s5 + $0xf8] sm:$0xff] }
 0xf0f   :  { %v2725_v1 = vsel %vm288_vm0, %v2721_v7, 0.0  ;;  %7322 = vmatpush3.bf16.msra.mxu0 %v7321_v18  ;;  %v7343_v18 = vpack.c.bf16 %v277_v16, %v276_v5 }
 0xf10   :  { %v2722_v58 = vsel %vm288_vm0, %v2720_v19, 0.0  ;;  %7324 = vmatprep.subr.bf16.mxu0 %v7323_v61  ;;  %v260_v61 = vld [vmem:[%s11041_s5 + $0x70] sm:$0xff] }
 0xf11   :  { %2723 = vadd.xlane.f32.xlu0 %v2722_v58 }
 0xf15   :  { %2726 = vadd.xlane.f32.xlu0 %v2725_v1 }
 0xf9e   :  { %v2724_v8 = vpop.xlane.xlu0 %2723 }
 0xf9f   :  { %v2728_v37 = vmul.f32 0.015625, %v2724_v8  ;;  %v252_v8 = vld [vmem:[%s11041_s5 + $0x30] sm:$0xff] }
 0xfa1   :  { %v9362_v20 = vsub.f32 %v2720_v19, %v2728_v37  ;;  %v251_v19 = vld [vmem:[%s11041_s5 + $0x28] sm:$0xff]  ;;  %v253_v37 = vld [vmem:[%s11041_s5 + $0x38] sm:$0xff] }
 0xfa2   :  { %v2727_v6 = vpop.xlane.xlu0 %2726  ;;  %v7325_v58 = vpack.c.bf16 %v251_v19, %v250_v13  ;;  %v261_v13 = vld [vmem:[%s11041_s5 + $0x78] sm:$0xff] }
 0xfa3   :  { %v2729_v54 = vmul.f32 0.015625, %v2727_v6  ;;  %v2732_v62 = vmul.f32 %v9362_v20, %v9362_v20  ;;  %v270_v6 = vld [vmem:[%s11041_s5 + $0xc0] sm:$0xff]  ;;  %v7345_v19 = vpack.c.bf16 %v261_v13, %v260_v61 }
 0xfa4   :  { %7326 = vmatpush3.bf16.msra.mxu0 %v7325_v58 }
 0xfa5   :  { %v9366_v10 = vsub.f32 %v2721_v7, %v2729_v54  ;;  %v2734_v12 = vsel %vm288_vm0, %v2732_v62, 0.0  ;;  %v269_v7 = vld [vmem:[%s11041_s5 + $0xb8] sm:$0xff]  ;;  %v271_v54 = vld [vmem:[%s11041_s5 + $0xc8] sm:$0xff]  ;;  %v7329_v62 = vpack.c.bf16 %v253_v37, %v252_v8 }
 0xfa6   :  { %2735 = vadd.xlane.f32.xlu0 %v2734_v12  ;;  %v7327_v1 = vpack.c.bf16 %v269_v7, %v268_v26  ;;  %v7331_v12 = vpack.c.bf16 %v271_v54, %v270_v6  ;;  %v11187_v26 = vlaneseq }
 0xfa7   :  { %v2733_v14 = vmul.f32 %v9366_v10, %v9366_v10 }
 0xfa8   :  { %7328 = vmatprep.subr.bf16.mxu0 %v7327_v1  ;;  %v9526_v7 = vshrl.u32 %v11187_v26, 7  ;;  %v287_v1 = vld [vmem:[%s11043_s7] ss:$4 sm:$0x3] }
 0xfa9   :  { %v2737_v34 = vsel %vm288_vm0, %v2733_v14, 0.0  ;;  %v254_v14 = vld [vmem:[%s11041_s5 + $0x40] sm:$0xff]  ;;  %7330 = vmatpush3.bf16.msra.mxu0 %v7329_v62 }
 0xfaa   :  { %2738 = vadd.xlane.f32.xlu1 %v2737_v34  ;;  %v255_v34 = vld [vmem:[%s11041_s5 + $0x48] sm:$0xff]  ;;  %7332 = vmatprep.subr.bf16.mxu0 %v7331_v12  ;;  %11188 = vst [vmem:[#allocation12_spill] sm:$0xff] %v9526_v7  ;;  %v9529_v58 = vsub.s32 0, %v9526_v7  ;;  %v11089_v8 = vsub.s32 1, %v9526_v7 }
 0xfab   :  { %v7333_v2 = vpack.c.bf16 %v255_v34, %v254_v14 }
 0xfac   :  { %11189 = vst [vmem:[#allocation11_spill] sm:$0xff] %v9529_v58  ;;  %v2764_v37 = vrot.slane %v287_v1, %v9529_v58  ;;  %v2768_v6 = vrot.slane %v287_v1, %v11089_v8 }
 0xfad   :  { %7334 = vmatpush3.bf16.msra.mxu0 %v7333_v2 }
 0xfae   :  { %7336 = vmatprep.subr.bf16.mxu0 %v7335_v29 }
 0xfb1   :  { %7338 = vmatpush3.bf16.msra.mxu0 %v7337_v53 }
 0xfb2   :  { %7340 = vmatprep.subr.bf16.mxu0 %v7339_v21 }
 0xfb5   :  { %7342 = vmatpush3.bf16.msra.mxu0 %v7341_v47 }
 0xfb6   :  { %7344 = vmatprep.subr.bf16.mxu0 %v7343_v18 }
 0xfb9   :  { %7346 = vmatpush3.bf16.msra.mxu0 %v7345_v19 }
 0xfba   :  { %7375 = vmatprep.subr.bf16.mxu0 %v11174_v45 }
0x1033   :  { %v2736_v51 = vpop.xlane.xlu0 %2735 }
0x1034   :  { %v2740_v36 = vmul.f32 0.015625, %v2736_v51 }
0x1036   :  { %v2742_v11 = vadd.f32 1e-05, %v2740_v36 }
0x1037   :  { %v2739_v27 = vpop.xlane.xlu1 %2738 }
0x1038   :  { %7656 = vrsqrt.f32 %v2742_v11  ;;  %v2741_v48 = vmul.f32 0.015625, %v2739_v27 }
0x103a   :  { %v2743_v24 = vadd.f32 1e-05, %v2741_v48 }
0x103c   :  { %7658 = vrsqrt.f32 %v2743_v24 }
0x1042   :  { %v7657_v40 = vpop.eup %7656 }
0x1043   :  { %v2746_v55 = vmul.f32 %v7657_v40, %v9362_v20  ;;  %v5977_v20 = vld [vmem:[%s11039_s3 + $0x120] sm:$0xff] }
0x1045   :  { %v2752_v44 = vmul.f32 %v5966_v15, %v2746_v55 }
0x1046   :  { %v7659_v57 = vpop.eup %7658 }
0x1047   :  { %v9472_v17 = vadd.f32 %v5967_v46, %v2752_v44  ;;  %v2747_v42 = vmul.f32 %v7659_v57, %v9366_v10  ;;  %v7355_v10 = vpack.c.bf16 %v5978_v32, %v5977_v20 }
0x1049   :  { %5968 = vmatmul.mubr.msk.f32.vlgmr.msra.gmra.mrb[20].mxu1 %vm288_vm0, %v9472_v17  ;;  %v2753_v4 = vmul.f32 %v5966_v15, %v2747_v42 }
0x104a   :  { %7350 = vmatpush3.bf16.msra.mxu1 %v9378_v56  ;;  %2847 = vmatprep.mubr.f32.mxu1 %v11135_v3  ;;  %v7710_v56 = vld [vmem:[%s11037_s1] sm:$0xff] }
0x104b   :  { %7352 = vmatprep.subr.bf16.mxu1 %v7351_v22  ;;  %v9485_v28 = vadd.f32 %v5967_v46, %v2753_v4 }
0x104d   :  { %5969 = vmatmul.mubr.msk.f32.gmra.mrb[22].mxu1 %vm288_vm0, %v9485_v28 }
0x104e   :  { %7354 = vmatpush3.bf16.msra.mxu1 %v7351_v22  ;;  %6793 = vmatprep.mubr.msk.f32.mxu1 %vm288_vm0, %v7710_v56 }
0x104f   :  { %7356 = vmatprep.subr.bf16.mxu1 %v7355_v10 }
0x1052   :  { %7358 = vmatpush3.bf16.msra.mxu1 %v7355_v10 }
0x1053   :  { %7360 = vmatprep.subr.bf16.mxu1 %v7359_v41 }
0x1056   :  { %7362 = vmatpush3.bf16.msra.mxu1 %v7359_v41 }
0x1057   :  { %7363 = vmatprep.subr.bf16.mxu1 %v11174_v45 }
0x1059   :  { %6794 = vmatmul.mubr.msk.f32.vlgmr.msra.gmra.mrb[24].mxu1 %vm288_vm0, %v7711_v9 }
0x105a   :  { %6812 = vmatprep.mubr.msk.f32.mxu1 %vm7790_vm5, %v11135_v3 }
0x111c   :  { %v2843_v54 = vpop.f32.mrb[20].mxu1 }
0x111d   :  { %v2844_v62 = vadd.f32 %v2843_v54, %v2764_v37  ;;  %v2845_v12 = vpop.f32.mrb[21].mxu1 }
0x111e   :  { %v2846_v14 = vadd.f32 %v2845_v12, %v2768_v6 }
0x111f   :  { %v2854_v23 = vmax.f32 %v2844_v62, 0.0 }
0x1120   :  { %v2855_v34 = vmax.f32 %v2846_v14, 0.0  ;;  %v2849_v31 = vpop.f32.mrb[22].mxu1  ;;  %v9704_v14 = vld [vmem:[%s11039_s3 + $0x200] sm:$0xff] }
0x1121   :  { %v2850_v2 = vadd.f32 %v2849_v31, %v2764_v37  ;;  %v2851_v29 = vpop.f32.mrb[23].mxu1  ;;  %v9710_v31 = vld [vmem:[%s11039_s3 + $0x208] sm:$0xff] }
0x1122   :  { %v2852_v35 = vadd.f32 %v2851_v29, %v2768_v6  ;;  %2926 = vmatprep.mubr.f32.mxu0 %v2855_v34 }
0x1123   :  { %2927 = vmatmul.mubr.f32.vlgmr.msra.gmra.mrb[18].mxu0 %v2854_v23  ;;  %v2856_v63 = vmax.f32 %v2850_v2, 0.0 }
0x1124   :  { %v2857_v59 = vmax.f32 %v2852_v35, 0.0  ;;  %7377 = vmatpush3.bf16.msra.mxu0 %v11181_v33 }
0x1125   :  { %7378 = vmatprep.subr.bf16.mxu0 %v11174_v45 }
0x1126   :  { %2931 = vmatprep.mubr.f32.mxu0 %v2857_v59 }
0x1127   :  { %2932 = vmatmul.mubr.f32.gmra.mrb[20].mxu0 %v2856_v63 }
0x1128   :  { %7380 = vmatpush3.bf16.msra.mxu0 %v11182_v39  ;;  %6831 = vmatprep.mubr.msk.f32.mxu0 %vm7790_vm5, %v11135_v3 }
0x1129   :  { %7381 = vmatprep.subr.bf16.mxu0 %v11174_v45 }
0x112c   :  { %v9544_v38 = vpop.f32.mrb[24].mxu1  ;;  %7383 = vmatpush3.bf16.msra.mxu0 %v11183_v30 }
0x112d   :  { %11190 = vst [vmem:[#allocation14_spill] sm:$0xff] %v9544_v38  ;;  %v9547_v53 = vpop.f32.mrb[25].mxu1  ;;  %7384 = vmatprep.subr.bf16.mxu0 %v11174_v45 }
0x112e   :  { %3149 = vxpose.xlu0.b32.start.end [1/1] (short) (narrow) %v9547_v53, 64 }
0x1130   :  { %7386 = vmatpush3.bf16.msra.mxu0 %v11184_v60 }
0x1131   :  { %7399 = vmatprep.subr.bf16.mxu0 %v11174_v45 }
0x11ae   :  { %v9553_v21 = vpop.trf.xlu0 }
0x11af   :  { %3189 = vrot.lane.b32.xlu1 %v9553_v21, %s7783_s0 }
0x11b2   :  { %v9557_v51 = vpop.trf.xlu0 }
0x11b3   :  { %3213 = vrot.lane.b32.xlu1 %v9553_v21, %s7780_s16 }
0x11b6   :  { %v9561_v36 = vpop.trf.xlu0 }
0x11b7   :  { %3237 = vrot.lane.b32.xlu1 %v9553_v21, %s7784_s25  ;;  %3193 = vrot.lane.b32.xlu0 %v9561_v36, %s7783_s0 }
0x11ba   :  { %v9567_v11 = vpop.trf.xlu0 }
0x11bb   :  { %3261 = vrot.lane.b32.xlu1 %v9553_v21, %s7786_s4  ;;  %3315 = vrot.lane.b32.xlu0 %v9567_v11, %s7788_s28 }
0x11be   :  { %v9573_v27 = vpop.trf.xlu0 }
0x11bf   :  { %3285 = vrot.lane.b32.xlu1 %v9553_v21, %s7787_s27  ;;  %3339 = vrot.lane.b32.xlu0 %v9567_v11, %s7785_s26 }
0x11c2   :  { %v9579_v48 = vpop.trf.xlu0 }
0x11c3   :  { %3309 = vrot.lane.b32.xlu1 %v9553_v21, %s7788_s28  ;;  %3223 = vrot.lane.b32.xlu0 %v9579_v48, %s7780_s16 }
0x11c6   :  { %v9597_v24 = vpop.trf.xlu0 }
0x11c7   :  { %3333 = vrot.lane.b32.xlu1 %v9553_v21, %s7785_s26  ;;  %3247 = vrot.lane.b32.xlu0 %v9579_v48, %s7784_s25 }
0x11ca   :  { %v9607_v40 = vpop.trf.xlu0 }
0x11cb   :  { %3191 = vrot.lane.b32.xlu1 %v9557_v51, %s7783_s0  ;;  %3271 = vrot.lane.b32.xlu0 %v9579_v48, %s7786_s4 }
0x11cf   :  { %3215 = vrot.lane.b32.xlu1 %v9557_v51, %s7780_s16  ;;  %3295 = vrot.lane.b32.xlu0 %v9579_v48, %s7787_s27 }
0x11d3   :  { %3239 = vrot.lane.b32.xlu1 %v9557_v51, %s7784_s25  ;;  %3319 = vrot.lane.b32.xlu0 %v9579_v48, %s7788_s28 }
0x11d7   :  { %3263 = vrot.lane.b32.xlu1 %v9557_v51, %s7786_s4  ;;  %3343 = vrot.lane.b32.xlu0 %v9579_v48, %s7785_s26 }
0x11db   :  { %3287 = vrot.lane.b32.xlu1 %v9557_v51, %s7787_s27  ;;  %3203 = vrot.lane.b32.xlu0 %v9607_v40, %s7783_s0 }
0x11df   :  { %3311 = vrot.lane.b32.xlu1 %v9557_v51, %s7788_s28  ;;  %3227 = vrot.lane.b32.xlu0 %v9607_v40, %s7780_s16 }
0x11e3   :  { %3335 = vrot.lane.b32.xlu1 %v9557_v51, %s7785_s26  ;;  %3251 = vrot.lane.b32.xlu0 %v9607_v40, %s7784_s25 }
0x11e7   :  { %3217 = vrot.lane.b32.xlu1 %v9561_v36, %s7780_s16  ;;  %3275 = vrot.lane.b32.xlu0 %v9607_v40, %s7786_s4 }
0x11eb   :  { %3241 = vrot.lane.b32.xlu1 %v9561_v36, %s7784_s25  ;;  %3299 = vrot.lane.b32.xlu0 %v9607_v40, %s7787_s27 }
0x11ef   :  { %3265 = vrot.lane.b32.xlu1 %v9561_v36, %s7786_s4  ;;  %3323 = vrot.lane.b32.xlu0 %v9607_v40, %s7788_s28 }
0x11f3   :  { %3289 = vrot.lane.b32.xlu1 %v9561_v36, %s7787_s27  ;;  %3347 = vrot.lane.b32.xlu0 %v9607_v40, %s7785_s26 }
0x11f6   :  { %v6264_v15 = vpop.f32.mrb[18].mxu0 }
0x11f7   :  { %3313 = vrot.lane.b32.xlu1 %v9561_v36, %s7788_s28  ;;  %v6265_v55 = vpop.f32.mrb[19].mxu0 }
0x11f8   :  { %v9639_v46 = vadd.f32 %v6265_v55, %v6264_v15 }
0x11fa   :  { %v6267_v49 = vpop.f32.mrb[20].mxu0 }
0x11fb   :  { %3337 = vrot.lane.b32.xlu1 %v9561_v36, %s7785_s26  ;;  %v6268_v0 = vpop.f32.mrb[21].mxu0 }
0x11fc   :  { %v9643_v44 = vadd.f32 %v6268_v0, %v6267_v49 }
0x11ff   :  { %3195 = vrot.lane.b32.xlu1 %v9567_v11, %s7783_s0 }
0x1203   :  { %3219 = vrot.lane.b32.xlu1 %v9567_v11, %s7780_s16 }
0x1207   :  { %3243 = vrot.lane.b32.xlu1 %v9567_v11, %s7784_s25 }
0x120b   :  { %3267 = vrot.lane.b32.xlu1 %v9567_v11, %s7786_s4 }
0x120f   :  { %3291 = vrot.lane.b32.xlu1 %v9567_v11, %s7787_s27 }
0x1213   :  { %3197 = vrot.lane.b32.xlu1 %v9573_v27, %s7783_s0 }
0x1217   :  { %3221 = vrot.lane.b32.xlu1 %v9573_v27, %s7780_s16 }
0x121b   :  { %3245 = vrot.lane.b32.xlu1 %v9573_v27, %s7784_s25 }
0x121f   :  { %3269 = vrot.lane.b32.xlu1 %v9573_v27, %s7786_s4 }
0x1221   :  { %v3190_v57 = vpop.permute.xlu1 %3189 }
0x1222   :  { %v3357_v50 = vsel %vm80_vm6, %v9553_v21, %v3190_v57 }
0x1223   :  { %3293 = vrot.lane.b32.xlu1 %v9573_v27, %s7787_s27 }
0x1225   :  { %v3214_v22 = vpop.permute.xlu1 %3213 }
0x1226   :  { %v3365_v43 = vsel %vm82_vm1, %v3357_v50, %v3214_v22 }
0x1227   :  { %3317 = vrot.lane.b32.xlu1 %v9573_v27, %s7788_s28 }
0x1229   :  { %v3238_v42 = vpop.permute.xlu1 %3237  ;;  %v3194_v59 = vpop.permute.xlu0 %3193 }
0x122a   :  { %v3373_v47 = vsel %vm84_vm7, %v3365_v43, %v3238_v42 }
0x122b   :  { %3341 = vrot.lane.b32.xlu1 %v9573_v27, %s7785_s26 }
0x122d   :  { %v3262_v20 = vpop.permute.xlu1 %3261  ;;  %v3316_v21 = vpop.permute.xlu0 %3315 }
0x122e   :  { %v3381_v16 = vsel %vm86_vm8, %v3373_v47, %v3262_v20 }
0x122f   :  { %3199 = vrot.lane.b32.xlu1 %v9579_v48, %s7783_s0 }
0x1231   :  { %v3286_v32 = vpop.permute.xlu1 %3285  ;;  %v3340_v55 = vpop.permute.xlu0 %3339 }
0x1232   :  { %v3389_v13 = vsel %vm88_vm9, %v3381_v16, %v3286_v32  ;;  %v3359_v32 = vsel %vm80_vm6, %v9561_v36, %v3194_v59 }
0x1233   :  { %3201 = vrot.lane.b32.xlu1 %v9597_v24, %s7783_s0 }
0x1235   :  { %v3310_v4 = vpop.permute.xlu1 %3309  ;;  %v3224_v0 = vpop.permute.xlu0 %3223 }
0x1236   :  { %v3397_v26 = vsel %vm90_vm10, %v3389_v13, %v3310_v4 }
0x1237   :  { %3225 = vrot.lane.b32.xlu1 %v9597_v24, %s7780_s16 }
0x1239   :  { %v3334_v10 = vpop.permute.xlu1 %3333  ;;  %v3248_v42 = vpop.permute.xlu0 %3247 }
0x123a   :  { %v3405_v37 = vsel %vm92_vm11, %v3397_v26, %v3334_v10 }
0x123b   :  { %3249 = vrot.lane.b32.xlu1 %v9597_v24, %s7784_s25  ;;  %v3413_v34 = vmul.f32 %v9704_v14, %v3405_v37 }
0x123d   :  { %v3192_v25 = vpop.permute.xlu1 %3191  ;;  %v3272_v4 = vpop.permute.xlu0 %3271 }
0x123e   :  { %v3358_v5 = vsel %vm80_vm6, %v9557_v51, %v3192_v25 }
0x123f   :  { %3273 = vrot.lane.b32.xlu1 %v9597_v24, %s7786_s4 }
0x1241   :  { %v3216_v52 = vpop.permute.xlu1 %3215 }
0x1242   :  { %v3366_v18 = vsel %vm82_vm1, %v3358_v5, %v3216_v52 }
0x1243   :  { %3297 = vrot.lane.b32.xlu1 %v9597_v24, %s7787_s27 }
0x1245   :  { %v3240_v56 = vpop.permute.xlu1 %3239 }
0x1246   :  { %v3374_v19 = vsel %vm84_vm7, %v3366_v18, %v3240_v56 }
0x1247   :  { %3321 = vrot.lane.b32.xlu1 %v9597_v24, %s7788_s28 }
0x1249   :  { %v3264_v41 = vpop.permute.xlu1 %3263 }
0x124a   :  { %v3382_v1 = vsel %vm86_vm8, %v3374_v19, %v3264_v41  ;;  %v9734_v19 = vld [vmem:[%s11039_s3 + $0x210] sm:$0xff] }
0x124b   :  { %3345 = vrot.lane.b32.xlu1 %v9597_v24, %s7785_s26 }
0x124d   :  { %v3288_v9 = vpop.permute.xlu1 %3287 }
0x124e   :  { %v3390_v6 = vsel %vm88_vm9, %v3382_v1, %v3288_v9  ;;  %v9740_v1 = vld [vmem:[%s11039_s3 + $0x218] sm:$0xff] }
0x1251   :  { %v3312_v61 = vpop.permute.xlu1 %3311 }
0x1252   :  { %v3398_v54 = vsel %vm90_vm10, %v3390_v6, %v3312_v61  ;;  %v3296_v61 = vpop.permute.xlu0 %3295 }
0x1255   :  { %v3336_v62 = vpop.permute.xlu1 %3335 }
0x1256   :  { %v3406_v12 = vsel %vm92_vm11, %v3398_v54, %v3336_v62  ;;  %v3320_v62 = vpop.permute.xlu0 %3319 }
0x1257   :  { %v3414_v23 = vmul.f32 %v9710_v31, %v3406_v12 }
0x1259   :  { %v7364_v2 = vpack.c.bf16 %v3414_v23, %v3413_v34  ;;  %v3218_v29 = vpop.permute.xlu1 %3217 }
0x125a   :  { %v3367_v10 = vsel %vm82_vm1, %v3359_v32, %v3218_v29  ;;  %v3344_v23 = vpop.permute.xlu0 %3343 }
0x125b   :  { %7365 = vmatpush3.bf16.msra.mxu1 %v7364_v2 }
0x125c   :  { %7366 = vmatprep.subr.bf16.mxu1 %v11174_v45 }
0x125d   :  { %v3242_v35 = vpop.permute.xlu1 %3241 }
0x125e   :  { %v3375_v52 = vsel %vm84_vm7, %v3367_v10, %v3242_v35  ;;  %v3204_v29 = vpop.permute.xlu0 %3203 }
0x1261   :  { %v3266_v63 = vpop.permute.xlu1 %3265 }
0x1262   :  { %v3383_v41 = vsel %vm86_vm8, %v3375_v52, %v3266_v63  ;;  %v3228_v63 = vpop.permute.xlu0 %3227 }
0x1265   :  { %v3290_v51 = vpop.permute.xlu1 %3289 }
0x1266   :  { %v3391_v50 = vsel %vm88_vm9, %v3383_v41, %v3290_v51 }
0x1269   :  { %v3314_v15 = vpop.permute.xlu1 %3313 }
0x126a   :  { %v3399_v47 = vsel %vm90_vm10, %v3391_v50, %v3314_v15  ;;  %v3252_v15 = vpop.permute.xlu0 %3251 }
0x126d   :  { %v3338_v49 = vpop.permute.xlu1 %3337 }
0x126e   :  { %v3407_v16 = vsel %vm92_vm11, %v3399_v47, %v3338_v49  ;;  %v3276_v50 = vpop.permute.xlu0 %3275 }
0x126f   :  { %v3415_v26 = vmul.f32 %v9734_v19, %v3407_v16 }
0x1271   :  { %v3196_v57 = vpop.permute.xlu1 %3195 }
0x1272   :  { %v3360_v56 = vsel %vm80_vm6, %v9567_v11, %v3196_v57  ;;  %v3300_v16 = vpop.permute.xlu0 %3299 }
0x1274   :  { %3657 = vxpose.xlu1.b32.start.end [1/1] (short) (narrow) %v9544_v38, 64 }
0x1275   :  { %v3220_v22 = vpop.permute.xlu1 %3219 }
0x1276   :  { %v3368_v9 = vsel %vm82_vm1, %v3360_v56, %v3220_v22 }
0x1279   :  { %v3244_v20 = vpop.permute.xlu1 %3243 }
0x127a   :  { %v3376_v43 = vsel %vm84_vm7, %v3368_v9, %v3244_v20 }
0x127d   :  { %v3268_v25 = vpop.permute.xlu1 %3267 }
0x127e   :  { %v3384_v36 = vsel %vm86_vm8, %v3376_v43, %v3268_v25 }
0x1281   :  { %v3292_v5 = vpop.permute.xlu1 %3291 }
0x1282   :  { %v3392_v18 = vsel %vm88_vm9, %v3384_v36, %v3292_v5 }
0x1283   :  { %v3400_v11 = vsel %vm90_vm10, %v3392_v18, %v3316_v21 }
0x1284   :  { %v3408_v13 = vsel %vm92_vm11, %v3400_v11, %v3340_v55  ;;  %v3324_v11 = vpop.permute.xlu0 %3323 }
0x1285   :  { %v3416_v37 = vmul.f32 %v9740_v1, %v3408_v13  ;;  %v3198_v6 = vpop.permute.xlu1 %3197 }
0x1286   :  { %v3361_v51 = vsel %vm80_vm6, %v9573_v27, %v3198_v6 }
0x1287   :  { %v7367_v54 = vpack.c.bf16 %v3416_v37, %v3415_v26  ;;  %v3364_v26 = vsel %vm80_vm6, %v9607_v40, %v3204_v29 }
0x1288   :  { %v3372_v37 = vsel %vm82_vm1, %v3364_v26, %v3228_v63 }
0x1289   :  { %v3222_v12 = vpop.permute.xlu1 %3221  ;;  %7368 = vmatpush3.bf16.msra.mxu1 %v7367_v54  ;;  %v3380_v6 = vsel %vm84_vm7, %v3372_v37, %v3252_v15  ;;  %v9792_v15 = vld [vmem:[%s11039_s3 + $0x238] sm:$0xff] }
0x128a   :  { %7369 = vmatprep.subr.bf16.mxu1 %v11174_v45  ;;  %v3369_v55 = vsel %vm82_vm1, %v3361_v51, %v3222_v12  ;;  %v3348_v12 = vpop.permute.xlu0 %3347  ;;  %11193 = vst [vmem:[#allocation8_spill] sm:$0xff] %v9792_v15 }
0x128d   :  { %v3246_v34 = vpop.permute.xlu1 %3245 }
0x128e   :  { %v3377_v57 = vsel %vm84_vm7, %v3369_v55, %v3246_v34 }
0x1291   :  { %v3270_v2 = vpop.permute.xlu1 %3269 }
0x1292   :  { %v3385_v20 = vsel %vm86_vm8, %v3377_v57, %v3270_v2 }
0x1295   :  { %v3294_v35 = vpop.permute.xlu1 %3293 }
0x1296   :  { %v3393_v10 = vsel %vm88_vm9, %v3385_v20, %v3294_v35  ;;  %v3576_v20 = vmul.f32 %v9704_v14, %v9547_v53 }
0x1299   :  { %v3318_v59 = vpop.permute.xlu1 %3317 }
0x129a   :  { %v3401_v52 = vsel %vm90_vm10, %v3393_v10, %v3318_v59 }
0x129d   :  { %v3342_v21 = vpop.permute.xlu1 %3341 }
0x129e   :  { %v3409_v41 = vsel %vm92_vm11, %v3401_v52, %v3342_v21  ;;  %v3579_v52 = vmul.f32 %v9740_v1, %v9547_v53 }
0x12a1   :  { %v3200_v49 = vpop.permute.xlu1 %3199 }
0x12a2   :  { %v3362_v22 = vsel %vm80_vm6, %v9579_v48, %v3200_v49  ;;  %v9798_v49 = vld [vmem:[%s11039_s3 + $0x230] sm:$0xff] }
0x12a3   :  { %v3370_v32 = vsel %vm82_vm1, %v3362_v22, %v3224_v0  ;;  %v9763_v0 = vld [vmem:[%s11039_s3 + $0x220] sm:$0xff]  ;;  %11194 = vst [vmem:[#allocation28_spill] sm:$0xff] %v9798_v49 }
0x12a4   :  { %v3378_v25 = vsel %vm84_vm7, %v3370_v32, %v3248_v42  ;;  %11191 = vst [vmem:[#allocation13_spill] sm:$0xff] %v9763_v0  ;;  %v3417_v42 = vmul.f32 %v9763_v0, %v3409_v41  ;;  %v3577_v32 = vmul.f32 %v9710_v31, %v9547_v53 }
0x12a5   :  { %v3386_v27 = vsel %vm86_vm8, %v3378_v25, %v3272_v4  ;;  %v3202_v56 = vpop.permute.xlu1 %3201  ;;  %v9769_v4 = vld [vmem:[%s11039_s3 + $0x228] sm:$0xff]  ;;  %v3578_v25 = vmul.f32 %v9734_v19, %v9547_v53 }
0x12a6   :  { %v3394_v9 = vsel %vm88_vm9, %v3386_v27, %v3296_v61  ;;  %11192 = vst [vmem:[#allocation21_spill] sm:$0xff] %v9769_v4  ;;  %v3363_v54 = vsel %vm80_vm6, %v9597_v24, %v3202_v56  ;;  %v7388_v10 = vpack.c.bf16 %v3577_v32, %v3576_v20  ;;  %v3580_v56 = vmul.f32 %v9763_v0, %v9547_v53 }
0x12a7   :  { %v3402_v48 = vsel %vm90_vm10, %v3394_v9, %v3320_v62  ;;  %v3388_v62 = vsel %vm86_vm8, %v3380_v6, %v3276_v50  ;;  %v7391_v27 = vpack.c.bf16 %v3579_v52, %v3578_v25  ;;  %v3581_v41 = vmul.f32 %v9769_v4, %v9547_v53  ;;  %v5970_v25 = vld [vmem:[%s11042_s6 + $0x26] ss:$0 sm:$0xff] }
0x12a8   :  { %v3410_v43 = vsel %vm92_vm11, %v3402_v48, %v3344_v23  ;;  %v3396_v2 = vsel %vm88_vm9, %v3388_v62, %v3300_v16  ;;  %v3582_v50 = vmul.f32 %v9798_v49, %v9547_v53  ;;  %v3583_v48 = vmul.f32 %v9792_v15, %v9547_v53 }
0x12a9   :  { %v3226_v47 = vpop.permute.xlu1 %3225  ;;  %v3418_v36 = vmul.f32 %v9769_v4, %v3410_v43  ;;  %v3404_v59 = vsel %vm90_vm10, %v3396_v2, %v3324_v11  ;;  %v7394_v9 = vpack.c.bf16 %v3581_v41, %v3580_v56  ;;  %v2929_v52 = vadd.f32 %v9639_v46, %v5970_v25 }
0x12aa   :  { %v3371_v34 = vsel %vm82_vm1, %v3363_v54, %v3226_v47  ;;  %v3412_v29 = vsel %vm92_vm11, %v3404_v59, %v3348_v12  ;;  %v7397_v43 = vpack.c.bf16 %v3583_v48, %v3582_v50  ;;  %v2934_v41 = vadd.f32 %v9643_v44, %v5970_v25 }
0x12ab   :  { %v7370_v5 = vpack.c.bf16 %v3418_v36, %v3417_v42  ;;  %v3420_v55 = vmul.f32 %v9792_v15, %v3412_v29 }
0x12ad   :  { %v3250_v18 = vpop.permute.xlu1 %3249  ;;  %7371 = vmatpush3.bf16.msra.mxu1 %v7370_v5 }
0x12ae   :  { %7372 = vmatprep.subr.bf16.mxu1 %v11174_v45  ;;  %v3379_v35 = vsel %vm84_vm7, %v3371_v34, %v3250_v18  ;;  %v11196_v34 = vld [vmem:[#allocation17_spill] sm:$0xff] }
0x12b1   :  { %v3274_v61 = vpop.permute.xlu1 %3273 }
0x12b2   :  { %v3387_v40 = vsel %vm86_vm8, %v3379_v35, %v3274_v61 }
0x12b5   :  { %v3298_v13 = vpop.permute.xlu1 %3297 }
0x12b6   :  { %v3395_v63 = vsel %vm88_vm9, %v3387_v40, %v3298_v13 }
0x12b9   :  { %v3322_v23 = vpop.permute.xlu1 %3321 }
0x12ba   :  { %v3403_v24 = vsel %vm90_vm10, %v3395_v63, %v3322_v23 }
0x12bd   :  { %v3346_v21 = vpop.permute.xlu1 %3345 }
0x12be   :  { %v3411_v51 = vsel %vm92_vm11, %v3403_v24, %v3346_v21 }
0x12bf   :  { %v3419_v57 = vmul.f32 %v9798_v49, %v3411_v51 }
0x12c1   :  { %v7373_v22 = vpack.c.bf16 %v3420_v55, %v3419_v57 }
0x12c3   :  { %7374 = vmatpush3.bf16.msra.mxu1 %v7373_v22 }
0x12c4   :  { %7387 = vmatprep.subr.bf16.mxu1 %v11174_v45 }
0x12c6   :  { %6813 = vmatmul.mubr.msk.f32.vlgmr.msra.gmra.mrb[26].mxu1 %vm288_vm0, %v9547_v53 }
0x12c7   :  { %7389 = vmatpush3.bf16.msra.mxu1 %v7388_v10  ;;  %6850 = vmatprep.mubr.msk.f32.mxu1 %vm7790_vm5, %v11135_v3 }
0x12c8   :  { %7390 = vmatprep.subr.bf16.mxu1 %v11174_v45 }
0x12cb   :  { %7392 = vmatpush3.bf16.msra.mxu1 %v7391_v27 }
0x12cc   :  { %7393 = vmatprep.subr.bf16.mxu1 %v11174_v45 }
0x12cf   :  { %7395 = vmatpush3.bf16.msra.mxu1 %v7394_v9  ;;  %v9999_v9 = vadd.f32 %v2929_v52, %v9472_v17 }
0x12d0   :  { %7396 = vmatprep.subr.bf16.mxu1 %v11174_v45 }
0x12d1   :  { %11197 = vst [vmem:[#allocation22_spill] sm:$0xff] %v9999_v9 }
0x12d3   :  { %7398 = vmatpush3.bf16.msra.mxu1 %v7397_v43  ;;  %v2939_v43 = vsel %vm288_vm0, %v9999_v9, 0.0 }
0x12d4   :  { %7411 = vmatprep.subr.bf16.mxu1 %v11174_v45 }
0x12f4   :  { %v9826_v42 = vpop.trf.xlu1 }
0x12f5   :  { %3697 = vrot.lane.b32.xlu0 %v9826_v42, %s7783_s0 }
0x12f8   :  { %v9830_v47 = vpop.trf.xlu1 }
0x12f9   :  { %3699 = vrot.lane.b32.xlu1 %v9830_v47, %s7783_s0  ;;  %3721 = vrot.lane.b32.xlu0 %v9826_v42, %s7780_s16 }
0x12fc   :  { %v9840_v53 = vpop.trf.xlu1 }
0x12fd   :  { %3817 = vrot.lane.b32.xlu1 %v9826_v42, %s7788_s28  ;;  %3723 = vrot.lane.b32.xlu0 %v9830_v47, %s7780_s16 }
0x1300   :  { %v9846_v36 = vpop.trf.xlu1 }
0x1301   :  { %3749 = vrot.lane.b32.xlu1 %v9840_v53, %s7784_s25  ;;  %3745 = vrot.lane.b32.xlu0 %v9826_v42, %s7784_s25 }
0x1304   :  { %v9856_v5 = vpop.trf.xlu1 }
0x1305   :  { %3841 = vrot.lane.b32.xlu1 %v9826_v42, %s7785_s26  ;;  %3747 = vrot.lane.b32.xlu0 %v9830_v47, %s7784_s25 }
0x1308   :  { %v9878_v16 = vpop.trf.xlu1 }
0x1309   :  { %3773 = vrot.lane.b32.xlu1 %v9840_v53, %s7786_s4  ;;  %3769 = vrot.lane.b32.xlu0 %v9826_v42, %s7786_s4 }
0x130c   :  { %v9888_v18 = vpop.trf.xlu1 }
0x130d   :  { %3705 = vrot.lane.b32.xlu1 %v9856_v5, %s7783_s0  ;;  %3771 = vrot.lane.b32.xlu0 %v9830_v47, %s7786_s4  ;;  %11195 = vst [vmem:[#allocation10_spill] sm:$0xff] %v9888_v18 }
0x1310   :  { %v9932_v61 = vpop.trf.xlu1 }
0x1311   :  { %3797 = vrot.lane.b32.xlu1 %v9840_v53, %s7787_s27  ;;  %3701 = vrot.lane.b32.xlu0 %v9840_v53, %s7783_s0 }
0x1315   :  { %3729 = vrot.lane.b32.xlu1 %v9856_v5, %s7780_s16  ;;  %3703 = vrot.lane.b32.xlu0 %v9846_v36, %s7783_s0 }
0x1319   :  { %3821 = vrot.lane.b32.xlu1 %v9840_v53, %s7788_s28  ;;  %3793 = vrot.lane.b32.xlu0 %v9826_v42, %s7787_s27 }
0x131d   :  { %3753 = vrot.lane.b32.xlu1 %v9856_v5, %s7784_s25  ;;  %3795 = vrot.lane.b32.xlu0 %v9830_v47, %s7787_s27 }
0x1321   :  { %3845 = vrot.lane.b32.xlu1 %v9840_v53, %s7785_s26  ;;  %3725 = vrot.lane.b32.xlu0 %v9840_v53, %s7780_s16 }
0x1325   :  { %3777 = vrot.lane.b32.xlu1 %v9856_v5, %s7786_s4  ;;  %3727 = vrot.lane.b32.xlu0 %v9846_v36, %s7780_s16 }
0x1329   :  { %3709 = vrot.lane.b32.xlu1 %v9888_v18, %s7783_s0  ;;  %3819 = vrot.lane.b32.xlu0 %v9830_v47, %s7788_s28 }
0x132d   :  { %3801 = vrot.lane.b32.xlu1 %v9856_v5, %s7787_s27  ;;  %3751 = vrot.lane.b32.xlu0 %v9846_v36, %s7784_s25 }
0x1331   :  { %3733 = vrot.lane.b32.xlu1 %v9888_v18, %s7780_s16  ;;  %3843 = vrot.lane.b32.xlu0 %v9830_v47, %s7785_s26 }
0x1335   :  { %3825 = vrot.lane.b32.xlu1 %v9856_v5, %s7788_s28  ;;  %3775 = vrot.lane.b32.xlu0 %v9846_v36, %s7786_s4 }
0x1339   :  { %3757 = vrot.lane.b32.xlu1 %v9888_v18, %s7784_s25  ;;  %3707 = vrot.lane.b32.xlu0 %v9878_v16, %s7783_s0 }
0x133d   :  { %3849 = vrot.lane.b32.xlu1 %v9856_v5, %s7785_s26  ;;  %3799 = vrot.lane.b32.xlu0 %v9846_v36, %s7787_s27 }
0x1341   :  { %3781 = vrot.lane.b32.xlu1 %v9888_v18, %s7786_s4  ;;  %3731 = vrot.lane.b32.xlu0 %v9878_v16, %s7780_s16 }
0x1345   :  { %3805 = vrot.lane.b32.xlu1 %v9888_v18, %s7787_s27  ;;  %3823 = vrot.lane.b32.xlu0 %v9846_v36, %s7788_s28 }
0x1349   :  { %3829 = vrot.lane.b32.xlu1 %v9888_v18, %s7788_s28  ;;  %3755 = vrot.lane.b32.xlu0 %v9878_v16, %s7784_s25 }
0x134d   :  { %3853 = vrot.lane.b32.xlu1 %v9888_v18, %s7785_s26  ;;  %3847 = vrot.lane.b32.xlu0 %v9846_v36, %s7785_s26 }
0x1351   :  { %3779 = vrot.lane.b32.xlu0 %v9878_v16, %s7786_s4 }
0x1355   :  { %3711 = vrot.lane.b32.xlu0 %v9932_v61, %s7783_s0 }
0x1359   :  { %3803 = vrot.lane.b32.xlu0 %v9878_v16, %s7787_s27 }
0x135d   :  { %3735 = vrot.lane.b32.xlu0 %v9932_v61, %s7780_s16 }
0x1361   :  { %3827 = vrot.lane.b32.xlu0 %v9878_v16, %s7788_s28 }
0x1365   :  { %3759 = vrot.lane.b32.xlu0 %v9932_v61, %s7784_s25 }
0x1367   :  { %v9948_v11 = vpop.permute.xlu0 %3697 }
0x1369   :  { %3851 = vrot.lane.b32.xlu0 %v9878_v16, %s7785_s26 }
0x136b   :  { %v9950_v13 = vpop.permute.xlu0 %3721  ;;  %v3700_v55 = vpop.permute.xlu1 %3699 }
0x136d   :  { %3783 = vrot.lane.b32.xlu0 %v9932_v61, %s7786_s4 }
0x136f   :  { %v9952_v26 = vpop.permute.xlu0 %3723  ;;  %v9983_v22 = vpop.permute.xlu1 %3817 }
0x1373   :  { %v9954_v37 = vpop.permute.xlu0 %3745  ;;  %v3750_v32 = vpop.permute.xlu1 %3749 }
0x1377   :  { %v9956_v6 = vpop.permute.xlu0 %3747  ;;  %v9993_v27 = vpop.permute.xlu1 %3841 }
0x137b   :  { %v9958_v54 = vpop.permute.xlu0 %3769  ;;  %v3774_v50 = vpop.permute.xlu1 %3773 }
0x137f   :  { %v9960_v62 = vpop.permute.xlu0 %3771  ;;  %v3706_v46 = vpop.permute.xlu1 %3705 }
0x1383   :  { %v3702_v59 = vpop.permute.xlu0 %3701  ;;  %v3798_v44 = vpop.permute.xlu1 %3797 }
0x1384   :  { %v3867_v0 = vsel %vm80_vm6, %v9840_v53, %v3702_v59  ;;  %v3866_v53 = vsel %vm80_vm6, %v9830_v47, %v3700_v55 }
0x1385   :  { %v3874_v59 = vsel %vm82_vm1, %v3866_v53, %v9952_v26 }
0x1387   :  { %v9967_v29 = vpop.permute.xlu0 %3703  ;;  %v3730_v17 = vpop.permute.xlu1 %3729 }
0x1388   :  { %v3868_v26 = vsel %vm80_vm6, %v9846_v36, %v9967_v29 }
0x138b   :  { %v9969_v63 = vpop.permute.xlu0 %3793  ;;  %v3822_v52 = vpop.permute.xlu1 %3821 }
0x138f   :  { %v9971_v24 = vpop.permute.xlu0 %3795  ;;  %v3754_v7 = vpop.permute.xlu1 %3753 }
0x1393   :  { %v3726_v21 = vpop.permute.xlu0 %3725  ;;  %v3846_v60 = vpop.permute.xlu1 %3845 }
0x1394   :  { %v3875_v45 = vsel %vm82_vm1, %v3867_v0, %v3726_v21 }
0x1397   :  { %v9977_v51 = vpop.permute.xlu0 %3727  ;;  %v3778_v39 = vpop.permute.xlu1 %3777 }
0x1399   :  { %v3490_v12 = vpop.f32.mrb[26].mxu1 }
0x139a   :  { %v3491_v23 = vadd.f32 %v3490_v12, %v11196_v34  ;;  %v6814_v2 = vpop.f32.mrb[27].mxu1  ;;  %v10006_v12 = vadd.f32 %v2934_v41, %v9485_v28 }
0x139b   :  { %v9981_v57 = vpop.permute.xlu0 %3819  ;;  %v10010_v41 = vpop.permute.xlu1 %3709 }
0x139c   :  { %v9963_v35 = vmul.f32 0.35355338, %v3491_v23  ;;  %11198 = vst [vmem:[#allocation27_spill] sm:$0xff] %v10006_v12  ;;  %v2942_v23 = vsel %vm288_vm0, %v10006_v12, 0.0 }
0x139e   :  { %v3495_v40 = vsel %vm288_vm0, %v9963_v35, -inf }
0x139f   :  { %3496 = vmax.xlane.f32.xlu0 %v3495_v40  ;;  %v9985_v20 = vpop.permute.xlu0 %3751  ;;  %v10012_v34 = vpop.permute.xlu1 %3801 }
0x13a0   :  { %11199 = vst [vmem:[#allocation24_spill] sm:$0xff] %v10012_v34  ;;  %v3883_v34 = vsel %vm84_vm7, %v3875_v45, %v3750_v32 }
0x13a1   :  { %v3891_v45 = vsel %vm86_vm8, %v3883_v34, %v3774_v50 }
0x13a3   :  { %v9987_v10 = vpop.permute.xlu0 %3843 }
0x13a7   :  { %v9995_v56 = vpop.permute.xlu0 %3775 }
0x13ab   :  { %v10001_v48 = vpop.permute.xlu0 %3707 }
0x13ac   :  { %v3870_v55 = vsel %vm80_vm6, %v9878_v16, %v10001_v48 }
0x13af   :  { %v3800_v2 = vpop.permute.xlu0 %3799 }
0x13b3   :  { %v3732_v40 = vpop.permute.xlu0 %3731 }
0x13b5   :  { %3807 = vrot.lane.b32.xlu0 %v9932_v61, %s7787_s27 }
0x13b7   :  { %v3824_v25 = vpop.permute.xlu0 %3823 }
0x13b9   :  { %3831 = vrot.lane.b32.xlu0 %v9932_v61, %s7788_s28 }
0x13bb   :  { %v3756_v8 = vpop.permute.xlu0 %3755 }
0x13bd   :  { %3855 = vrot.lane.b32.xlu0 %v9932_v61, %s7785_s26 }
0x13bf   :  { %v3848_v58 = vpop.permute.xlu0 %3847 }
0x13c3   :  { %v3780_v30 = vpop.permute.xlu0 %3779 }
0x13c7   :  { %v3712_v28 = vpop.permute.xlu0 %3711 }
0x13dc   :  { %2940 = vadd.xlane.f32.xlu0 %v2939_v43  ;;  %v3804_v43 = vpop.permute.xlu0 %3803 }
0x13e0   :  { %2943 = vadd.xlane.f32.xlu0 %v2942_v23  ;;  %v10014_v9 = vpop.permute.xlu0 %3735  ;;  %v10016_v23 = vpop.permute.xlu1 %3733 }
0x13e1   :  { %11200 = vst [vmem:[#allocation25_spill] sm:$0xff] %v10016_v23  ;;  %v3865_v23 = vsel %vm80_vm6, %v9826_v42, %v9948_v11 }
0x13e4   :  { %v3828_v33 = vpop.permute.xlu0 %3827  ;;  %v10018_v12 = vpop.permute.xlu1 %3825 }
0x13e5   :  { %11201 = vst [vmem:[#allocation23_spill] sm:$0xff] %v10018_v12 }
0x13e8   :  { %v10020_v38 = vpop.permute.xlu0 %3759  ;;  %v10022_v49 = vpop.permute.xlu1 %3757  ;;  %v11207_v53 = vld [vmem:[#allocation25_spill] sm:$0xff] }
0x13e9   :  { %11202 = vst [vmem:[#allocation15_spill] sm:$0xff] %v10020_v38  ;;  %11203 = vst [vmem:[#allocation9_spill] sm:$0xff] %v10022_v49  ;;  %v3873_v38 = vsel %vm82_vm1, %v3865_v23, %v9950_v13  ;;  %v3882_v13 = vsel %vm84_vm7, %v3874_v59, %v9956_v6  ;;  %v11209_v59 = vmov 0.0  }
0x13ea   :  { %v3881_v0 = vsel %vm84_vm7, %v3873_v38, %v9954_v37  ;;  %v3890_v47 = vsel %vm86_vm8, %v3882_v13, %v9960_v62  ;;  %v3899_v38 = vsel %vm88_vm9, %v3891_v45, %v3798_v44 }
0x13eb   :  { %v3889_v42 = vsel %vm86_vm8, %v3881_v0, %v9958_v54  ;;  %v3876_v54 = vsel %vm82_vm1, %v3868_v26, %v9977_v51  ;;  %v3907_v36 = vsel %vm90_vm10, %v3899_v38, %v3822_v52  ;;  %v11205_v52 = vld [vmem:[#allocation24_spill] sm:$0xff]  ;;  %v11212_v26 = vld [vmem:[#allocation21_spill] sm:$0xff] }
0x13ec   :  { %v3852_v15 = vpop.permute.xlu0 %3851  ;;  %v10026_v4 = vpop.permute.xlu1 %3849  ;;  %v11208_v0 = vld [vmem:[#allocation23_spill] sm:$0xff] }
0x13f0   :  { %v3784_v3 = vpop.permute.xlu0 %3783  ;;  %v10035_v49 = vpop.permute.xlu1 %3781 }
0x13f4   :  { %v3806_v34 = vpop.permute.xlu1 %3805 }
0x13f8   :  { %v3830_v48 = vpop.permute.xlu1 %3829 }
0x13fc   :  { %v3854_v38 = vpop.permute.xlu1 %3853 }
0x142c   :  { %v3497_v12 = vpop.xlane.xlu0 %3496 }
0x142d   :  { %v3498_v18 = vsub.f32 %v9963_v35, %v3497_v12  ;;  %v3897_v35 = vsel %vm88_vm9, %v3889_v42, %v9969_v63  ;;  %v3884_v63 = vsel %vm84_vm7, %v3876_v54, %v9985_v20  ;;  %v3878_v20 = vsel %vm82_vm1, %v3870_v55, %v3732_v40  ;;  %v11210_v42 = vld [vmem:[#allocation9_spill] sm:$0xff]  ;;  %v11216_v55 = vld [vmem:[#allocation14_spill] sm:$0xff] }
0x142e   :  { %v3905_v6 = vsel %vm90_vm10, %v3897_v35, %v9983_v22  ;;  %v3892_v29 = vsel %vm86_vm8, %v3884_v63, %v9995_v56  ;;  %v3886_v50 = vsel %vm84_vm7, %v3878_v20, %v3756_v8  ;;  %v11211_v35 = vmov 0.0|0.0   ;;  %v11213_v63 = vld [vmem:[#allocation13_spill] sm:$0xff] }
0x142f   :  { %v3499_v11 = vmul.f32 1.442695, %v3498_v18  ;;  %v3898_v18 = vsel %vm88_vm9, %v3890_v47, %v9971_v24  ;;  %v3869_v24 = vsel %vm80_vm6, %v9856_v5, %v3706_v46  ;;  %v3913_v51 = vsel %vm92_vm11, %v3905_v6, %v9993_v27 }
0x1430   :  { %v3808_v37 = vpop.permute.xlu0 %3807  ;;  %v3906_v62 = vsel %vm90_vm10, %v3898_v18, %v9981_v57  ;;  %v3900_v57 = vsel %vm88_vm9, %v3892_v29, %v3800_v2  ;;  %v3877_v5 = vsel %vm82_vm1, %v3869_v24, %v3730_v17  ;;  %v3921_v16 = vmul.f32 %v9704_v14, %v3913_v51  ;;  %v11215_v24 = vld [vmem:[#allocation28_spill] sm:$0xff] }
0x1431   :  { %7660 = vpow2.f32 %v3499_v11  ;;  %v3914_v21 = vsel %vm92_vm11, %v3906_v62, %v9987_v10  ;;  %v3908_v32 = vsel %vm90_vm10, %v3900_v57, %v3824_v25  ;;  %v3915_v10 = vsel %vm92_vm11, %v3907_v36, %v3846_v60  ;;  %v11214_v36 = vld [vmem:[#allocation8_spill] sm:$0xff] }
0x1432   :  { %v3922_v22 = vmul.f32 %v9710_v31, %v3914_v21  ;;  %v3916_v27 = vsel %vm92_vm11, %v3908_v32, %v3848_v58  ;;  %v3885_v12 = vsel %vm84_vm7, %v3877_v5, %v3754_v7  ;;  %v3894_v46 = vsel %vm86_vm8, %v3886_v50, %v3780_v30  ;;  %v11204_v30 = vld [vmem:[#allocation10_spill] sm:$0xff] }
0x1433   :  { %v3893_v2 = vsel %vm86_vm8, %v3885_v12, %v3778_v39  ;;  %v3923_v44 = vmul.f32 %v9734_v19, %v3915_v10  ;;  %v3872_v60 = vsel %vm80_vm6, %v9932_v61, %v3712_v28  ;;  %v3902_v40 = vsel %vm88_vm9, %v3894_v46, %v3804_v43  ;;  %v11206_v61 = vld [vmem:[#allocation15_spill] sm:$0xff] }
0x1434   :  { %v3832_v56 = vpop.permute.xlu0 %3831  ;;  %v7400_v8 = vpack.c.bf16 %v3922_v22, %v3921_v16  ;;  %v3924_v58 = vmul.f32 %v9740_v1, %v3916_v27  ;;  %v3880_v7 = vsel %vm82_vm1, %v3872_v60, %v10014_v9  ;;  %v3910_v25 = vsel %vm90_vm10, %v3902_v40, %v3828_v33 }
0x1435   :  { %v3871_v39 = vsel %vm80_vm6, %v11204_v30, %v10010_v41  ;;  %v3901_v23 = vsel %vm88_vm9, %v3893_v2, %v11205_v52  ;;  %v3888_v28 = vsel %vm84_vm7, %v3880_v7, %v11206_v61  ;;  %v3918_v43 = vsel %vm92_vm11, %v3910_v25, %v3852_v15  ;;  %v11218_v25 = vld [vmem:[#allocation16_spill] sm:$0xff] }
0x1436   :  { %v3879_v9 = vsel %vm82_vm1, %v3871_v39, %v11207_v53  ;;  %v3909_v33 = vsel %vm90_vm10, %v3901_v23, %v11208_v0  ;;  %v3896_v45 = vsel %vm86_vm8, %v3888_v28, %v3784_v3  ;;  %v7403_v3 = vpack.c.bf16 %v3924_v58, %v3923_v44  ;;  %v11219_v39 = vld [vmem:[#allocation22_spill] sm:$0xff]  ;;  %v11220_v23 = vld [vmem:[#allocation17_spill] sm:$0xff]  ;;  %v11222_v0 = vld [vmem:[#allocation19_spill] sm:$0xff] }
0x1437   :  { %v3887_v11 = vsel %vm84_vm7, %v3879_v9, %v11210_v42  ;;  %v3917_v15 = vsel %vm92_vm11, %v3909_v33, %v10026_v4  ;;  %v3904_v13 = vsel %vm88_vm9, %v3896_v45, %v3808_v37  ;;  %v3926_v18 = vmul.f32 %v11212_v26, %v3918_v43  ;;  %v11221_v53 = vld [vmem:[#allocation18_spill] sm:$0xff]  ;;  %v11223_v45 = vld [vmem:[#allocation20_spill] sm:$0xff] }
0x1438   :  { %v3856_v41 = vpop.permute.xlu0 %3855  ;;  %v3895_v47 = vsel %vm86_vm8, %v3887_v11, %v10035_v49  ;;  %v3912_v6 = vsel %vm90_vm10, %v3904_v13, %v3832_v56  ;;  %v3925_v21 = vmul.f32 %v11213_v63, %v3917_v15  ;;  %v4084_v57 = vmul.f32 %v9704_v14, %v11216_v55 }
0x1439   :  { %v3903_v54 = vsel %vm88_vm9, %v3895_v47, %v3806_v34  ;;  %v3920_v62 = vsel %vm92_vm11, %v3912_v6, %v3856_v41  ;;  %v4085_v22 = vmul.f32 %v9710_v31, %v11216_v55  ;;  %v4086_v32 = vmul.f32 %v9734_v19, %v11216_v55  ;;  %v5982_v6 = vld [vmem:[%s11039_s3 + $0x148] sm:$0xff] }
0x143a   :  { %v3911_v4 = vsel %vm90_vm10, %v3903_v54, %v3830_v48  ;;  %v7406_v49 = vpack.c.bf16 %v3926_v18, %v3925_v21  ;;  %v3928_v29 = vmul.f32 %v11214_v36, %v3920_v62  ;;  %v4087_v10 = vmul.f32 %v9740_v1, %v11216_v55  ;;  %v11217_v48 = vld [vmem:[#allocation27_spill] sm:$0xff]  ;;  %v5981_v18 = vld [vmem:[%s11039_s3 + $0x140] sm:$0xff]  ;;  %v5983_v54 = vld [vmem:[%s11039_s3 + $0x150] sm:$0xff] }
0x143b   :  { %v10095_v17 = vpop.eup %7660  ;;  %v3919_v37 = vsel %vm92_vm11, %v3911_v4, %v3854_v38  ;;  %v7424_v20 = vpack.c.bf16 %v4085_v22, %v4084_v57  ;;  %v4088_v31 = vmul.f32 %v11213_v63, %v11216_v55  ;;  %v4089_v56 = vmul.f32 %v11212_v26, %v11216_v55  ;;  %v5989_v38 = vld [vmem:[%s11039_s3 + $0x180] sm:$0xff]  ;;  %v5984_v63 = vld [vmem:[%s11039_s3 + $0x158] sm:$0xff] }
0x143c   :  { %6832 = vmatmul.mubr.msk.f32.vlgmr.msra.gmra.mrb[22].mxu0 %vm288_vm0, %v10095_v17  ;;  %v3927_v51 = vmul.f32 %v11215_v24, %v3919_v37  ;;  %v7427_v14 = vpack.c.bf16 %v4087_v10, %v4086_v32  ;;  %v4090_v1 = vmul.f32 %v11215_v24, %v11216_v55  ;;  %v4091_v5 = vmul.f32 %v11214_v36, %v11216_v55  ;;  %v5985_v4 = vld [vmem:[%s11039_s3 + $0x160] sm:$0xff]  ;;  %v5986_v37 = vld [vmem:[%s11039_s3 + $0x168] sm:$0xff]  ;;  %v5987_v36 = vld [vmem:[%s11039_s3 + $0x170] sm:$0xff] }
0x143d   :  { %7401 = vmatpush3.bf16.msra.mxu0 %v7400_v8  ;;  %6869 = vmatprep.mubr.msk.f32.mxu0 %vm7790_vm5, %v11209_v59  ;;  %v7430_v19 = vpack.c.bf16 %v4089_v56, %v4088_v31  ;;  %v7435_v62 = vpack.c.bf16 %v5982_v6, %v5981_v18  ;;  %v7439_v21 = vpack.c.bf16 %v5984_v63, %v5983_v54  ;;  %v5971_v56 = vld [vmem:[%s11042_s6 + $0x27] ss:$0 sm:$0xff] }
0x143e   :  { %7402 = vmatprep.subr.bf16.mxu0 %v11211_v35  ;;  %v7409_v34 = vpack.c.bf16 %v3928_v29, %v3927_v51  ;;  %v7433_v50 = vpack.c.bf16 %v4091_v5, %v4090_v1  ;;  %v5988_v29 = vld [vmem:[%s11039_s3 + $0x178] sm:$0xff]  ;;  %v5991_v1 = vld [vmem:[%s11039_s3 + $0x190] sm:$0xff] }
0x143f   :  { %v7447_v24 = vpack.c.bf16 %v5988_v29, %v5987_v36  ;;  %v5992_v5 = vld [vmem:[%s11039_s3 + $0x198] sm:$0xff] }
0x1441   :  { %7404 = vmatpush3.bf16.msra.mxu0 %v7403_v3  ;;  %v5990_v3 = vld [vmem:[%s11039_s3 + $0x188] sm:$0xff] }
0x1442   :  { %7405 = vmatprep.subr.bf16.mxu0 %v11211_v35  ;;  %v7451_v26 = vpack.c.bf16 %v5990_v3, %v5989_v38  ;;  %v10352_v3 = vld [vmem:[%s11042_s6 + $0x29] ss:$0 sm:$0xff] }
0x1445   :  { %7407 = vmatpush3.bf16.msra.mxu0 %v7406_v49  ;;  %v7443_v49 = vpack.c.bf16 %v5986_v37, %v5985_v4 }
0x1446   :  { %7408 = vmatprep.subr.bf16.mxu0 %v11211_v35 }
0x1449   :  { %7410 = vmatpush3.bf16.msra.mxu0 %v7409_v34 }
0x144a   :  { %7423 = vmatprep.subr.bf16.mxu0 %v11211_v35 }
0x144c   :  { %6870 = vmatmul.mubr.msk.f32.vlgmr.msra.gmra.mrb[24].mxu0 %vm288_vm0, %v11216_v55 }
0x144d   :  { %7425 = vmatpush3.bf16.msra.mxu0 %v7424_v20  ;;  %6907 = vmatprep.mubr.msk.f32.mxu0 %vm7790_vm5, %v11209_v59 }
0x144e   :  { %7426 = vmatprep.subr.bf16.mxu0 %v11211_v35 }
0x1451   :  { %7428 = vmatpush3.bf16.msra.mxu0 %v7427_v14 }
0x1452   :  { %7429 = vmatprep.subr.bf16.mxu0 %v11211_v35 }
0x1455   :  { %7431 = vmatpush3.bf16.msra.mxu0 %v7430_v19 }
0x1456   :  { %7432 = vmatprep.subr.bf16.mxu0 %v11211_v35 }
0x1459   :  { %7434 = vmatpush3.bf16.msra.mxu0 %v7433_v50 }
0x145a   :  { %7452 = vmatprep.subr.bf16.mxu0 %v7451_v26 }
0x1469   :  { %v2941_v27 = vpop.xlane.xlu0 %2940 }
0x146a   :  { %v2945_v7 = vmul.f32 0.015625, %v2941_v27 }
0x146c   :  { %v2947_v52 = vsub.f32 %v11219_v39, %v2945_v7 }
0x146d   :  { %v2944_v12 = vpop.xlane.xlu0 %2943 }
0x146e   :  { %v2946_v16 = vmul.f32 0.015625, %v2944_v12  ;;  %v2949_v9 = vmul.f32 %v2947_v52, %v2947_v52  ;;  %v5972_v12 = vld [vmem:[%s11042_s6 + $0x28] ss:$0 sm:$0xff] }
0x1470   :  { %v10162_v46 = vsub.f32 %v11217_v48, %v2946_v16  ;;  %v2951_v33 = vsel %vm288_vm0, %v2949_v9, 0.0  ;;  %v7455_v16 = vpack.c.bf16 %v5992_v5, %v5991_v1 }
0x1472   :  { %v2950_v2 = vmul.f32 %v10162_v46, %v10162_v46 }
0x1474   :  { %v2954_v44 = vsel %vm288_vm0, %v2950_v2, 0.0  ;;  %v5993_v2 = vld [vmem:[%s11039_s3 + $0x1a0] sm:$0xff] }
0x1475   :  { %2955 = vadd.xlane.f32.xlu0 %v2954_v44  ;;  %v5994_v44 = vld [vmem:[%s11039_s3 + $0x1a8] sm:$0xff] }
0x1502   :  { %v2956_v57 = vpop.xlane.xlu0 %2955 }
0x1503   :  { %v2958_v22 = vmul.f32 0.015625, %v2956_v57 }
0x1505   :  { %v2960_v14 = vadd.f32 1e-05, %v2958_v22 }
0x150f   :  { %v3570_v60 = vpop.f32.mrb[22].mxu0 }
0x1510   :  { %7662 = vrcp.f32 %v3570_v60  ;;  %v6833_v40 = vpop.f32.mrb[23].mxu0  ;;  %v7459_v60 = vpack.c.bf16 %v5994_v44, %v5993_v2  ;;  %v10432_v44 = vld [vmem:[%s11039_s3 + $0x200] sm:$0xff] }
0x151a   :  { %v7663_v8 = vpop.eup %7662 }
0x151b   :  { %v3575_v58 = vmul.f32 %v7663_v8, %v10095_v17  ;;  %v5995_v8 = vld [vmem:[%s11039_s3 + $0x1b0] sm:$0xff] }
0x151d   :  { %6851 = vmatmul.mubr.msk.f32.vlgmr.msra.gmra.mrb[28].mxu1 %vm288_vm0, %v3575_v58  ;;  %v5996_v58 = vld [vmem:[%s11039_s3 + $0x1b8] sm:$0xff] }
0x151e   :  { %7413 = vmatpush3.bf16.msra.mxu1 %v11218_v25  ;;  %6888 = vmatprep.mubr.msk.f32.mxu1 %vm7790_vm5, %v11209_v59 }
0x151f   :  { %v3998_v30 = vpop.f32.mrb[24].mxu0  ;;  %7414 = vmatprep.subr.bf16.mxu1 %v11211_v35 }
0x1520   :  { %v3999_v61 = vadd.f32 %v3998_v30, %v11220_v23  ;;  %v6871_v28 = vpop.f32.mrb[25].mxu0  ;;  %v7463_v30 = vpack.c.bf16 %v5996_v58, %v5995_v8  ;;  %v10247_v23 = vld [vmem:[%s11037_s1] sm:$0xff] }
0x1522   :  { %v4002_v43 = vmul.f32 0.35355338, %v3999_v61  ;;  %7416 = vmatpush3.bf16.msra.mxu1 %v11221_v53 }
0x1523   :  { %7417 = vmatprep.subr.bf16.mxu1 %v11211_v35 }
0x1524   :  { %v4003_v17 = vsel %vm288_vm0, %v4002_v43, -inf }
0x1525   :  { %4004 = vmax.xlane.f32.xlu1 %v4003_v17 }
0x1526   :  { %7419 = vmatpush3.bf16.msra.mxu1 %v11222_v0 }
0x1527   :  { %7420 = vmatprep.subr.bf16.mxu1 %v11211_v35 }
0x1529   :  { %2952 = vadd.xlane.f32.xlu1 %v2951_v33 }
0x152a   :  { %7422 = vmatpush3.bf16.msra.mxu1 %v11223_v45 }
0x152b   :  { %7436 = vmatprep.subr.bf16.mxu1 %v7435_v62 }
0x15b2   :  { %v4005_v41 = vpop.xlane.xlu1 %4004 }
0x15b3   :  { %v4006_v42 = vsub.f32 %v4002_v43, %v4005_v41 }
0x15b5   :  { %v4007_v11 = vmul.f32 1.442695, %v4006_v42 }
0x15b6   :  { %v2953_v51 = vpop.xlane.xlu1 %2952 }
0x15b7   :  { %7664 = vpow2.f32 %v4007_v11  ;;  %v2957_v34 = vmul.f32 0.015625, %v2953_v51 }
0x15b9   :  { %v2959_v55 = vadd.f32 1e-05, %v2957_v34 }
0x15bb   :  { %7666 = vrsqrt.f32 %v2959_v55 }
0x15c1   :  { %v7665_v15 = vpop.eup %7664 }
0x15c2   :  { %6889 = vmatmul.mubr.msk.f32.vlgmr.msra.gmra.mrb[30].mxu1 %vm288_vm0, %v7665_v15 }
0x15c3   :  { %7438 = vmatpush3.bf16.msra.mxu1 %v7435_v62 }
0x15c4   :  { %7440 = vmatprep.subr.bf16.mxu1 %v7439_v21 }
0x15c5   :  { %v7667_v10 = vpop.eup %7666 }
0x15c6   :  { %v2963_v31 = vmul.f32 %v7667_v10, %v2947_v52 }
0x15c7   :  { %7442 = vmatpush3.bf16.msra.mxu1 %v7439_v21 }
0x15c8   :  { %7444 = vmatprep.subr.bf16.mxu1 %v7443_v49  ;;  %v2969_v19 = vmul.f32 %v5971_v56, %v2963_v31 }
0x15ca   :  { %v2975_v48 = vadd.f32 %v5972_v12, %v2969_v19 }
0x15cb   :  { %7446 = vmatpush3.bf16.msra.mxu1 %v7443_v49 }
0x15cc   :  { %7448 = vmatprep.subr.bf16.mxu1 %v7447_v24 }
0x15cf   :  { %7450 = vmatpush3.bf16.msra.mxu1 %v7447_v24 }
0x15d0   :  { %7467 = vmatprep.subr.bf16.mxu1 %v11211_v35 }
0x15f0   :  { %v3653_v13 = vpop.f32.mrb[28].mxu1 }
0x15f1   :  { %v6852_v47 = vpop.f32.mrb[29].mxu1  ;;  %6926 = vmatprep.mubr.msk.f32.mxu1 %vm288_vm0, %v3653_v13 }
0x1695   :  { %v4078_v20 = vpop.f32.mrb[30].mxu1 }
0x1696   :  { %7668 = vrcp.f32 %v4078_v20  ;;  %v6890_v32 = vpop.f32.mrb[31].mxu1 }
0x1697   :  { %7670 = vrsqrt.f32 %v2960_v14 }
0x16a0   :  { %v7669_v50 = vpop.eup %7668 }
0x16a1   :  { %v4083_v27 = vmul.f32 %v7669_v50, %v7665_v15  ;;  %v7671_v40 = vpop.eup %7670 }
0x16a2   :  { %v2964_v7 = vmul.f32 %v7671_v40, %v10162_v46  ;;  %v10256_v46 = vld [vmem:[%s11037_s1 + $0x8] sm:$0xff] }
0x16a3   :  { %6908 = vmatmul.mubr.msk.f32.vlgmr.msra.gmra.mrb[26].mxu0 %vm288_vm0, %v4083_v27  ;;  %v10438_v40 = vld [vmem:[%s11039_s3 + $0x208] sm:$0xff] }
0x16a4   :  { %7454 = vmatpush3.bf16.msra.mxu0 %v7451_v26  ;;  %6945 = vmatprep.mubr.msk.f32.mxu0 %vm288_vm0, %v2975_v48  ;;  %v2970_v39 = vmul.f32 %v5971_v56, %v2964_v7 }
0x16a5   :  { %7456 = vmatprep.subr.bf16.mxu0 %v7455_v16 }
0x16a6   :  { %v2976_v52 = vadd.f32 %v5972_v12, %v2970_v39 }
0x16a8   :  { %7458 = vmatpush3.bf16.msra.mxu0 %v7455_v16 }
0x16a9   :  { %7460 = vmatprep.subr.bf16.mxu0 %v7459_v60 }
0x16ac   :  { %7462 = vmatpush3.bf16.msra.mxu0 %v7459_v60 }
0x16ad   :  { %7464 = vmatprep.subr.bf16.mxu0 %v7463_v30 }
0x16b0   :  { %7466 = vmatpush3.bf16.msra.mxu0 %v7463_v30 }
0x16b1   :  { %7479 = vmatprep.subr.bf16.mxu0 %v11211_v35 }
0x16b3   :  { %6946 = vmatmul.mubr.msk.f32.vlgmr.msra.gmra.mrb[28].mxu0 %vm288_vm0, %v2976_v52 }
0x16b4   :  { %6948 = vmatprep.mubr.msk.f32.mxu0 %vm288_vm0, %v10247_v23  ;;  %7481 = vmatpush3.bf16.msra.mxu0 %v11218_v25 }
0x16b5   :  { %7482 = vmatprep.subr.bf16.mxu0 %v11211_v35 }
0x16b7   :  { %6949 = vmatmul.mubr.msk.f32.gmra.mrb[30].mxu0 %vm288_vm0, %v10256_v46 }
0x16b8   :  { %7484 = vmatpush3.bf16.msra.mxu0 %v11221_v53 }
0x16b9   :  { %7485 = vmatprep.subr.bf16.mxu0 %v11211_v35 }
0x16bc   :  { %7487 = vmatpush3.bf16.msra.mxu0 %v11222_v0 }
0x16bd   :  { %7488 = vmatprep.subr.bf16.mxu0 %v11211_v35 }
0x16c0   :  { %7490 = vmatpush3.bf16.msra.mxu0 %v11223_v45 }
0x16c1   :  { %7503 = vmatprep.subr.bf16.mxu0 %v11211_v35 }
0x1776   :  { %v4161_v61 = vpop.f32.mrb[26].mxu0 }
0x1777   :  { %v6909_v28 = vpop.f32.mrb[27].mxu0  ;;  %6927 = vmatmul.mubr.msk.f32.vlgmr.msra.gmra.mrb[32].mxu1 %vm288_vm0, %v4161_v61 }
0x1778   :  { %6970 = vmatprep.mubr.msk.f32.mxu1 %vm7790_vm5, %v11209_v59 }
0x1786   :  { %v10269_v43 = vpop.f32.mrb[28].mxu0 }
0x1787   :  { %v10271_v17 = vpop.f32.mrb[29].mxu0 }
0x178a   :  { %v10273_v9 = vpop.f32.mrb[30].mxu0 }
0x178b   :  { %v4378_v33 = vpop.f32.mrb[31].mxu0 }
0x178c   :  { %4397 = vxpose.xlu1.b32.start.end [1/1] (short) (narrow) %v4378_v33, 64 }
0x180c   :  { %v10275_v41 = vpop.trf.xlu1 }
0x180d   :  { %4437 = vrot.lane.b32.xlu0 %v10275_v41, %s7783_s0 }
0x1810   :  { %v10279_v42 = vpop.trf.xlu1 }
0x1811   :  { %4461 = vrot.lane.b32.xlu0 %v10275_v41, %s7780_s16 }
0x1814   :  { %v10283_v11 = vpop.trf.xlu1 }
0x1815   :  { %4485 = vrot.lane.b32.xlu0 %v10275_v41, %s7784_s25  ;;  %4441 = vrot.lane.b32.xlu1 %v10283_v11, %s7783_s0 }
0x1818   :  { %v10293_v15 = vpop.trf.xlu1 }
0x1819   :  { %4509 = vrot.lane.b32.xlu0 %v10275_v41, %s7786_s4  ;;  %4537 = vrot.lane.b32.xlu1 %v10283_v11, %s7787_s27 }
0x181c   :  { %v10303_v13 = vpop.trf.xlu1 }
0x181d   :  { %4533 = vrot.lane.b32.xlu0 %v10275_v41, %s7787_s27  ;;  %4561 = vrot.lane.b32.xlu1 %v10283_v11, %s7788_s28 }
0x1820   :  { %v10321_v47 = vpop.trf.xlu1 }
0x1821   :  { %4557 = vrot.lane.b32.xlu0 %v10275_v41, %s7788_s28  ;;  %4585 = vrot.lane.b32.xlu1 %v10283_v11, %s7785_s26 }
0x1824   :  { %v10331_v38 = vpop.trf.xlu1 }
0x1825   :  { %4581 = vrot.lane.b32.xlu0 %v10275_v41, %s7785_s26  ;;  %4469 = vrot.lane.b32.xlu1 %v10303_v13, %s7780_s16 }
0x1828   :  { %v10397_v4 = vpop.trf.xlu1 }
0x1829   :  { %4439 = vrot.lane.b32.xlu0 %v10279_v42, %s7783_s0  ;;  %4493 = vrot.lane.b32.xlu1 %v10303_v13, %s7784_s25 }
0x182d   :  { %4463 = vrot.lane.b32.xlu0 %v10279_v42, %s7780_s16  ;;  %4517 = vrot.lane.b32.xlu1 %v10303_v13, %s7786_s4 }
0x1831   :  { %4487 = vrot.lane.b32.xlu0 %v10279_v42, %s7784_s25  ;;  %4541 = vrot.lane.b32.xlu1 %v10303_v13, %s7787_s27 }
0x1835   :  { %4511 = vrot.lane.b32.xlu0 %v10279_v42, %s7786_s4  ;;  %4565 = vrot.lane.b32.xlu1 %v10303_v13, %s7788_s28 }
0x1839   :  { %4535 = vrot.lane.b32.xlu0 %v10279_v42, %s7787_s27  ;;  %4589 = vrot.lane.b32.xlu1 %v10303_v13, %s7785_s26 }
0x183d   :  { %4559 = vrot.lane.b32.xlu0 %v10279_v42, %s7788_s28  ;;  %4449 = vrot.lane.b32.xlu1 %v10331_v38, %s7783_s0 }
0x1841   :  { %4583 = vrot.lane.b32.xlu0 %v10279_v42, %s7785_s26  ;;  %4473 = vrot.lane.b32.xlu1 %v10331_v38, %s7780_s16 }
0x1845   :  { %4465 = vrot.lane.b32.xlu0 %v10283_v11, %s7780_s16  ;;  %4497 = vrot.lane.b32.xlu1 %v10331_v38, %s7784_s25 }
0x1849   :  { %4489 = vrot.lane.b32.xlu0 %v10283_v11, %s7784_s25  ;;  %4521 = vrot.lane.b32.xlu1 %v10331_v38, %s7786_s4 }
0x184a   :  { %v10354_v26 = vpop.f32.mrb[32].mxu1 }
0x184b   :  { %v4241_v18 = vpop.f32.mrb[33].mxu1  ;;  %v4247_v39 = vadd.f32 %v10354_v26, %v10352_v3 }
0x184c   :  { %v10357_v6 = vadd.f32 %v10352_v3, %v4241_v18 }
0x184d   :  { %4513 = vrot.lane.b32.xlu0 %v10283_v11, %s7786_s4  ;;  %4545 = vrot.lane.b32.xlu1 %v10331_v38, %s7787_s27  ;;  %v10445_v61 = vadd.f32 %v10256_v46, %v4247_v39 }
0x1851   :  { %4443 = vrot.lane.b32.xlu0 %v10293_v15, %s7783_s0  ;;  %4569 = vrot.lane.b32.xlu1 %v10331_v38, %s7788_s28 }
0x1855   :  { %4467 = vrot.lane.b32.xlu0 %v10293_v15, %s7780_s16  ;;  %4593 = vrot.lane.b32.xlu1 %v10331_v38, %s7785_s26 }
0x1859   :  { %4491 = vrot.lane.b32.xlu0 %v10293_v15, %s7784_s25 }
0x185d   :  { %4515 = vrot.lane.b32.xlu0 %v10293_v15, %s7786_s4 }
0x1861   :  { %4539 = vrot.lane.b32.xlu0 %v10293_v15, %s7787_s27 }
0x1865   :  { %4563 = vrot.lane.b32.xlu0 %v10293_v15, %s7788_s28 }
0x1869   :  { %4587 = vrot.lane.b32.xlu0 %v10293_v15, %s7785_s26 }
0x186d   :  { %4445 = vrot.lane.b32.xlu0 %v10303_v13, %s7783_s0 }
0x1871   :  { %4447 = vrot.lane.b32.xlu0 %v10321_v47, %s7783_s0 }
0x1875   :  { %4471 = vrot.lane.b32.xlu0 %v10321_v47, %s7780_s16 }
0x1879   :  { %4495 = vrot.lane.b32.xlu0 %v10321_v47, %s7784_s25 }
0x187d   :  { %4519 = vrot.lane.b32.xlu0 %v10321_v47, %s7786_s4 }
0x187f   :  { %v4438_v54 = vpop.permute.xlu0 %4437 }
0x1880   :  { %v4605_v57 = vsel %vm80_vm6, %v10275_v41, %v4438_v54 }
0x1881   :  { %4543 = vrot.lane.b32.xlu0 %v10321_v47, %s7787_s27 }
0x1883   :  { %v4462_v62 = vpop.permute.xlu0 %4461 }
0x1884   :  { %v4613_v22 = vsel %vm82_vm1, %v4605_v57, %v4462_v62 }
0x1885   :  { %4567 = vrot.lane.b32.xlu0 %v10321_v47, %s7788_s28 }
0x1887   :  { %v4486_v63 = vpop.permute.xlu0 %4485  ;;  %v4442_v12 = vpop.permute.xlu1 %4441 }
0x1888   :  { %v4621_v20 = vsel %vm84_vm7, %v4613_v22, %v4486_v63 }
0x1889   :  { %4591 = vrot.lane.b32.xlu0 %v10321_v47, %s7785_s26 }
0x188b   :  { %v4510_v21 = vpop.permute.xlu0 %4509  ;;  %v4538_v30 = vpop.permute.xlu1 %4537 }
0x188c   :  { %v4629_v10 = vsel %vm86_vm8, %v4621_v20, %v4510_v21  ;;  %v4607_v21 = vsel %vm80_vm6, %v10283_v11, %v4442_v12 }
0x188d   :  { %4451 = vrot.lane.b32.xlu0 %v10397_v4, %s7783_s0 }
0x188f   :  { %v4534_v37 = vpop.permute.xlu0 %4533  ;;  %v4562_v28 = vpop.permute.xlu1 %4561 }
0x1890   :  { %v4637_v56 = vsel %vm88_vm9, %v4629_v10, %v4534_v37 }
0x1891   :  { %4475 = vrot.lane.b32.xlu0 %v10397_v4, %s7780_s16 }
0x1893   :  { %v4558_v49 = vpop.permute.xlu0 %4557  ;;  %v4586_v18 = vpop.permute.xlu1 %4585 }
0x1894   :  { %v4645_v1 = vsel %vm90_vm10, %v4637_v56, %v4558_v49  ;;  %v10468_v56 = vld [vmem:[%s11039_s3 + $0x210] sm:$0xff] }
0x1895   :  { %4499 = vrot.lane.b32.xlu0 %v10397_v4, %s7784_s25 }
0x1897   :  { %v4582_v36 = vpop.permute.xlu0 %4581  ;;  %v4470_v62 = vpop.permute.xlu1 %4469 }
0x1898   :  { %v4653_v50 = vsel %vm92_vm11, %v4645_v1, %v4582_v36  ;;  %v10474_v1 = vld [vmem:[%s11039_s3 + $0x218] sm:$0xff] }
0x1899   :  { %4523 = vrot.lane.b32.xlu0 %v10397_v4, %s7786_s4  ;;  %v4661_v60 = vmul.f32 %v10432_v44, %v4653_v50 }
0x189b   :  { %v4440_v29 = vpop.permute.xlu0 %4439  ;;  %v4494_v37 = vpop.permute.xlu1 %4493 }
0x189c   :  { %v4606_v32 = vsel %vm80_vm6, %v10279_v42, %v4440_v29  ;;  %v4255_v42 = vsel %vm288_vm0, %v10445_v61, 0.0 }
0x189d   :  { %4547 = vrot.lane.b32.xlu0 %v10397_v4, %s7787_s27 }
0x189f   :  { %v4464_v24 = vpop.permute.xlu0 %4463 }
0x18a0   :  { %v4614_v14 = vsel %vm82_vm1, %v4606_v32, %v4464_v24 }
0x18a1   :  { %4571 = vrot.lane.b32.xlu0 %v10397_v4, %s7788_s28 }
0x18a3   :  { %v4488_v51 = vpop.permute.xlu0 %4487 }
0x18a4   :  { %v4622_v19 = vsel %vm84_vm7, %v4614_v14, %v4488_v51  ;;  %v4518_v51 = vpop.permute.xlu1 %4517 }
0x18a5   :  { %4595 = vrot.lane.b32.xlu0 %v10397_v4, %s7785_s26 }
0x18a7   :  { %v4512_v34 = vpop.permute.xlu0 %4511 }
0x18a8   :  { %v4630_v5 = vsel %vm86_vm8, %v4622_v19, %v4512_v34 }
0x18ab   :  { %v4536_v55 = vpop.permute.xlu0 %4535 }
0x18ac   :  { %v4638_v27 = vsel %vm88_vm9, %v4630_v5, %v4536_v55 }
0x18af   :  { %v4560_v31 = vpop.permute.xlu0 %4559 }
0x18b0   :  { %v4646_v16 = vsel %vm90_vm10, %v4638_v27, %v4560_v31 }
0x18b3   :  { %v4584_v48 = vpop.permute.xlu0 %4583 }
0x18b4   :  { %v4654_v2 = vsel %vm92_vm11, %v4646_v16, %v4584_v48 }
0x18b5   :  { %v4662_v8 = vmul.f32 %v10438_v40, %v4654_v2 }
0x18b7   :  { %v7468_v58 = vpack.c.bf16 %v4662_v8, %v4661_v60  ;;  %v4466_v7 = vpop.permute.xlu0 %4465 }
0x18b8   :  { %v4615_v3 = vsel %vm82_vm1, %v4607_v21, %v4466_v7 }
0x18b9   :  { %7469 = vmatpush3.bf16.msra.mxu1 %v7468_v58 }
0x18ba   :  { %7470 = vmatprep.subr.bf16.mxu1 %v11211_v35 }
0x18bb   :  { %v4490_v52 = vpop.permute.xlu0 %4489 }
0x18bc   :  { %v4623_v46 = vsel %vm84_vm7, %v4615_v3, %v4490_v52 }
0x18bf   :  { %v4514_v33 = vpop.permute.xlu0 %4513 }
0x18c0   :  { %v4631_v49 = vsel %vm86_vm8, %v4623_v46, %v4514_v33 }
0x18c1   :  { %v4639_v29 = vsel %vm88_vm9, %v4631_v49, %v4538_v30 }
0x18c2   :  { %v4647_v34 = vsel %vm90_vm10, %v4639_v29, %v4562_v28 }
0x18c3   :  { %v4444_v41 = vpop.permute.xlu0 %4443  ;;  %v4655_v32 = vsel %vm92_vm11, %v4647_v34, %v4586_v18 }
0x18c4   :  { %4256 = vadd.xlane.f32.xlu0 %v4255_v42  ;;  %v4608_v24 = vsel %vm80_vm6, %v10293_v15, %v4444_v41  ;;  %v4542_v15 = vpop.permute.xlu1 %4541  ;;  %v4663_v19 = vmul.f32 %v10468_v56, %v4655_v32 }
0x18c7   :  { %v4468_v54 = vpop.permute.xlu0 %4467 }
0x18c8   :  { %v4616_v55 = vsel %vm82_vm1, %v4608_v24, %v4468_v54  ;;  %v4566_v12 = vpop.permute.xlu1 %4565 }
0x18cb   :  { %v4492_v63 = vpop.permute.xlu0 %4491 }
0x18cc   :  { %v4624_v57 = vsel %vm84_vm7, %v4616_v55, %v4492_v63  ;;  %v4590_v60 = vpop.permute.xlu1 %4589 }
0x18cf   :  { %v4516_v26 = vpop.permute.xlu0 %4515 }
0x18d0   :  { %v4632_v22 = vsel %vm86_vm8, %v4624_v57, %v4516_v26  ;;  %v4450_v30 = vpop.permute.xlu1 %4449 }
0x18d3   :  { %v4540_v36 = vpop.permute.xlu0 %4539 }
0x18d4   :  { %v4640_v20 = vsel %vm88_vm9, %v4632_v22, %v4540_v36  ;;  %v4474_v41 = vpop.permute.xlu1 %4473  ;;  %v10504_v36 = vld [vmem:[%s11039_s3 + $0x228] sm:$0xff] }
0x18d7   :  { %v4564_v11 = vpop.permute.xlu0 %4563 }
0x18d8   :  { %v4648_v10 = vsel %vm90_vm10, %v4640_v20, %v4564_v11  ;;  %v4498_v3 = vpop.permute.xlu1 %4497 }
0x18db   :  { %v4588_v14 = vpop.permute.xlu0 %4587 }
0x18dc   :  { %v4656_v31 = vsel %vm92_vm11, %v4648_v10, %v4588_v14  ;;  %v4522_v34 = vpop.permute.xlu1 %4521  ;;  %v4611_v10 = vsel %vm80_vm6, %v10331_v38, %v4450_v30 }
0x18dd   :  { %v4664_v5 = vmul.f32 %v10474_v1, %v4656_v31  ;;  %v4619_v14 = vsel %vm82_vm1, %v4611_v10, %v4474_v41 }
0x18de   :  { %v4627_v31 = vsel %vm84_vm7, %v4619_v14, %v4498_v3 }
0x18df   :  { %v7471_v50 = vpack.c.bf16 %v4664_v5, %v4663_v19  ;;  %v4446_v27 = vpop.permute.xlu0 %4445  ;;  %v4635_v19 = vsel %vm86_vm8, %v4627_v31, %v4522_v34 }
0x18e0   :  { %v4609_v2 = vsel %vm80_vm6, %v10303_v13, %v4446_v27  ;;  %v4546_v11 = vpop.permute.xlu1 %4545 }
0x18e1   :  { %7472 = vmatpush3.bf16.msra.mxu1 %v7471_v50  ;;  %v4617_v8 = vsel %vm82_vm1, %v4609_v2, %v4470_v62 }
0x18e2   :  { %7473 = vmatprep.subr.bf16.mxu1 %v11211_v35  ;;  %v4625_v7 = vsel %vm84_vm7, %v4617_v8, %v4494_v37 }
0x18e3   :  { %v4448_v16 = vpop.permute.xlu0 %4447  ;;  %v4633_v52 = vsel %vm86_vm8, %v4625_v7, %v4518_v51  ;;  %v10527_v7 = vld [vmem:[%s11039_s3 + $0x230] sm:$0xff] }
0x18e4   :  { %v4641_v33 = vsel %vm88_vm9, %v4633_v52, %v4542_v15  ;;  %v4610_v42 = vsel %vm80_vm6, %v10321_v47, %v4448_v16  ;;  %v10498_v47 = vld [vmem:[%s11039_s3 + $0x220] sm:$0xff]  ;;  %v4570_v20 = vpop.permute.xlu1 %4569 }
0x18e5   :  { %v4649_v54 = vsel %vm90_vm10, %v4641_v33, %v4566_v12  ;;  %v4643_v12 = vsel %vm88_vm9, %v4635_v19, %v4546_v11 }
0x18e7   :  { %v4472_v48 = vpop.permute.xlu0 %4471 }
0x18e8   :  { %v4618_v13 = vsel %vm82_vm1, %v4610_v42, %v4472_v48  ;;  %v4594_v5 = vpop.permute.xlu1 %4593  ;;  %v4651_v48 = vsel %vm90_vm10, %v4643_v12, %v4570_v20 }
0x18e9   :  { %v4659_v2 = vsel %vm92_vm11, %v4651_v48, %v4594_v5 }
0x18ea   :  { %v4667_v30 = vmul.f32 %v10527_v7, %v4659_v2 }
0x18eb   :  { %v4496_v58 = vpop.permute.xlu0 %4495 }
0x18ec   :  { %v4626_v62 = vsel %vm84_vm7, %v4618_v13, %v4496_v58 }
0x18ef   :  { %v4520_v39 = vpop.permute.xlu0 %4519 }
0x18f0   :  { %v4634_v63 = vsel %vm86_vm8, %v4626_v62, %v4520_v39  ;;  %v10533_v39 = vld [vmem:[%s11039_s3 + $0x238] sm:$0xff] }
0x18f1   :  { %4905 = vxpose.xlu0.b32.start.end [1/1] (short) (narrow) %v10273_v9, 64  ;;  %v4657_v9 = vsel %vm92_vm11, %v4649_v54, %v4590_v60 }
0x18f2   :  { %v4665_v49 = vmul.f32 %v10498_v47, %v4657_v9 }
0x18f3   :  { %v4544_v28 = vpop.permute.xlu0 %4543 }
0x18f4   :  { %v4642_v21 = vsel %vm88_vm9, %v4634_v63, %v4544_v28  ;;  %v11224_v28 = vmov 0  }
0x18f7   :  { %v4568_v18 = vpop.permute.xlu0 %4567 }
0x18f8   :  { %v4650_v26 = vsel %vm90_vm10, %v4642_v21, %v4568_v18 }
0x18fb   :  { %v4592_v46 = vpop.permute.xlu0 %4591 }
0x18fc   :  { %v4658_v37 = vsel %vm92_vm11, %v4650_v26, %v4592_v46 }
0x18fd   :  { %v4666_v29 = vmul.f32 %v10504_v36, %v4658_v37 }
0x18ff   :  { %v7474_v24 = vpack.c.bf16 %v4666_v29, %v4665_v49  ;;  %v4452_v51 = vpop.permute.xlu0 %4451 }
0x1900   :  { %v4612_v15 = vsel %vm80_vm6, %v10397_v4, %v4452_v51 }
0x1901   :  { %7475 = vmatpush3.bf16.msra.mxu1 %v7474_v24 }
0x1902   :  { %7476 = vmatprep.subr.bf16.mxu1 %v11211_v35 }
0x1903   :  { %v4476_v55 = vpop.permute.xlu0 %4475 }
0x1904   :  { %v4620_v50 = vsel %vm82_vm1, %v4612_v15, %v4476_v55 }
0x1907   :  { %v4500_v57 = vpop.permute.xlu0 %4499 }
0x1908   :  { %v4628_v16 = vsel %vm84_vm7, %v4620_v50, %v4500_v57 }
0x190b   :  { %v4524_v22 = vpop.permute.xlu0 %4523 }
0x190c   :  { %v4636_v38 = vsel %vm86_vm8, %v4628_v16, %v4524_v22 }
0x190f   :  { %v4548_v32 = vpop.permute.xlu0 %4547 }
0x1910   :  { %v4644_v60 = vsel %vm88_vm9, %v4636_v38, %v4548_v32 }
0x1913   :  { %v4572_v27 = vpop.permute.xlu0 %4571 }
0x1914   :  { %v4652_v4 = vsel %vm90_vm10, %v4644_v60, %v4572_v27 }
0x1917   :  { %v4596_v8 = vpop.permute.xlu0 %4595 }
0x1918   :  { %v4660_v58 = vsel %vm92_vm11, %v4652_v4, %v4596_v8  ;;  %v10668_v8 = vadd.f32 %v10247_v23, %v10357_v6 }
0x1919   :  { %v4668_v52 = vmul.f32 %v10533_v39, %v4660_v58 }
0x191a   :  { %7635 = vset.pattern.permute.xlu0 %v11224_v28  ;;  %v4252_v28 = vsel %vm288_vm0, %v10668_v8, 0.0 }
0x191b   :  { %v7477_v33 = vpack.c.bf16 %v4668_v52, %v4667_v30 }
0x191d   :  { %7478 = vmatpush3.bf16.msra.mxu1 %v7477_v33 }
0x191e   :  { %7491 = vmatprep.subr.bf16.mxu1 %v11211_v35 }
0x1920   :  { %6971 = vmatmul.mubr.msk.f32.vlgmr.msra.gmra.mrb[34].mxu1 %vm288_vm0, %v10271_v17 }
0x1921   :  { %7008 = vmatprep.mubr.msk.f32.mxu1 %vm7790_vm5, %v11209_v59 }
0x1951   :  { %v10542_v41 = vpop.xlane.xlu0 %4256 }
0x1971   :  { %v4921_v42 = vpop.trf.xlu0 }
0x1972   :  { %4945 = vrot.lane.b32.xlu1 %v4921_v42, %s7783_s0 }
0x1975   :  { %v4922_v13 = vpop.trf.xlu0 }
0x1976   :  { %4995 = vrot.lane.b32.xlu0 %v4922_v13, %s7784_s25  ;;  %4947 = vrot.lane.b32.xlu1 %v4922_v13, %s7783_s0 }
0x1979   :  { %v10547_v18 = vpop.trf.xlu0 }
0x197a   :  { %4969 = vrot.lane.b32.xlu1 %v4921_v42, %s7780_s16 }
0x197d   :  { %v10550_v54 = vpop.trf.xlu0 }
0x197e   :  { %4971 = vrot.lane.b32.xlu1 %v4922_v13, %s7780_s16 }
0x1981   :  { %v10553_v17 = vpop.trf.xlu0 }
0x1982   :  { %4993 = vrot.lane.b32.xlu1 %v4921_v42, %s7784_s25 }
0x1985   :  { %v10556_v62 = vpop.trf.xlu0 }
0x1986   :  { %5017 = vrot.lane.b32.xlu1 %v4921_v42, %s7786_s4  ;;  %4955 = vrot.lane.b32.xlu0 %v10556_v62, %s7783_s0 }
0x1989   :  { %v10575_v63 = vpop.trf.xlu0 }
0x198a   :  { %5019 = vrot.lane.b32.xlu1 %v4922_v13, %s7786_s4  ;;  %5047 = vrot.lane.b32.xlu0 %v10550_v54, %s7787_s27 }
0x198d   :  { %v10584_v21 = vpop.trf.xlu0 }
0x198e   :  { %4949 = vrot.lane.b32.xlu1 %v10547_v18, %s7783_s0  ;;  %4979 = vrot.lane.b32.xlu0 %v10556_v62, %s7780_s16 }
0x1992   :  { %4951 = vrot.lane.b32.xlu1 %v10550_v54, %s7783_s0  ;;  %5071 = vrot.lane.b32.xlu0 %v10550_v54, %s7788_s28 }
0x1996   :  { %5041 = vrot.lane.b32.xlu1 %v4921_v42, %s7787_s27  ;;  %5003 = vrot.lane.b32.xlu0 %v10556_v62, %s7784_s25 }
0x199a   :  { %5043 = vrot.lane.b32.xlu1 %v4922_v13, %s7787_s27  ;;  %5095 = vrot.lane.b32.xlu0 %v10550_v54, %s7785_s26 }
0x199e   :  { %4973 = vrot.lane.b32.xlu1 %v10547_v18, %s7780_s16  ;;  %5027 = vrot.lane.b32.xlu0 %v10556_v62, %s7786_s4 }
0x19a2   :  { %4975 = vrot.lane.b32.xlu1 %v10550_v54, %s7780_s16  ;;  %4959 = vrot.lane.b32.xlu0 %v10584_v21, %s7783_s0 }
0x19a6   :  { %5065 = vrot.lane.b32.xlu1 %v4921_v42, %s7788_s28  ;;  %5051 = vrot.lane.b32.xlu0 %v10556_v62, %s7787_s27 }
0x19aa   :  { %5067 = vrot.lane.b32.xlu1 %v4922_v13, %s7788_s28  ;;  %4983 = vrot.lane.b32.xlu0 %v10584_v21, %s7780_s16 }
0x19ae   :  { %4997 = vrot.lane.b32.xlu1 %v10547_v18, %s7784_s25  ;;  %5075 = vrot.lane.b32.xlu0 %v10556_v62, %s7788_s28 }
0x19b2   :  { %4999 = vrot.lane.b32.xlu1 %v10550_v54, %s7784_s25  ;;  %5007 = vrot.lane.b32.xlu0 %v10584_v21, %s7784_s25 }
0x19b6   :  { %5089 = vrot.lane.b32.xlu1 %v4921_v42, %s7785_s26  ;;  %5099 = vrot.lane.b32.xlu0 %v10556_v62, %s7785_s26 }
0x19ba   :  { %5091 = vrot.lane.b32.xlu1 %v4922_v13, %s7785_s26  ;;  %5031 = vrot.lane.b32.xlu0 %v10584_v21, %s7786_s4 }
0x19be   :  { %5021 = vrot.lane.b32.xlu1 %v10547_v18, %s7786_s4  ;;  %5055 = vrot.lane.b32.xlu0 %v10584_v21, %s7787_s27 }
0x19c2   :  { %5023 = vrot.lane.b32.xlu1 %v10550_v54, %s7786_s4  ;;  %5079 = vrot.lane.b32.xlu0 %v10584_v21, %s7788_s28 }
0x19c6   :  { %4953 = vrot.lane.b32.xlu1 %v10553_v17, %s7783_s0  ;;  %5103 = vrot.lane.b32.xlu0 %v10584_v21, %s7785_s26 }
0x19ca   :  { %5045 = vrot.lane.b32.xlu1 %v10547_v18, %s7787_s27 }
0x19ce   :  { %4977 = vrot.lane.b32.xlu1 %v10553_v17, %s7780_s16 }
0x19d2   :  { %5069 = vrot.lane.b32.xlu1 %v10547_v18, %s7788_s28 }
0x19d6   :  { %5001 = vrot.lane.b32.xlu1 %v10553_v17, %s7784_s25 }
0x19da   :  { %5093 = vrot.lane.b32.xlu1 %v10547_v18, %s7785_s26 }
0x19de   :  { %5025 = vrot.lane.b32.xlu1 %v10553_v17, %s7786_s4 }
0x19e2   :  { %4957 = vrot.lane.b32.xlu1 %v10575_v63, %s7783_s0 }
0x19e4   :  { %v4946_v9 = vpop.permute.xlu1 %4945 }
0x19e5   :  { %v5113_v26 = vsel %vm80_vm6, %v4921_v42, %v4946_v9 }
0x19e6   :  { %5049 = vrot.lane.b32.xlu1 %v10553_v17, %s7787_s27 }
0x19e8   :  { %v4948_v3 = vpop.permute.xlu1 %4947  ;;  %v4996_v20 = vpop.permute.xlu0 %4995 }
0x19e9   :  { %v5114_v49 = vsel %vm80_vm6, %v4922_v13, %v4948_v3 }
0x19ea   :  { %4981 = vrot.lane.b32.xlu1 %v10575_v63, %s7780_s16 }
0x19ec   :  { %v4970_v46 = vpop.permute.xlu1 %4969 }
0x19ed   :  { %v5121_v37 = vsel %vm82_vm1, %v5113_v26, %v4970_v46 }
0x19ee   :  { %5073 = vrot.lane.b32.xlu1 %v10553_v17, %s7788_s28 }
0x19f0   :  { %v4972_v29 = vpop.permute.xlu1 %4971 }
0x19f1   :  { %v5122_v24 = vsel %vm82_vm1, %v5114_v49, %v4972_v29 }
0x19f2   :  { %5005 = vrot.lane.b32.xlu1 %v10575_v63, %s7784_s25  ;;  %v5130_v32 = vsel %vm84_vm7, %v5122_v24, %v4996_v20 }
0x19f3   :  { %v10648_v51 = vpop.f32.mrb[34].mxu1 }
0x19f4   :  { %v6972_v34 = vpop.f32.mrb[35].mxu1  ;;  %v4994_v55 = vpop.permute.xlu1 %4993 }
0x19f5   :  { %v5129_v11 = vsel %vm84_vm7, %v5121_v37, %v4994_v55 }
0x19f6   :  { %5097 = vrot.lane.b32.xlu1 %v10553_v17, %s7785_s26 }
0x19f8   :  { %v5018_v57 = vpop.permute.xlu1 %5017  ;;  %v10677_v23 = vpop.permute.xlu0 %4955 }
0x19f9   :  { %v5137_v22 = vsel %vm86_vm8, %v5129_v11, %v5018_v57 }
0x19fa   :  { %5029 = vrot.lane.b32.xlu1 %v10575_v63, %s7786_s4 }
0x19fc   :  { %v5020_v10 = vpop.permute.xlu1 %5019  ;;  %v5048_v24 = vpop.permute.xlu0 %5047 }
0x19fd   :  { %v5138_v14 = vsel %vm86_vm8, %v5130_v32, %v5020_v10 }
0x1a00   :  { %v4950_v31 = vpop.permute.xlu1 %4949  ;;  %v10692_v11 = vpop.permute.xlu0 %4979 }
0x1a01   :  { %v5115_v12 = vsel %vm80_vm6, %v10547_v18, %v4950_v31 }
0x1a04   :  { %v4952_v15 = vpop.permute.xlu1 %4951  ;;  %v5072_v32 = vpop.permute.xlu0 %5071 }
0x1a05   :  { %v5116_v38 = vsel %vm80_vm6, %v10550_v54, %v4952_v15 }
0x1a08   :  { %v5042_v19 = vpop.permute.xlu1 %5041  ;;  %v10698_v15 = vpop.permute.xlu0 %5003 }
0x1a09   :  { %v5145_v5 = vsel %vm88_vm9, %v5137_v22, %v5042_v19 }
0x1a0c   :  { %v5044_v50 = vpop.permute.xlu1 %5043 }
0x1a0d   :  { %v5146_v27 = vsel %vm88_vm9, %v5138_v14, %v5044_v50 }
0x1a10   :  { %v4974_v16 = vpop.permute.xlu1 %4973 }
0x1a11   :  { %v5123_v48 = vsel %vm82_vm1, %v5115_v12, %v4974_v16 }
0x1a14   :  { %v4976_v2 = vpop.permute.xlu1 %4975 }
0x1a15   :  { %v5124_v60 = vsel %vm82_vm1, %v5116_v38, %v4976_v2 }
0x1a18   :  { %v5066_v4 = vpop.permute.xlu1 %5065 }
0x1a19   :  { %v5153_v58 = vsel %vm90_vm10, %v5145_v5, %v5066_v4 }
0x1a1c   :  { %v5068_v30 = vpop.permute.xlu1 %5067 }
0x1a1d   :  { %v5154_v52 = vsel %vm90_vm10, %v5146_v27, %v5068_v30  ;;  %v4259_v27 = vmul.f32 0.015625, %v10542_v41 }
0x1a1e   :  { %4253 = vadd.xlane.f32.xlu1 %v4252_v28 }
0x1a1f   :  { %v4261_v38 = vsub.f32 %v10445_v61, %v4259_v27 }
0x1a20   :  { %v4998_v33 = vpop.permute.xlu1 %4997 }
0x1a21   :  { %v5131_v42 = vsel %vm84_vm7, %v5123_v48, %v4998_v33  ;;  %v4263_v41 = vmul.f32 %v4261_v38, %v4261_v38 }
0x1a23   :  { %v4267_v61 = vsel %vm288_vm0, %v4263_v41, 0.0 }
0x1a24   :  { %v5000_v13 = vpop.permute.xlu1 %4999 }
0x1a25   :  { %v5132_v18 = vsel %vm84_vm7, %v5124_v60, %v5000_v13 }
0x1a28   :  { %v5090_v54 = vpop.permute.xlu1 %5089 }
0x1a29   :  { %v5161_v9 = vsel %vm92_vm11, %v5153_v58, %v5090_v54 }
0x1a2a   :  { %v10681_v26 = vmul.f32 %v10432_v44, %v5161_v9 }
0x1a2c   :  { %v5092_v6 = vpop.permute.xlu1 %5091 }
0x1a2d   :  { %v5162_v3 = vsel %vm92_vm11, %v5154_v52, %v5092_v6 }
0x1a2e   :  { %v10684_v46 = vmul.f32 %v10438_v40, %v5162_v3 }
0x1a2f   :  { %5053 = vrot.lane.b32.xlu1 %v10575_v63, %s7787_s27 }
0x1a30   :  { %v7504_v37 = vpack.c.bf16 %v10684_v46, %v10681_v26  ;;  %v5022_v49 = vpop.permute.xlu1 %5021 }
0x1a31   :  { %v5139_v29 = vsel %vm86_vm8, %v5131_v42, %v5022_v49 }
0x1a34   :  { %v5024_v34 = vpop.permute.xlu1 %5023 }
0x1a35   :  { %v5140_v55 = vsel %vm86_vm8, %v5132_v18, %v5024_v34 }
0x1a36   :  { %v5148_v5 = vsel %vm88_vm9, %v5140_v55, %v5048_v24 }
0x1a37   :  { %v5156_v12 = vsel %vm90_vm10, %v5148_v5, %v5072_v32 }
0x1a38   :  { %v4954_v57 = vpop.permute.xlu1 %4953 }
0x1a39   :  { %v5117_v10 = vsel %vm80_vm6, %v10553_v17, %v4954_v57  ;;  %v5096_v17 = vpop.permute.xlu0 %5095 }
0x1a3a   :  { %v5164_v2 = vsel %vm92_vm11, %v5156_v12, %v5096_v17 }
0x1a3b   :  { %v10709_v58 = vmul.f32 %v10474_v1, %v5164_v2 }
0x1a3c   :  { %v5046_v22 = vpop.permute.xlu1 %5045 }
0x1a3d   :  { %v5147_v20 = vsel %vm88_vm9, %v5139_v29, %v5046_v22  ;;  %v5028_v41 = vpop.permute.xlu0 %5027 }
0x1a40   :  { %v4978_v14 = vpop.permute.xlu1 %4977 }
0x1a41   :  { %v5125_v31 = vsel %vm82_vm1, %v5117_v10, %v4978_v14 }
0x1a44   :  { %v5070_v19 = vpop.permute.xlu1 %5069 }
0x1a45   :  { %v5155_v50 = vsel %vm90_vm10, %v5147_v20, %v5070_v19 }
0x1a48   :  { %v5002_v16 = vpop.permute.xlu1 %5001 }
0x1a49   :  { %v5133_v48 = vsel %vm84_vm7, %v5125_v31, %v5002_v16 }
0x1a4c   :  { %v5094_v60 = vpop.permute.xlu1 %5093 }
0x1a4d   :  { %v5163_v4 = vsel %vm92_vm11, %v5155_v50, %v5094_v60  ;;  %v4742_v50 = vmul.f32 0.35355338, %v10648_v51  ;;  %v6049_v51 = vld [vmem:[%s11042_s6 + $0x2a] ss:$0 sm:$0xff] }
0x1a4e   :  { %v10712_v30 = vmul.f32 %v10468_v56, %v5163_v4 }
0x1a4f   :  { %v4743_v27 = vsel %vm288_vm0, %v4742_v50, -inf }
0x1a50   :  { %v7507_v52 = vpack.c.bf16 %v10709_v58, %v10712_v30  ;;  %v5026_v28 = vpop.permute.xlu1 %5025 }
0x1a51   :  { %v5141_v33 = vsel %vm86_vm8, %v5133_v48, %v5026_v28 }
0x1a53   :  { %4268 = vadd.xlane.f32.xlu1 %v4267_v61 }
0x1a54   :  { %v4958_v42 = vpop.permute.xlu1 %4957 }
0x1a55   :  { %v5119_v54 = vsel %vm80_vm6, %v10575_v63, %v4958_v42 }
0x1a58   :  { %v5050_v13 = vpop.permute.xlu1 %5049 }
0x1a59   :  { %v5149_v18 = vsel %vm88_vm9, %v5141_v33, %v5050_v13  ;;  %v4960_v13 = vpop.permute.xlu0 %4959 }
0x1a5c   :  { %v4982_v9 = vpop.permute.xlu1 %4981 }
0x1a5d   :  { %v5127_v6 = vsel %vm82_vm1, %v5119_v54, %v4982_v9 }
0x1a60   :  { %v5074_v3 = vpop.permute.xlu1 %5073 }
0x1a61   :  { %v5157_v49 = vsel %vm90_vm10, %v5149_v18, %v5074_v3 }
0x1a64   :  { %v5006_v29 = vpop.permute.xlu1 %5005 }
0x1a65   :  { %v5135_v24 = vsel %vm84_vm7, %v5127_v6, %v5006_v29 }
0x1a68   :  { %v5098_v34 = vpop.permute.xlu1 %5097 }
0x1a69   :  { %v10725_v55 = vsel %vm92_vm11, %v5157_v49, %v5098_v34 }
0x1a6c   :  { %v5030_v57 = vpop.permute.xlu1 %5029 }
0x1a6d   :  { %v5143_v22 = vsel %vm86_vm8, %v5135_v24, %v5030_v57 }
0x1aab   :  { %v4254_v20 = vpop.xlane.xlu1 %4253 }
0x1aac   :  { %v4258_v32 = vmul.f32 0.015625, %v4254_v20  ;;  %v5120_v20 = vsel %vm80_vm6, %v10584_v21, %v4960_v13 }
0x1aae   :  { %v4260_v10 = vsub.f32 %v10668_v8, %v4258_v32 }
0x1aaf   :  { %v5054_v14 = vpop.permute.xlu1 %5053 }
0x1ab0   :  { %v10730_v31 = vsel %vm88_vm9, %v5143_v22, %v5054_v14  ;;  %v4262_v19 = vmul.f32 %v4260_v10, %v4260_v10 }
0x1ab2   :  { %v4264_v5 = vsel %vm288_vm0, %v4262_v19, 0.0  ;;  %v5118_v19 = vsel %vm80_vm6, %v10556_v62, %v10677_v23 }
0x1ab3   :  { %4265 = vadd.xlane.f32.xlu1 %v4264_v5  ;;  %v5126_v5 = vsel %vm82_vm1, %v5118_v19, %v10692_v11 }
0x1ac4   :  { %5077 = vrot.lane.b32.xlu1 %v10575_v63, %s7788_s28 }
0x1ae0   :  { %v4269_v8 = vpop.xlane.xlu1 %4268 }
0x1ae1   :  { %v4271_v12 = vmul.f32 0.015625, %v4269_v8  ;;  %v5134_v8 = vsel %vm84_vm7, %v5126_v5, %v10698_v15  ;;  %v5173_v15 = vmul.f32 %v10498_v47, %v10725_v55 }
0x1ae3   :  { %v4273_v16 = vadd.f32 1e-05, %v4271_v12  ;;  %v5142_v12 = vsel %vm86_vm8, %v5134_v8, %v5028_v41 }
0x1ae5   :  { %7672 = vrsqrt.f32 %v4273_v16 }
0x1ae8   :  { %4744 = vmax.xlane.f32.xlu1 %v4743_v27 }
0x1aef   :  { %v7673_v60 = vpop.eup %7672 }
0x1af0   :  { %v4277_v4 = vmul.f32 %v7673_v60, %v4261_v38  ;;  %v5052_v38 = vpop.permute.xlu0 %5051 }
0x1af1   :  { %v5150_v16 = vsel %vm88_vm9, %v5142_v12, %v5052_v38  ;;  %v6000_v12 = vld [vmem:[%s11039_s3 + $0x1d8] sm:$0xff] }
0x1af2   :  { %v4283_v61 = vmul.f32 %v6049_v51, %v4277_v4 }
0x1af4   :  { %v4984_v9 = vpop.permute.xlu0 %4983 }
0x1af5   :  { %v5128_v32 = vsel %vm82_vm1, %v5120_v20, %v4984_v9 }
0x1af8   :  { %v5076_v6 = vpop.permute.xlu0 %5075 }
0x1af9   :  { %5101 = vrot.lane.b32.xlu1 %v10575_v63, %s7785_s26  ;;  %v6050_v63 = vld [vmem:[%s11042_s6 + $0x2b] ss:$0 sm:$0xff]  ;;  %v5158_v62 = vsel %vm90_vm10, %v5150_v16, %v5076_v6 }
0x1afa   :  { %v10747_v54 = vadd.f32 %v6050_v63, %v4283_v61 }
0x1afc   :  { %v5008_v3 = vpop.permute.xlu0 %5007 }
0x1afd   :  { %v5136_v14 = vsel %vm84_vm7, %v5128_v32, %v5008_v3 }
0x1b00   :  { %v5100_v29 = vpop.permute.xlu0 %5099 }
0x1b01   :  { %v5166_v11 = vsel %vm92_vm11, %v5158_v62, %v5100_v29  ;;  %v6002_v62 = vld [vmem:[%s11039_s3 + $0x1e8] sm:$0xff] }
0x1b02   :  { %v5174_v26 = vmul.f32 %v10504_v36, %v5166_v11  ;;  %v6003_v11 = vld [vmem:[%s11039_s3 + $0x1f0] sm:$0xff] }
0x1b04   :  { %v5032_v34 = vpop.permute.xlu0 %5031 }
0x1b05   :  { %v5144_v27 = vsel %vm86_vm8, %v5136_v14, %v5032_v34 }
0x1b40   :  { %v4266_v48 = vpop.xlane.xlu1 %4265 }
0x1b41   :  { %v4270_v17 = vmul.f32 0.015625, %v4266_v48 }
0x1b43   :  { %v4272_v2 = vadd.f32 1e-05, %v4270_v17 }
0x1b44   :  { %v5078_v49 = vpop.permute.xlu1 %5077 }
0x1b45   :  { %7674 = vrsqrt.f32 %v4272_v2  ;;  %v5159_v60 = vsel %vm90_vm10, %v10730_v31, %v5078_v49 }
0x1b4f   :  { %v7675_v28 = vpop.eup %7674 }
0x1b50   :  { %v4276_v33 = vmul.f32 %v7675_v28, %v4260_v10  ;;  %v5056_v10 = vpop.permute.xlu0 %5055 }
0x1b51   :  { %v5152_v48 = vsel %vm88_vm9, %v5144_v27, %v5056_v10 }
0x1b52   :  { %v4282_v42 = vmul.f32 %v6049_v51, %v4276_v33 }
0x1b54   :  { %v10745_v18 = vadd.f32 %v6050_v63, %v4282_v42 }
0x1b56   :  { %6951 = vmatprep.mubr.msk.f32.mxu0 %vm288_vm0, %v10745_v18 }
0x1b57   :  { %6952 = vmatmul.mubr.msk.f32.gmra.mrb[32].mxu0 %vm288_vm0, %v10747_v54 }
0x1b58   :  { %6989 = vmatprep.mubr.msk.f32.mxu0 %vm7790_vm5, %v11209_v59 }
0x1b75   :  { %v4745_v24 = vpop.xlane.xlu1 %4744 }
0x1b76   :  { %v4746_v57 = vsub.f32 %v4742_v50, %v4745_v24  ;;  %v5080_v50 = vpop.permute.xlu0 %5079 }
0x1b77   :  { %v5160_v17 = vsel %vm90_vm10, %v5152_v48, %v5080_v50  ;;  %v6001_v48 = vld [vmem:[%s11039_s3 + $0x1e0] sm:$0xff] }
0x1b78   :  { %v4747_v22 = vmul.f32 1.442695, %v4746_v57 }
0x1b79   :  { %v5102_v23 = vpop.permute.xlu1 %5101 }
0x1b7a   :  { %7676 = vpow2.f32 %v4747_v22  ;;  %v5104_v2 = vpop.permute.xlu0 %5103  ;;  %v5167_v4 = vsel %vm92_vm11, %v5159_v60, %v5102_v23  ;;  %v7547_v23 = vpack.c.bf16 %v6002_v62, %v6001_v48  ;;  %v6007_v62 = vld [vmem:[%s11041_s5 + $0x110] sm:$0xff] }
0x1b7b   :  { %v5168_v46 = vsel %vm92_vm11, %v5160_v17, %v5104_v2  ;;  %v5175_v55 = vmul.f32 %v10527_v7, %v5167_v4 }
0x1b7c   :  { %v5176_v41 = vmul.f32 %v10533_v39, %v5168_v46 }
0x1b7e   :  { %v7513_v31 = vpack.c.bf16 %v5176_v41, %v5175_v55  ;;  %v6063_v55 = vld [vmem:[%s11042_s6 + $0x2c] ss:$0 sm:$0xff] }
0x1b84   :  { %v10767_v21 = vpop.eup %7676 }
0x1b85   :  { %6990 = vmatmul.mubr.msk.f32.vlgmr.msra.gmra.mrb[34].mxu0 %vm288_vm0, %v10767_v21 }
0x1b86   :  { %7505 = vmatpush3.bf16.msra.mxu0 %v7504_v37  ;;  %7027 = vmatprep.mubr.msk.f32.mxu0 %vm7790_vm5, %v11209_v59  ;;  %v7510_v37 = vpack.c.bf16 %v5174_v26, %v5173_v15  ;;  %v6004_v15 = vld [vmem:[%s11039_s3 + $0x1f8] sm:$0xff] }
0x1b87   :  { %7506 = vmatprep.subr.bf16.mxu0 %v11211_v35  ;;  %v7551_v17 = vpack.c.bf16 %v6004_v15, %v6003_v11  ;;  %v6025_v11 = vld [vmem:[%s11041_s5 + $0x1a0] sm:$0xff]  ;;  %v6026_v15 = vld [vmem:[%s11041_s5 + $0x1a8] sm:$0xff] }
0x1b8a   :  { %7508 = vmatpush3.bf16.msra.mxu0 %v7507_v52 }
0x1b8b   :  { %7509 = vmatprep.subr.bf16.mxu0 %v11211_v35 }
0x1b8e   :  { %7511 = vmatpush3.bf16.msra.mxu0 %v7510_v37 }
0x1b8f   :  { %7512 = vmatprep.subr.bf16.mxu0 %v11211_v35 }
0x1b92   :  { %7514 = vmatpush3.bf16.msra.mxu0 %v7513_v31 }
0x1b93   :  { %7527 = vmatprep.subr.bf16.mxu0 %v11211_v35 }
0x1b95   :  { %7028 = vmatmul.mubr.msk.f32.vlgmr.msra.gmra.mrb[36].mxu0 %vm288_vm0, %v10269_v43 }
0x1b96   :  { %7065 = vmatprep.mubr.msk.f32.mxu0 %vm7790_vm5, %v11209_v59 }
0x1c2a   :  { %v6953_v58 = vpop.f32.mrb[32].mxu0 }
0x1c2b   :  { %v4388_v30 = vpop.f32.mrb[33].mxu0  ;;  %v5332_v52 = vmul.f32 %v10432_v44, %v6953_v58  ;;  %v5333_v51 = vmul.f32 %v10438_v40, %v6953_v58  ;;  %v5334_v63 = vmul.f32 %v10468_v56, %v6953_v58  ;;  %v5335_v42 = vmul.f32 %v10474_v1, %v6953_v58 }
0x1c2c   :  { %v4824_v28 = vmul.f32 %v10432_v44, %v4388_v30  ;;  %v4825_v33 = vmul.f32 %v10438_v40, %v4388_v30  ;;  %v4826_v43 = vmul.f32 %v10468_v56, %v4388_v30  ;;  %v4827_v38 = vmul.f32 %v10474_v1, %v4388_v30 }
0x1c2d   :  { %v7528_v61 = vpack.c.bf16 %v5333_v51, %v5332_v52  ;;  %v7531_v9 = vpack.c.bf16 %v5335_v42, %v5334_v63  ;;  %v5336_v44 = vmul.f32 %v10498_v47, %v6953_v58  ;;  %v5337_v40 = vmul.f32 %v10504_v36, %v6953_v58 }
0x1c2e   :  { %v7492_v13 = vpack.c.bf16 %v4825_v33, %v4824_v28  ;;  %v7495_v6 = vpack.c.bf16 %v4827_v38, %v4826_v43  ;;  %v4828_v3 = vmul.f32 %v10498_v47, %v4388_v30  ;;  %v4829_v49 = vmul.f32 %v10504_v36, %v4388_v30 }
0x1c2f   :  { %7529 = vmatpush3.bf16.msra.mxu0 %v7528_v61  ;;  %v7534_v56 = vpack.c.bf16 %v5337_v40, %v5336_v44  ;;  %v5338_v1 = vmul.f32 %v10527_v7, %v6953_v58  ;;  %v5339_v29 = vmul.f32 %v10533_v39, %v6953_v58  ;;  %v4830_v34 = vmul.f32 %v10527_v7, %v4388_v30  ;;  %v3015_v40 = vld [vmem:[#allocation2 + $0x88] sm:$0xff] }
0x1c30   :  { %7493 = vmatpush3.bf16.msra.mxu1 %v7492_v13  ;;  %7530 = vmatprep.subr.bf16.mxu0 %v11211_v35  ;;  %v7498_v24 = vpack.c.bf16 %v4829_v49, %v4828_v3  ;;  %v4831_v57 = vmul.f32 %v10533_v39, %v4388_v30  ;;  %v3014_v49 = vld [vmem:[#allocation2 + $0x80] sm:$0xff] }
0x1c31   :  { %7494 = vmatprep.subr.bf16.mxu1 %v11211_v35  ;;  %v7537_v47 = vpack.c.bf16 %v5339_v29, %v5338_v1  ;;  %v3019_v29 = vld [vmem:[#allocation2 + $0xa8] sm:$0xff] }
0x1c32   :  { %v7501_v36 = vpack.c.bf16 %v4831_v57, %v4830_v34  ;;  %v3018_v57 = vld [vmem:[#allocation2 + $0xa0] sm:$0xff] }
0x1c33   :  { %7532 = vmatpush3.bf16.msra.mxu0 %v7531_v9 }
0x1c34   :  { %7496 = vmatpush3.bf16.msra.mxu1 %v7495_v6  ;;  %7533 = vmatprep.subr.bf16.mxu0 %v11211_v35  ;;  %v3017_v6 = vld [vmem:[#allocation2 + $0x98] sm:$0xff] }
0x1c35   :  { %7497 = vmatprep.subr.bf16.mxu1 %v11211_v35  ;;  %v7555_v3 = vpack.c.bf16 %v3017_v6, %v3015_v40 }
0x1c37   :  { %7535 = vmatpush3.bf16.msra.mxu0 %v7534_v56  ;;  %v3016_v56 = vld [vmem:[#allocation2 + $0x90] sm:$0xff] }
0x1c38   :  { %7499 = vmatpush3.bf16.msra.mxu1 %v7498_v24  ;;  %7536 = vmatprep.subr.bf16.mxu0 %v11211_v35  ;;  %v7557_v1 = vpack.c.bf16 %v3016_v56, %v3014_v49  ;;  %v3021_v24 = vld [vmem:[#allocation2 + $0xb8] sm:$0xff] }
0x1c39   :  { %7500 = vmatprep.subr.bf16.mxu1 %v11211_v35  ;;  %v7559_v34 = vpack.c.bf16 %v3021_v24, %v3019_v29 }
0x1c3b   :  { %7538 = vmatpush3.bf16.msra.mxu0 %v7537_v47  ;;  %v3020_v47 = vld [vmem:[#allocation2 + $0xb0] sm:$0xff] }
0x1c3c   :  { %7502 = vmatpush3.bf16.msra.mxu1 %v7501_v36  ;;  %7556 = vmatprep.subr.bf16.mxu0 %v7555_v3  ;;  %v7561_v36 = vpack.c.bf16 %v3020_v47, %v3018_v57  ;;  %v6066_v57 = vld [vmem:[%s11042_s6 + $0x2d] ss:$0 sm:$0xff] }
0x1c3d   :  { %7515 = vmatprep.subr.bf16.mxu1 %v11211_v35 }
0x1c58   :  { %v4818_v22 = vpop.f32.mrb[34].mxu0 }
0x1c59   :  { %7678 = vrcp.f32 %v4818_v22  ;;  %v6991_v20 = vpop.f32.mrb[35].mxu0  ;;  %v3023_v22 = vld [vmem:[#allocation2 + $0xc8] sm:$0xff] }
0x1c5a   :  { %v3025_v20 = vld [vmem:[#allocation2 + $0xd8] sm:$0xff] }
0x1c63   :  { %v7679_v32 = vpop.eup %7678 }
0x1c64   :  { %v4823_v7 = vmul.f32 %v7679_v32, %v10767_v21  ;;  %v7563_v32 = vpack.c.bf16 %v3025_v20, %v3023_v22 }
0x1c66   :  { %7009 = vmatmul.mubr.msk.f32.vlgmr.msra.gmra.mrb[36].mxu1 %vm288_vm0, %v4823_v7  ;;  %v3022_v7 = vld [vmem:[#allocation2 + $0xc0] sm:$0xff] }
0x1c67   :  { %7517 = vmatpush3.bf16.msra.mxu1 %v11218_v25  ;;  %7046 = vmatprep.mubr.msk.f32.mxu1 %vm7790_vm5, %v11209_v59 }
0x1c68   :  { %v5246_v39 = vpop.f32.mrb[36].mxu0  ;;  %7518 = vmatprep.subr.bf16.mxu1 %v11211_v35 }
0x1c69   :  { %v5250_v10 = vmul.f32 0.35355338, %v5246_v39  ;;  %v7029_v14 = vpop.f32.mrb[37].mxu0  ;;  %v3024_v39 = vld [vmem:[#allocation2 + $0xd0] sm:$0xff] }
0x1c6a   :  { %v3027_v14 = vld [vmem:[#allocation2 + $0xe8] sm:$0xff] }
0x1c6b   :  { %v5251_v19 = vsel %vm288_vm0, %v5250_v10, -inf  ;;  %7520 = vmatpush3.bf16.msra.mxu1 %v11221_v53  ;;  %v5997_v53 = vld [vmem:[%s11039_s3 + $0x1c0] sm:$0xff] }
0x1c6c   :  { %5252 = vmax.xlane.f32.xlu1 %v5251_v19  ;;  %7521 = vmatprep.subr.bf16.mxu1 %v11211_v35  ;;  %v3029_v19 = vld [vmem:[#allocation2 + $0xf8] sm:$0xff] }
0x1c6f   :  { %7523 = vmatpush3.bf16.msra.mxu1 %v11222_v0  ;;  %v5999_v0 = vld [vmem:[%s11039_s3 + $0x1d0] sm:$0xff] }
0x1c70   :  { %7524 = vmatprep.subr.bf16.mxu1 %v11211_v35  ;;  %v5998_v35 = vld [vmem:[%s11039_s3 + $0x1c8] sm:$0xff]  ;;  %v7543_v16 = vpack.c.bf16 %v6000_v12, %v5999_v0  ;;  %v6024_v12 = vld [vmem:[%s11041_s5 + $0x198] sm:$0xff] }
0x1c71   :  { %v6006_v0 = vld [vmem:[%s11041_s5 + $0x108] sm:$0xff] }
0x1c73   :  { %7526 = vmatpush3.bf16.msra.mxu1 %v11223_v45  ;;  %v7539_v45 = vpack.c.bf16 %v5998_v35, %v5997_v53  ;;  %v6005_v53 = vld [vmem:[%s11041_s5 + $0x100] sm:$0xff] }
0x1c75   :  { %7540 = vmatprep.subr.bf16.mxu1 %v7539_v45 }
0x1cf9   :  { %v5253_v25 = vpop.xlane.xlu1 %5252 }
0x1cfa   :  { %v5254_v5 = vsub.f32 %v5250_v10, %v5253_v25  ;;  %v7565_v10 = vpack.c.bf16 %v3024_v39, %v3022_v7  ;;  %v3026_v25 = vld [vmem:[#allocation2 + $0xe0] sm:$0xff] }
0x1cfc   :  { %v5255_v27 = vmul.f32 1.442695, %v5254_v5  ;;  %v7567_v5 = vpack.c.bf16 %v3029_v19, %v3027_v14  ;;  %v6018_v14 = vld [vmem:[%s11041_s5 + $0x168] sm:$0xff] }
0x1cfe   :  { %7680 = vpow2.f32 %v5255_v27  ;;  %v3028_v27 = vld [vmem:[#allocation2 + $0xf0] sm:$0xff] }
0x1d08   :  { %v7681_v50 = vpop.eup %7680 }
0x1d09   :  { %7047 = vmatmul.mubr.msk.f32.vlgmr.msra.gmra.mrb[38].mxu1 %vm288_vm0, %v7681_v50 }
0x1d0a   :  { %7542 = vmatpush3.bf16.msra.mxu1 %v7539_v45  ;;  %v6023_v45 = vld [vmem:[%s11041_s5 + $0x190] sm:$0xff] }
0x1d0b   :  { %7544 = vmatprep.subr.bf16.mxu1 %v7543_v16  ;;  %v7575_v48 = vpack.c.bf16 %v6024_v12, %v6023_v45 }
0x1d0e   :  { %7546 = vmatpush3.bf16.msra.mxu1 %v7543_v16  ;;  %v7573_v16 = vpack.c.bf16 %v6006_v0, %v6005_v53  ;;  %v11225_v53 = vld [vmem:[#allocation11_spill] sm:$0xff]  ;;  %v11226_v0 = vld [vmem:[#allocation12_spill] sm:$0xff] }
0x1d0f   :  { %7548 = vmatprep.subr.bf16.mxu1 %v7547_v23  ;;  %v11227_v45 = vsub.s32 1, %v11226_v0 }
0x1d12   :  { %7550 = vmatpush3.bf16.msra.mxu1 %v7547_v23  ;;  %v6008_v23 = vld [vmem:[%s11041_s5 + $0x118] sm:$0xff] }
0x1d13   :  { %7552 = vmatprep.subr.bf16.mxu1 %v7551_v17 }
0x1d16   :  { %7554 = vmatpush3.bf16.msra.mxu1 %v7551_v17  ;;  %v7577_v17 = vpack.c.bf16 %v6008_v23, %v6007_v62 }
0x1d39   :  { %v4901_v8 = vpop.f32.mrb[36].mxu1 }
0x1d3a   :  { %v7010_v21 = vpop.f32.mrb[37].mxu1  ;;  %7084 = vmatprep.mubr.msk.f32.mxu1 %vm288_vm0, %v4901_v8  ;;  %v6021_v8 = vld [vmem:[%s11041_s5 + $0x180] sm:$0xff] }
0x1d3b   :  { %v6022_v21 = vld [vmem:[%s11041_s5 + $0x188] sm:$0xff] }
0x1d3c   :  { %v7571_v35 = vpack.c.bf16 %v6022_v21, %v6021_v8  ;;  %v6037_v21 = vld [vmem:[%s11043_s7 + $0x1] ss:$4 sm:$0x3] }
0x1d3d   :  { %v5546_v12 = vrot.slane %v6037_v21, %v11227_v45 }
0x1d3e   :  { %7572 = vmatprep.subr.bf16.mxu1 %v7571_v35  ;;  %v5542_v35 = vrot.slane %v6037_v21, %v11225_v53  ;;  %v5770_v21 = vld [vmem:[#allocation2 + $0x170] sm:$0xff] }
0x1ddc   :  { %v5326_v2 = vpop.f32.mrb[38].mxu1 }
0x1ddd   :  { %7682 = vrcp.f32 %v5326_v2  ;;  %v7048_v60 = vpop.f32.mrb[39].mxu1  ;;  %v7579_v2 = vpack.c.bf16 %v6026_v15, %v6025_v11 }
0x1dde   :  { %v6009_v60 = vld [vmem:[%s11041_s5 + $0x120] sm:$0xff] }
0x1de7   :  { %v7683_v4 = vpop.eup %7682 }
0x1de8   :  { %v5331_v26 = vmul.f32 %v7683_v4, %v7681_v50  ;;  %v7569_v50 = vpack.c.bf16 %v3028_v27, %v3026_v25  ;;  %v6010_v4 = vld [vmem:[%s11041_s5 + $0x128] sm:$0xff]  ;;  %v6036_v25 = vld [vmem:[%s11041_s5 + $0x1f8] sm:$0xff]  ;;  %v6019_v27 = vld [vmem:[%s11041_s5 + $0x170] sm:$0xff] }
0x1dea   :  { %7066 = vmatmul.mubr.msk.f32.vlgmr.msra.gmra.mrb[38].mxu0 %vm288_vm0, %v5331_v26  ;;  %v6027_v26 = vld [vmem:[%s11041_s5 + $0x1b0] sm:$0xff] }
0x1deb   :  { %5619 = vmatprep.mubr.f32.mxu0 %v11209_v59  ;;  %7558 = vmatpush1.bf16.msra.mxu0 %v7557_v1 }
0x1dec   :  { %7560 = vmatprep.subr.bf16.mxu0 %v7559_v34 }
0x1def   :  { %7562 = vmatpush1.bf16.msra.mxu0 %v7561_v36  ;;  %v6067_v36 = vld [vmem:[%s11042_s6 + $0x2e] ss:$0 sm:$0xff] }
0x1df0   :  { %7564 = vmatprep.subr.bf16.mxu0 %v7563_v32 }
0x1df3   :  { %7566 = vmatpush1.bf16.msra.mxu0 %v7565_v10 }
0x1df4   :  { %7568 = vmatprep.subr.bf16.mxu0 %v7567_v5 }
0x1df7   :  { %7570 = vmatpush1.bf16.msra.mxu0 %v7569_v50  ;;  %v6020_v50 = vld [vmem:[%s11041_s5 + $0x178] sm:$0xff] }
0x1df8   :  { %v7601_v8 = vpack.c.bf16 %v6020_v50, %v6019_v27  ;;  %v5771_v27 = vld [vmem:[#allocation2 + $0x178] sm:$0xff] }
0x1ebd   :  { %v5409_v46 = vpop.f32.mrb[38].mxu0 }
0x1ebe   :  { %v7067_v37 = vpop.f32.mrb[39].mxu0  ;;  %7085 = vmatmul.mubr.msk.f32.vlgmr.msra.gmra.mrb[40].mxu1 %vm288_vm0, %v5409_v46  ;;  %v6028_v46 = vld [vmem:[%s11041_s5 + $0x1b8] sm:$0xff] }
0x1ebf   :  { %7574 = vmatpush3.bf16.msra.mxu1 %v7573_v16  ;;  %v7581_v37 = vpack.c.bf16 %v6010_v4, %v6009_v60 }
0x1ec0   :  { %7576 = vmatprep.subr.bf16.mxu1 %v7575_v48 }
0x1ec3   :  { %7578 = vmatpush3.bf16.msra.mxu1 %v7577_v17 }
0x1ec4   :  { %7580 = vmatprep.subr.bf16.mxu1 %v7579_v2 }
0x1ec7   :  { %7582 = vmatpush3.bf16.msra.mxu1 %v7581_v37 }
0x1f91   :  { %v7086_v41 = vpop.f32.mrb[40].mxu1 }
0x1f92   :  { %v5489_v31 = vpop.f32.mrb[41].mxu1  ;;  %v5495_v58 = vadd.f32 %v7086_v41, %v6063_v55  ;;  %v6011_v41 = vld [vmem:[%s11041_s5 + $0x130] sm:$0xff] }
0x1f93   :  { %v5490_v30 = vadd.f32 %v6063_v55, %v5489_v31  ;;  %v7583_v55 = vpack.c.bf16 %v6028_v46, %v6027_v26  ;;  %v6012_v31 = vld [vmem:[%s11041_s5 + $0x138] sm:$0xff] }
0x1f94   :  { %v5499_v51 = vadd.f32 %v5495_v58, %v10747_v54  ;;  %v6029_v58 = vld [vmem:[%s11041_s5 + $0x1c0] sm:$0xff] }
0x1f95   :  { %v5498_v52 = vadd.f32 %v5490_v30, %v10745_v18  ;;  %v6030_v30 = vld [vmem:[%s11041_s5 + $0x1c8] sm:$0xff]  ;;  %7584 = vmatprep.subr.bf16.mxu1 %v7583_v55 }
0x1f96   :  { %v5503_v33 = vsel %vm288_vm0, %v5499_v51, 0.0  ;;  %v6070_v55 = vld [vmem:[%s11042_s6 + $0x2f] ss:$0 sm:$0xff] }
0x1f97   :  { %v5500_v28 = vsel %vm288_vm0, %v5498_v52, 0.0 }
0x1f98   :  { %5501 = vadd.xlane.f32.xlu0 %v5500_v28  ;;  %v6013_v28 = vld [vmem:[%s11041_s5 + $0x140] sm:$0xff] }
0x1f9c   :  { %5504 = vadd.xlane.f32.xlu0 %v5503_v33  ;;  %v6014_v33 = vld [vmem:[%s11041_s5 + $0x148] sm:$0xff] }
0x2025   :  { %v5502_v61 = vpop.xlane.xlu0 %5501 }
0x2026   :  { %v5506_v63 = vmul.f32 0.015625, %v5502_v61  ;;  %v6031_v61 = vld [vmem:[%s11041_s5 + $0x1d0] sm:$0xff] }
0x2028   :  { %v10873_v42 = vsub.f32 %v5498_v52, %v5506_v63  ;;  %v7585_v52 = vpack.c.bf16 %v6012_v31, %v6011_v41  ;;  %v6032_v63 = vld [vmem:[%s11041_s5 + $0x1d8] sm:$0xff] }
0x2029   :  { %v5505_v13 = vpop.xlane.xlu0 %5504 }
0x202a   :  { %v5507_v43 = vmul.f32 0.015625, %v5505_v13  ;;  %v5510_v38 = vmul.f32 %v10873_v42, %v10873_v42  ;;  %7586 = vmatpush3.bf16.msra.mxu1 %v7585_v52  ;;  %v7589_v13 = vpack.c.bf16 %v6014_v33, %v6013_v28 }
0x202c   :  { %v10877_v9 = vsub.f32 %v5499_v51, %v5507_v43  ;;  %v5512_v18 = vsel %vm288_vm0, %v5510_v38, 0.0  ;;  %v7587_v51 = vpack.c.bf16 %v6030_v30, %v6029_v58  ;;  %v7591_v43 = vpack.c.bf16 %v6032_v63, %v6031_v61  ;;  %v6015_v38 = vld [vmem:[%s11041_s5 + $0x150] sm:$0xff] }
0x202d   :  { %5513 = vadd.xlane.f32.xlu1 %v5512_v18  ;;  %v6016_v18 = vld [vmem:[%s11041_s5 + $0x158] sm:$0xff] }
0x202e   :  { %v5511_v54 = vmul.f32 %v10877_v9, %v10877_v9  ;;  %7588 = vmatprep.subr.bf16.mxu1 %v7587_v51  ;;  %v7593_v40 = vpack.c.bf16 %v6016_v18, %v6015_v38 }
0x202f   :  { %7590 = vmatpush3.bf16.msra.mxu1 %v7589_v13 }
0x2030   :  { %v5515_v44 = vsel %vm288_vm0, %v5511_v54, 0.0  ;;  %v6033_v54 = vld [vmem:[%s11041_s5 + $0x1e0] sm:$0xff]  ;;  %7592 = vmatprep.subr.bf16.mxu1 %v7591_v43 }
0x2031   :  { %5516 = vadd.xlane.f32.xlu0 %v5515_v44  ;;  %v6034_v44 = vld [vmem:[%s11041_s5 + $0x1e8] sm:$0xff] }
0x2032   :  { %v7595_v6 = vpack.c.bf16 %v6034_v44, %v6033_v54 }
0x2033   :  { %7594 = vmatpush3.bf16.msra.mxu1 %v7593_v40 }
0x2034   :  { %7596 = vmatprep.subr.bf16.mxu1 %v7595_v6 }
0x20ba   :  { %v5514_v3 = vpop.xlane.xlu1 %5513 }
0x20bb   :  { %v5518_v49 = vmul.f32 0.015625, %v5514_v3 }
0x20bd   :  { %v5520_v56 = vadd.f32 1e-05, %v5518_v49 }
0x20be   :  { %v5517_v1 = vpop.xlane.xlu0 %5516 }
0x20bf   :  { %7684 = vrsqrt.f32 %v5520_v56  ;;  %v5519_v29 = vmul.f32 0.015625, %v5517_v1  ;;  %v5757_v1 = vld [vmem:[#allocation2 + $0x108] sm:$0xff] }
0x20c1   :  { %v5521_v24 = vadd.f32 1e-05, %v5519_v29  ;;  %v5759_v29 = vld [vmem:[#allocation2 + $0x118] sm:$0xff] }
0x20c3   :  { %7686 = vrsqrt.f32 %v5521_v24  ;;  %v7603_v24 = vpack.c.bf16 %v5759_v29, %v5757_v1 }
0x20c5   :  { %7604 = vmatprep.subr.bf16.mxu0 %v7603_v24 }
0x20c9   :  { %v7685_v34 = vpop.eup %7684 }
0x20ca   :  { %v5524_v47 = vmul.f32 %v7685_v34, %v10873_v42  ;;  %v6017_v42 = vld [vmem:[%s11041_s5 + $0x160] sm:$0xff] }
0x20cb   :  { %v7597_v19 = vpack.c.bf16 %v6018_v14, %v6017_v42  ;;  %v5756_v34 = vld [vmem:[#allocation2 + $0x100] sm:$0xff]  ;;  %v5767_v42 = vld [vmem:[#allocation2 + $0x158] sm:$0xff] }
0x20cc   :  { %v5530_v22 = vmul.f32 %v6066_v57, %v5524_v47 }
0x20cd   :  { %v7687_v20 = vpop.eup %7686  ;;  %7598 = vmatpush3.bf16.msra.mxu1 %v7597_v19  ;;  %v5764_v19 = vld [vmem:[#allocation2 + $0x140] sm:$0xff] }
0x20ce   :  { %v5536_v32 = vadd.f32 %v6067_v36, %v5530_v22  ;;  %v5525_v7 = vmul.f32 %v7687_v20, %v10877_v9  ;;  %v6035_v9 = vld [vmem:[%s11041_s5 + $0x1f0] sm:$0xff]  ;;  %v5763_v22 = vld [vmem:[#allocation2 + $0x138] sm:$0xff] }
0x20cf   :  { %v7599_v5 = vpack.c.bf16 %v6036_v25, %v6035_v9  ;;  %v5766_v9 = vld [vmem:[#allocation2 + $0x150] sm:$0xff] }
0x20d0   :  { %6068 = vmatmul.mubr.msk.f32.vlgmr.msra.gmra.mrb[40].mxu0 %vm288_vm0, %v5536_v32  ;;  %v5531_v39 = vmul.f32 %v6066_v57, %v5525_v7  ;;  %v5758_v57 = vld [vmem:[#allocation2 + $0x110] sm:$0xff]  ;;  %v7613_v25 = vpack.c.bf16 %v5766_v9, %v5764_v19 }
0x20d1   :  { %5625 = vmatprep.mubr.f32.mxu0 %v11209_v59  ;;  %7600 = vmatprep.subr.bf16.mxu1 %v7599_v5  ;;  %v7605_v47 = vpack.c.bf16 %v5758_v57, %v5756_v34  ;;  %v5762_v7 = vld [vmem:[#allocation2 + $0x130] sm:$0xff]  ;;  %v5769_v5 = vld [vmem:[#allocation2 + $0x168] sm:$0xff] }
0x20d2   :  { %v5537_v10 = vadd.f32 %v6067_v36, %v5531_v39  ;;  %7602 = vmatpush3.bf16.msra.mxu1 %v7601_v8  ;;  %v5761_v36 = vld [vmem:[#allocation2 + $0x128] sm:$0xff]  ;;  %v7615_v50 = vpack.c.bf16 %v5771_v27, %v5769_v5  ;;  %v5768_v8 = vld [vmem:[#allocation2 + $0x160] sm:$0xff] }
0x20d3   :  { %7606 = vmatpush1.bf16.msra.mxu0 %v7605_v47  ;;  %v7607_v20 = vpack.c.bf16 %v5763_v22, %v5761_v36 }
0x20d4   :  { %6069 = vmatmul.mubr.msk.f32.gmra.mrb[42].mxu0 %vm288_vm0, %v5537_v10 }
0x20d5   :  { %5850 = vmatprep.mubr.f32.mxu0 %v11209_v59  ;;  %7608 = vmatprep.subr.bf16.mxu0 %v7607_v20 }
0x21a3   :  { %v5621_v16 = vpop.f32.mrb[40].mxu0 }
0x21a4   :  { %v5622_v48 = vadd.f32 %v5621_v16, %v5542_v35  ;;  %v5623_v62 = vpop.f32.mrb[41].mxu0 }
0x21a5   :  { %v5624_v23 = vadd.f32 %v5623_v62, %v5546_v12 }
0x21a6   :  { %v5632_v17 = vmax.f32 %v5622_v48, 0.0 }
0x21a7   :  { %v5633_v11 = vmax.f32 %v5624_v23, 0.0  ;;  %v5627_v15 = vpop.f32.mrb[42].mxu0 }
0x21a8   :  { %v5628_v2 = vadd.f32 %v5627_v15, %v5542_v35  ;;  %v5629_v60 = vpop.f32.mrb[43].mxu0  ;;  %v7617_v35 = vpack.c.bf16 %v5770_v21, %v5768_v8 }
0x21a9   :  { %v5630_v4 = vadd.f32 %v5629_v60, %v5546_v12  ;;  %5704 = vmatprep.mubr.f32.mxu1 %v5633_v11  ;;  %v6071_v11 = vld [vmem:[%s11042_s6 + $0x30] ss:$0 sm:$0xff] }
0x21aa   :  { %5705 = vmatmul.mubr.f32.vlgmr.msra.gmra.mrb[42].mxu1 %v5632_v17  ;;  %v5634_v46 = vmax.f32 %v5628_v2, 0.0  ;;  %v6072_v17 = vld [vmem:[%s11042_s6 + $0x31] ss:$0 sm:$0xff]  ;;  %s7791_s6 = smov [#allocation5]  }
0x21ab   :  { %v5635_v26 = vmax.f32 %v5630_v4, 0.0 }
0x21ad   :  { %5709 = vmatprep.mubr.f32.mxu1 %v5635_v26 }
0x21ae   :  { %5710 = vmatmul.mubr.f32.gmra.mrb[44].mxu1 %v5634_v46 }
0x227d   :  { %v6454_v37 = vpop.f32.mrb[42].mxu1 }
0x227e   :  { %v6455_v41 = vpop.f32.mrb[43].mxu1 }
0x227f   :  { %v6456_v31 = vadd.f32 %v6455_v41, %v6454_v37 }
0x2281   :  { %v5707_v58 = vadd.f32 %v6456_v31, %v6070_v55  ;;  %v6457_v30 = vpop.f32.mrb[44].mxu1 }
0x2282   :  { %v6458_v52 = vpop.f32.mrb[45].mxu1 }
0x2283   :  { %v6459_v51 = vadd.f32 %v6458_v52, %v6457_v30  ;;  %v5715_v28 = vadd.f32 %v5707_v58, %v5536_v32  ;;  %v5760_v32 = vld [vmem:[#allocation2 + $0x120] sm:$0xff] }
0x2284   :  { %v7609_v39 = vpack.c.bf16 %v5762_v7, %v5760_v32 }
0x2285   :  { %v5712_v33 = vadd.f32 %v6459_v51, %v6070_v55  ;;  %v5717_v61 = vsel %vm288_vm0, %v5715_v28, 0.0  ;;  %v6073_v55 = vld [vmem:[%s11043_s7 + $0x2] ss:$4 sm:$0x3]  ;;  %s5890_s7 = sshll.u32 %s7791_s6, 4  ;;  %s5891_s7 = int_to_ptr.vmem [resolvable:$true] %s5890_s7 }
0x2286   :  { %5718 = vadd.xlane.f32.xlu1 %v5717_v61  ;;  %7610 = vmatpush1.bf16.msra.mxu0 %v7609_v39  ;;  %v5778_v41 = vrot.slane %v6073_v55, %v11225_v53  ;;  %s7752_s12 = scalar_lea.vmem %s5891_s7, 256  ;;  %p7757_p9 = scmp.lt.s32.totalorder %s5891_s7, %s5891_s7 }
0x2287   :  { %v5716_v63 = vadd.f32 %v5712_v33, %v5537_v10  ;;  %v5765_v10 = vld [vmem:[#allocation2 + $0x148] sm:$0xff]  ;;  %p7753_p8 = scmp.ne.s32.totalorder %s5891_s7, %s7752_s12  ;;  %p7758_p10 = scmp.lt.s32.totalorder %s7752_s12, %s7752_s12 }
0x2288   :  { %v7611_v14 = vpack.c.bf16 %v5767_v42, %v5765_v10 }
0x2289   :  { %v5720_v13 = vsel %vm288_vm0, %v5716_v63, 0.0  ;;  %p7759_p11 = por %p7758_p10, %p7757_p9 }
0x228a   :  { %5721 = vadd.xlane.f32.xlu0 %v5720_v13  ;;  %7612 = vmatprep.subr.bf16.mxu0 %v7611_v14 }
0x228b   :  { %7614 = vmatpush1.bf16.msra.mxu0 %v7613_v25  ;;  %p7760_p12 = pnand %p7759_p11, %p7753_p8 }
0x228c   :  { %7616 = vmatprep.subr.bf16.mxu0 %v7615_v50 }
0x228f   :  { %7618 = vmatpush1.bf16.msra.mxu0 %v7617_v35 }
0x2313   :  { %v5719_v43 = vpop.xlane.xlu1 %5718 }
0x2314   :  { %v5723_v38 = vmul.f32 0.015625, %v5719_v43 }
0x2316   :  { %v5725_v18 = vsub.f32 %v5715_v28, %v5723_v38 }
0x2317   :  { %v5722_v54 = vpop.xlane.xlu0 %5721 }
0x2318   :  { %v5724_v44 = vmul.f32 0.015625, %v5722_v54  ;;  %v5727_v40 = vmul.f32 %v5725_v18, %v5725_v18 }
0x231a   :  { %v5726_v6 = vsub.f32 %v5716_v63, %v5724_v44  ;;  %v5729_v3 = vsel %vm288_vm0, %v5727_v40, 0.0 }
0x231b   :  { %5730 = vadd.xlane.f32.xlu1 %v5729_v3 }
0x231c   :  { %v5728_v49 = vmul.f32 %v5726_v6, %v5726_v6 }
0x231e   :  { %v5732_v56 = vsel %vm288_vm0, %v5728_v49, 0.0 }
0x231f   :  { %5733 = vadd.xlane.f32.xlu0 %v5732_v56 }
0x23a8   :  { %v5731_v0 = vpop.xlane.xlu1 %5730 }
0x23a9   :  { %v5735_v45 = vmul.f32 0.015625, %v5731_v0 }
0x23ab   :  { %v5737_v12 = vadd.f32 1e-05, %v5735_v45 }
0x23ac   :  { %v5734_v16 = vpop.xlane.xlu0 %5733 }
0x23ad   :  { %7688 = vrsqrt.f32 %v5737_v12  ;;  %v5736_v48 = vmul.f32 0.015625, %v5734_v16 }
0x23af   :  { %v5738_v62 = vadd.f32 1e-05, %v5736_v48 }
0x23b1   :  { %7690 = vrsqrt.f32 %v5738_v62 }
0x23b7   :  { %v7689_v23 = vpop.eup %7688 }
0x23b8   :  { %v5741_v15 = vmul.f32 %v7689_v23, %v5725_v18 }
0x23ba   :  { %v5747_v2 = vmul.f32 %v6071_v11, %v5741_v15 }
0x23bb   :  { %v7691_v60 = vpop.eup %7690 }
0x23bc   :  { %v5753_v4 = vadd.f32 %v6072_v17, %v5747_v2  ;;  %v5742_v26 = vmul.f32 %v7691_v60, %v5726_v6 }
0x23be   :  { %6074 = vmatmul.mubr.msk.f32.vlgmr.msra.gmra.mrb[44].mxu0 %vm288_vm0, %v5753_v4  ;;  %v5748_v46 = vmul.f32 %v6071_v11, %v5742_v26 }
0x23bf   :  { %5855 = vmatprep.mubr.f32.mxu0 %v11209_v59 }
0x23c0   :  { %v5754_v37 = vadd.f32 %v6072_v17, %v5748_v46 }
0x23c2   :  { %6075 = vmatmul.mubr.msk.f32.gmra.mrb[46].mxu0 %vm288_vm0, %v5754_v37 }
0x2491   :  { %v5852_v31 = vpop.f32.mrb[44].mxu0 }
0x2492   :  { %v5853_v58 = vadd.f32 %v5852_v31, %v5778_v41  ;;  %v5854_v30 = vpop.f32.mrb[45].mxu0 }
0x2494   :  { %v5861_v52 = vsel %vm82_vm1, %v5853_v58, -inf }
0x2495   :  { %v5857_v51 = vpop.f32.mrb[46].mxu0  ;;  %5862 = vmax.xlane.f32.xlu1 %v5861_v52 }
0x2496   :  { %v5858_v28 = vadd.f32 %v5857_v51, %v5778_v41  ;;  %v5859_v33 = vpop.f32.mrb[47].mxu0 }
0x2498   :  { %v5864_v59 = vsel %vm82_vm1, %v5858_v28, -inf }
0x2499   :  { %5865 = vmax.xlane.f32.xlu0 %v5864_v59 }
0x2522   :  { %v5863_v61 = vpop.xlane.xlu1 %5862 }
0x2523   :  { %v5867_v63 = vsub.f32 %v5853_v58, %v5863_v61 }
0x2525   :  { %v5869_v13 = vmul.f32 1.442695, %v5867_v63 }
0x2526   :  { %v5866_v43 = vpop.xlane.xlu0 %5865 }
0x2527   :  { %7692 = vpow2.f32 %v5869_v13  ;;  %v5868_v38 = vsub.f32 %v5858_v28, %v5866_v43 }
0x2529   :  { %v5871_v18 = vmul.f32 1.442695, %v5868_v38 }
0x252b   :  { %7694 = vpow2.f32 %v5871_v18 }
0x2531   :  { %v7693_v53 = vpop.eup %7692 }
0x2532   :  { %v5873_v54 = vsel %vm82_vm1, %v7693_v53, 0.0 }
0x2533   :  { %5874 = vadd.xlane.f32.xlu1 %v5873_v54 }
0x2535   :  { %v7695_v44 = vpop.eup %7694 }
0x2536   :  { %v5876_v40 = vsel %vm82_vm1, %v7695_v44, 0.0 }
0x2537   :  { %5877 = vadd.xlane.f32.xlu0 %v5876_v40 }
0x25c0   :  { %v5875_v6 = vpop.xlane.xlu1 %5874 }
0x25c1   :  { %7696 = vrcp.f32 %v5875_v6 }
0x25c4   :  { %v5878_v3 = vpop.xlane.xlu0 %5877 }
0x25c5   :  { %7698 = vrcp.f32 %v5878_v3 }
0x25cb   :  { %v7697_v49 = vpop.eup %7696 }
0x25cc   :  { %v5880_v56 = vmul.f32 %v7697_v49, %v7693_v53 }
0x25ce   :  { %5883 = vst.msk [vmem:[#allocation5] sm:$0xff] %vm82_vm1, %v5880_v56 }
0x25cf   :  { %v7699_v1 = vpop.eup %7698 }
0x25d0   :  { %v5882_v29 = vmul.f32 %v7699_v1, %v7695_v44 }
0x25d2   :  { %5884 = vst.msk [vmem:[#allocation5 + $0x8] sm:$0xff] %vm82_vm1, %v5882_v29 }
0x25d3   :  { %7763 = shalt.err (!%p7760_p12)
}
0x25d4   :  { %s7764_s15 = scalar_lea.hbm %s11044_s8, 256 }
0x25d5   :  { %p7765_p13 = scmp.ne.s32.totalorder %s11044_s8, %s7764_s15  ;;  %p7768_p0 = scmp.lt.u32.totalorder %s7764_s15, %s11044_s8 }
0x25d7   :  { %p7770_p1 = pnand %p7768_p0, %p7765_p13 }
0x25d9   :  { %7773 = shalt.err (!%p7770_p1)
}
0x25da   :  { %s7792_s26 = smov 128  }
0x25db   :  { %5896 = dma.vmem_to_hbm [thread:$0]  %s5891_s7, 256, %s11044_s8, [#allocation4], %s7792_s26, %s7792_s26, %s7783_s0  }
0x25dc   :  { %7776 = dma.done.wait [#allocation4], 256  }
0x25dd   :  { %7777 = vsyncadd [#allocation4], 4294967040 }
0x25de   :  { %5900 = vsyncpa [#allocation3], 1 }
0x25df   :  { %5901 = vsyncpa [#allocation4], 1 }

</bundles_post_ra>
